<compile_context>
chip_gen: v7x
topology: tpu7x:2x2x1
jax: 0.10.0
libtpu: 0.0.40
codegen_flags: <defaults>
</compile_context>

<pallas_src>
import functools

import jax
import jax.numpy as jnp
from jax.experimental import pallas as pl
from jax.experimental.pallas import tpu as pltpu


def _round_up(x, m):
    return (x + m - 1) // m * m


def _pick_tile(total, preferred, multiple=128):
    """Largest multiple-of-`multiple` divisor of `total` that is <= preferred."""
    best = multiple
    t = multiple
    while t <= min(total, preferred):
        if total % t == 0:
            best = t
        t += multiple
    return best


# ----------------------------- Pallas kernels ------------------------------

def _fused_matmul_kernel(x_ref, w_ref, scale_ref, shift_ref, o_ref, acc_ref, *, relu):
    # Grid = (M tiles, K tiles); K is the reduction axis ("arbitrary").
    # bf16 operands on the MXU, f32 accumulation, f32 BN epilogue (+ReLU).
    @pl.when(pl.program_id(1) == 0)
    def _():
        acc_ref[...] = jnp.zeros_like(acc_ref)

    acc_ref[...] += jnp.dot(x_ref[...], w_ref[...],
                            preferred_element_type=jnp.float32)

    @pl.when(pl.program_id(1) == pl.num_programs(1) - 1)
    def _():
        y = acc_ref[...] * scale_ref[...] + shift_ref[...]
        if relu:
            y = jnp.maximum(y, 0.0)
        o_ref[...] = y.astype(o_ref.dtype)


def _fused_matmul_res_kernel(x_ref, w_ref, scale_ref, shift_ref, res_ref, o_ref,
                             acc_ref, *, relu):
    # Same as above, plus the fused residual add before the final ReLU
    # (the `out += identity; out = relu(out)` tail of a Bottleneck block).
    @pl.when(pl.program_id(1) == 0)
    def _():
        acc_ref[...] = jnp.zeros_like(acc_ref)

    acc_ref[...] += jnp.dot(x_ref[...], w_ref[...],
                            preferred_element_type=jnp.float32)

    @pl.when(pl.program_id(1) == pl.num_programs(1) - 1)
    def _():
        y = acc_ref[...] * scale_ref[...] + shift_ref[...] + res_ref[...]
        if relu:
            y = jnp.maximum(y, 0.0)
        o_ref[...] = y.astype(o_ref.dtype)


def _max9_kernel(x_ref, o_ref):
    # x_ref: (9, tr, 128). Pairwise maxima over aligned (tr,128) tiles -> pure VPU work.
    m = x_ref[0]
    for t in range(1, 9):
        m = jnp.maximum(m, x_ref[t])
    o_ref[...] = m


# ----------------------------- Pallas wrappers ------------------------------

def fused_matmul(x, w, scale, shift, residual=None, relu=True):
    """x: (M, K), w: (K, Cout), scale/shift: (Cout,), residual: (M, Cout) or None.

    Returns (M, Cout) f32.  Internally pads M up to the tile size, and K / Cout up to
    multiples of 128 (lane-dense, MXU-aligned); padding is sliced off afterwards.
    """
    M, K = x.shape
    Cout = w.shape[1]
    Kp = _round_up(K, 128)
    Cp = _round_up(Cout, 128)

    tm = 256
    m8 = _round_up(M, 8)
    if m8 < tm:
        tm = m8
    Mp = _round_up(M, tm)
    tk = _pick_tile(Kp, 512)

    # bf16 MXU operands (accumulation stays f32 inside the kernel).
    xb = x.astype(jnp.bfloat16)
    wb = w.astype(jnp.bfloat16)
    if (Mp, Kp) != (M, K):
        xb = jnp.pad(xb, ((0, Mp - M), (0, Kp - K)))
    if (Kp, Cp) != (K, Cout):
        wb = jnp.pad(wb, ((0, Kp - K), (0, Cp - Cout)))
    scale2 = jnp.pad(scale.astype(jnp.float32), (0, Cp - Cout)).reshape(1, Cp)
    shift2 = jnp.pad(shift.astype(jnp.float32), (0, Cp - Cout)).reshape(1, Cp)

    in_specs = [
        pl.BlockSpec((tm, tk), lambda i, k: (i, k)),
        pl.BlockSpec((tk, Cp), lambda i, k: (k, 0)),
        pl.BlockSpec((1, Cp), lambda i, k: (0, 0)),
        pl.BlockSpec((1, Cp), lambda i, k: (0, 0)),
    ]
    args = [xb, wb, scale2, shift2]
    if residual is not None:
        r = residual.astype(jnp.float32)
        r = jnp.pad(r, ((0, Mp - M), (0, Cp - Cout)))
        in_specs.append(pl.BlockSpec((tm, Cp), lambda i, k: (i, 0)))
        args.append(r)
        kernel = functools.partial(_fused_matmul_res_kernel, relu=relu)
    else:
        kernel = functools.partial(_fused_matmul_kernel, relu=relu)

    out = pl.pallas_call(
        kernel,
        out_shape=jax.ShapeDtypeStruct((Mp, Cp), jnp.float32),
        grid=(Mp // tm, Kp // tk),
        in_specs=in_specs,
        out_specs=pl.BlockSpec((tm, Cp), lambda i, k: (i, 0)),
        scratch_shapes=[pltpu.VMEM((tm, Cp), jnp.float32)],
        compiler_params=pltpu.CompilerParams(
            dimension_semantics=("parallel", "arbitrary"),
            vmem_limit_bytes=32 * 1024 * 1024,
        ),
    )(*args)
    return out[:M, :Cout]


def maxpool_3x3_s2(x):
    """MaxPool2d(kernel_size=3, stride=2, padding=1) on NHWC, tiled Pallas max."""
    N, H, W, C = x.shape
    pad, stride, k = 1, 2, 3
    Ho = (H + 2 * pad - k) // stride + 1
    Wo = (W + 2 * pad - k) // stride + 1
    neg = jnp.finfo(x.dtype).min
    xp = jnp.pad(x, ((0, 0), (pad, pad), (pad, pad), (0, 0)), constant_values=neg)

    taps = [xp[:, i:i + stride * Ho:stride, j:j + stride * Wo:stride, :]
            for i in range(k) for j in range(k)]
    P = N * Ho * Wo * C
    stacked = jnp.stack(taps, axis=0).reshape(k * k, P)

    lanes = 128
    R = pl.cdiv(P, lanes)
    tr = 256
    r8 = _round_up(R, 8)
    if r8 < tr:
        tr = r8
    R_pad = _round_up(R, tr)
    P_pad = R_pad * lanes
    if P_pad != P:
        stacked = jnp.pad(stacked, ((0, 0), (0, P_pad - P)), constant_values=neg)
    stacked = stacked.reshape(k * k, R_pad, lanes)

    out = pl.pallas_call(
        _max9_kernel,
        out_shape=jax.ShapeDtypeStruct((R_pad, lanes), x.dtype),
        grid=(R_pad // tr,),
        in_specs=[pl.BlockSpec((k * k, tr, lanes), lambda r: (0, r, 0))],
        out_specs=pl.BlockSpec((tr, lanes), lambda r: (r, 0)),
        compiler_params=pltpu.CompilerParams(dimension_semantics=("parallel",)),
    )(stacked)
    return out.reshape(R_pad * lanes)[:P].reshape(N, Ho, Wo, C)


# ----------------------------- conv / block glue ------------------------------

def im2col_nhwc(x, kh, kw, stride, padding):
    """NHWC -> (N*Ho*Wo, kh*kw*Cin), K order = (kh, kw, Cin)."""
    N, H, W, C = x.shape
    xp = jnp.pad(x, ((0, 0), (padding, padding), (padding, padding), (0, 0)))
    Ho = (H + 2 * padding - kh) // stride + 1
    Wo = (W + 2 * padding - kw) // stride + 1
    cols = [xp[:, i:i + stride * Ho:stride, j:j + stride * Wo:stride, :]
            for i in range(kh) for j in range(kw)]
    cols = jnp.concatenate(cols, axis=-1)  # (N, Ho, Wo, kh*kw*C)
    return cols.reshape(N * Ho * Wo, kh * kw * C), Ho, Wo


def conv_bn(x, weight, bn, stride, padding, relu=True, residual=None):
    """Conv2d(bias=False) + BatchNorm2d(eval) [+ residual] [+ ReLU], NHWC in/out."""
    Cout, Cin, kh, kw = weight.shape
    N = x.shape[0]
    scale = bn["gamma"] / jnp.sqrt(bn["var"] + 1e-5)
    shift = bn["beta"] - bn["mean"] * scale

    if kh == 1 and kw == 1:
        # 1x1 conv: no im2col, just an (optionally strided) channel matmul.
        xs = x if stride == 1 else x[:, ::stride, ::stride, :]
        Ho, Wo = xs.shape[1], xs.shape[2]
        cols = xs.reshape(N * Ho * Wo, Cin)
        wmat = weight.reshape(Cout, Cin).T  # (Cin, Cout)
    else:
        cols, Ho, Wo = im2col_nhwc(x, kh, kw, stride, padding)
        wmat = weight.transpose(2, 3, 1, 0).reshape(kh * kw * Cin, Cout)

    res2d = None
    if residual is not None:
        res2d = residual.reshape(N * Ho * Wo, Cout)
    y = fused_matmul(cols, wmat, scale, shift, residual=res2d, relu=relu)
    return y.reshape(N, Ho, Wo, Cout)


def bottleneck(x, p, stride):
    """torchvision-style Bottleneck: 1x1 -> 3x3(stride) -> 1x1, expansion=4 (NHWC)."""
    identity = x
    out = conv_bn(x, p["conv1_w"], p["bn1"], stride=1, padding=0, relu=True)
    out = conv_bn(out, p["conv2_w"], p["bn2"], stride=stride, padding=1, relu=True)
    if "convd_w" in p:  # downsample branch
        identity = conv_bn(x, p["convd_w"], p["bnd"], stride=stride, padding=0, relu=False)
    out = conv_bn(out, p["conv3_w"], p["bn3"], stride=1, padding=0, relu=True,
                  residual=identity)
    return out


# ----------------------------- parameter init ------------------------------

def init_bn(key, c):
    k1, k2, k3, k4 = jax.random.split(key, 4)
    return dict(
        gamma=jax.random.uniform(k1, (c,), jnp.float32, 0.5, 1.5),
        beta=jax.random.normal(k2, (c,), jnp.float32) * 0.1,
        mean=jax.random.normal(k3, (c,), jnp.float32) * 0.1,
        var=jax.random.uniform(k4, (c,), jnp.float32, 0.5, 1.5),
    )


def init_conv(key, cout, cin, kh, kw):
    fan_in = cin * kh * kw
    return jax.random.normal(key, (cout, cin, kh, kw), jnp.float32) * (2.0 / fan_in) ** 0.5


def init_e_resnet(key, base=16, blocks=(2, 1, 1, 1)):
    """Small ResNet encoder with Bottleneck structure (expansion=4, strides 1,2,2,2)."""
    expansion = 4
    keys = iter(jax.random.split(key, 256))
    params = {
        "conv1_w": init_conv(next(keys), base, 3, 7, 7),
        "bn1": init_bn(next(keys), base),
    }
    widths = [base, base * 2, base * 4, base * 8]
    strides = [1, 2, 2, 2]
    in_c = base
    layers = []
    for li in range(4):
        mid = widths[li]
        out_c = mid * expansion
        blist = []
        for bi in range(blocks[li]):
            s = strides[li] if bi == 0 else 1
            bp = {
                "conv1_w": init_conv(next(keys), mid, in_c, 1, 1),
                "bn1": init_bn(next(keys), mid),
                "conv2_w": init_conv(next(keys), mid, mid, 3, 3),
                "bn2": init_bn(next(keys), mid),
                "conv3_w": init_conv(next(keys), out_c, mid, 1, 1),
                "bn3": init_bn(next(keys), out_c),
            }
            if s != 1 or in_c != out_c:
                bp["convd_w"] = init_conv(next(keys), out_c, in_c, 1, 1)
                bp["bnd"] = init_bn(next(keys), out_c)
            blist.append((bp, s))
            in_c = out_c
        layers.append(blist)
    params["layers"] = layers
    return params


# ----------------------------- E_resnet forward ------------------------------

def e_resnet_forward(params, x_nchw):
    # One layout change at the boundary: NCHW (PyTorch) -> NHWC (internal).
    x = jnp.transpose(x_nchw, (0, 2, 3, 1))
    # conv1 -> bn1 -> relu
    x = conv_bn(x, params["conv1_w"], params["bn1"], stride=2, padding=3, relu=True)
    # maxpool 3x3 / s2 / p1
    x = maxpool_3x3_s2(x)
    feats = []
    for layer in params["layers"]:
        for bp, s in layer:
            x = bottleneck(x, bp, s)
        feats.append(jnp.transpose(x, (0, 3, 1, 2)))  # back to NCHW like the PyTorch module
    return tuple(feats)  # (x_block1, x_block2, x_block3, x_block4)


if __name__ == "__main__":
    key = jax.random.PRNGKey(0)
    kp, kx = jax.random.split(key)
    params = init_e_resnet(kp, base=16, blocks=(2, 1, 1, 1))
    x = jax.random.normal(kx, (2, 3, 32, 32), jnp.float32)  # NCHW, like PyTorch

    fwd = jax.jit(lambda inp: e_resnet_forward(params, inp))
    outs = jax.block_until_ready(fwd(x))

    assert outs[0].shape == (2, 64, 8, 8)
    assert outs[1].shape == (2, 128, 4, 4)
    assert outs[2].shape == (2, 256, 2, 2)
    assert outs[3].shape == (2, 512, 1, 1)
    assert all(jnp.all(jnp.isfinite(o)) for o in outs)
    print("KERNEL_OK")
</pallas_src>

<mosaic_0001>
module attributes {stable_mosaic.version = 11 : i64} {
  func.func @_fused_matmul_kernel(%arg0: i32, %arg1: i32, %arg2: memref<256x256xbf16, #tpu.memory_space<vmem>>, %arg3: memref<256x128xbf16, #tpu.memory_space<vmem>>, %arg4: memref<1x128xf32, #tpu.memory_space<vmem>>, %arg5: memref<1x128xf32, #tpu.memory_space<vmem>>, %arg6: memref<256x128xf32, #tpu.memory_space<vmem>>, %arg7: memref<256x128xf32, #tpu.memory_space<vmem>>) attributes {dimension_semantics = [#tpu.dimension_semantics<parallel>, #tpu.dimension_semantics<arbitrary>], iteration_bounds = array<i64: 2, 1>, scalar_prefetch = 0 : i64, scratch_operands = 1 : i64, tpu.core_type = #tpu.core_type<tc>, window_params = [{transform_indices = @transform_0, window_bounds = array<i64: 256, 256>}, {transform_indices = @transform_1, window_bounds = array<i64: 256, 128>}, {pipeline_mode = #tpu.pipeline_mode<synchronous>, transform_indices = @transform_2, window_bounds = array<i64: 1, 128>}, {pipeline_mode = #tpu.pipeline_mode<synchronous>, transform_indices = @transform_3, window_bounds = array<i64: 1, 128>}, {transform_indices = @transform_4, window_bounds = array<i64: 256, 128>}]} {
    %c0_i32 = arith.constant 0 : i32
    %0 = arith.cmpi eq, %arg1, %c0_i32 : i32
    %1 = arith.extui %0 : i1 to i32
    %c0_i32_0 = arith.constant 0 : i32
    %2 = arith.cmpi ne, %1, %c0_i32_0 : i32
    scf.if %2 {
      %cst_10 = arith.constant 0.000000e+00 : f32
      %12 = vector.broadcast %cst_10 : f32 to vector<256x128xf32>
      %c0_11 = arith.constant 0 : index
      %c0_12 = arith.constant 0 : index
      %13 = vector.load %arg7[%c0_11, %c0_12] : memref<256x128xf32, #tpu.memory_space<vmem>>, vector<256x128xf32>
      tpu.vector_store %arg7[%c0_11, %c0_12], %12 {strides = array<i32>} : memref<256x128xf32, #tpu.memory_space<vmem>>, vector<256x128xf32>,
    } else {
    }
    %c0 = arith.constant 0 : index
    %c0_1 = arith.constant 0 : index
    %3 = vector.load %arg7[%c0, %c0_1] : memref<256x128xf32, #tpu.memory_space<vmem>>, vector<256x128xf32>
    %c0_2 = arith.constant 0 : index
    %c0_3 = arith.constant 0 : index
    %4 = vector.load %arg2[%c0_2, %c0_3] : memref<256x256xbf16, #tpu.memory_space<vmem>>, vector<256x256xbf16>
    %c0_4 = arith.constant 0 : index
    %c0_5 = arith.constant 0 : index
    %5 = vector.load %arg3[%c0_4, %c0_5] : memref<256x128xbf16, #tpu.memory_space<vmem>>, vector<256x128xbf16>
    %cst = arith.constant dense<0.000000e+00> : vector<256x128xf32>
    %6 = tpu.matmul %4, %5, %cst {dimension_numbers = #tpu.dot_dimension_numbers<[1], [0], [0], [1], [0, 0, 1, 1], [], []>} : vector<256x256xbf16>, vector<256x128xbf16>, vector<256x128xf32> -> vector<256x128xf32>
    %7 = arith.addf %3, %6 : vector<256x128xf32>
    %c0_6 = arith.constant 0 : index
    %c0_7 = arith.constant 0 : index
    %8 = vector.load %arg7[%c0_6, %c0_7] : memref<256x128xf32, #tpu.memory_space<vmem>>, vector<256x128xf32>
    tpu.vector_store %arg7[%c0_6, %c0_7], %7 {strides = array<i32>} : memref<256x128xf32, #tpu.memory_space<vmem>>, vector<256x128xf32>,
    %c0_i32_8 = arith.constant 0 : i32
    %9 = arith.cmpi eq, %arg1, %c0_i32_8 : i32
    %10 = arith.extui %9 : i1 to i32
    %c0_i32_9 = arith.constant 0 : i32
    %11 = arith.cmpi ne, %10, %c0_i32_9 : i32
    scf.if %11 {
      %c0_10 = arith.constant 0 : index
      %c0_11 = arith.constant 0 : index
      %12 = vector.load %arg7[%c0_10, %c0_11] : memref<256x128xf32, #tpu.memory_space<vmem>>, vector<256x128xf32>
      %c0_12 = arith.constant 0 : index
      %c0_13 = arith.constant 0 : index
      %13 = vector.load %arg4[%c0_12, %c0_13] : memref<1x128xf32, #tpu.memory_space<vmem>>, vector<1x128xf32>
      %14 = vector.broadcast %13 : vector<1x128xf32> to vector<256x128xf32>
      %15 = arith.mulf %12, %14 : vector<256x128xf32>
      %c0_14 = arith.constant 0 : index
      %c0_15 = arith.constant 0 : index
      %16 = vector.load %arg5[%c0_14, %c0_15] : memref<1x128xf32, #tpu.memory_space<vmem>>, vector<1x128xf32>
      %17 = vector.broadcast %16 : vector<1x128xf32> to vector<256x128xf32>
      %18 = arith.addf %15, %17 : vector<256x128xf32>
      %cst_16 = arith.constant 0.000000e+00 : f32
      %19 = vector.broadcast %cst_16 : f32 to vector<256x128xf32>
      %20 = arith.maximumf %18, %19 : vector<256x128xf32>
      %c0_17 = arith.constant 0 : index
      %c0_18 = arith.constant 0 : index
      %21 = vector.load %arg6[%c0_17, %c0_18] : memref<256x128xf32, #tpu.memory_space<vmem>>, vector<256x128xf32>
      tpu.vector_store %arg6[%c0_17, %c0_18], %20 {strides = array<i32>} : memref<256x128xf32, #tpu.memory_space<vmem>>, vector<256x128xf32>,
    } else {
    }
    return
  }
  func.func @transform_0(%arg0: i32, %arg1: i32) -> (i32, i32) {
    %c0_i32 = arith.constant 0 : i32
    return %arg0, %arg1 : i32, i32
  }
  func.func @transform_1(%arg0: i32, %arg1: i32) -> (i32, i32) {
    %c0_i32 = arith.constant 0 : i32
    %c0_i32_0 = arith.constant 0 : i32
    return %arg1, %c0_i32 : i32, i32
  }
  func.func @transform_2(%arg0: i32, %arg1: i32) -> (i32, i32) {
    %c0_i32 = arith.constant 0 : i32
    %c0_i32_0 = arith.constant 0 : i32
    %c0_i32_1 = arith.constant 0 : i32
    return %c0_i32, %c0_i32_0 : i32, i32
  }
  func.func @transform_3(%arg0: i32, %arg1: i32) -> (i32, i32) {
    %c0_i32 = arith.constant 0 : i32
    %c0_i32_0 = arith.constant 0 : i32
    %c0_i32_1 = arith.constant 0 : i32
    return %c0_i32, %c0_i32_0 : i32, i32
  }
  func.func @transform_4(%arg0: i32, %arg1: i32) -> (i32, i32) {
    %c0_i32 = arith.constant 0 : i32
    %c0_i32_0 = arith.constant 0 : i32
    return %arg0, %c0_i32 : i32, i32
  }
}

module attributes {stable_mosaic.version = 11 : i64} {
  func.func @_max9_kernel(%arg0: i32, %arg1: memref<9x16x128xf32, #tpu.memory_space<vmem>>, %arg2: memref<16x128xf32, #tpu.memory_space<vmem>>) attributes {dimension_semantics = [#tpu.dimension_semantics<parallel>], iteration_bounds = array<i64: 1>, scalar_prefetch = 0 : i64, scratch_operands = 0 : i64, tpu.core_type = #tpu.core_type<tc>, window_params = [{transform_indices = @transform_0, window_bounds = array<i64: 9, 16, 128>}, {transform_indices = @transform_1, window_bounds = array<i64: 16, 128>}]} {
    %c0 = arith.constant 0 : index
    %c0_0 = arith.constant 0 : index
    %c0_1 = arith.constant 0 : index
    %0 = vector.load %arg1[%c0, %c0_0, %c0_1] : memref<9x16x128xf32, #tpu.memory_space<vmem>>, vector<1x16x128xf32>
    %1 = vector.shape_cast %0 : vector<1x16x128xf32> to vector<16x128xf32>
    %c1 = arith.constant 1 : index
    %c0_2 = arith.constant 0 : index
    %c0_3 = arith.constant 0 : index
    %2 = vector.load %arg1[%c1, %c0_2, %c0_3] : memref<9x16x128xf32, #tpu.memory_space<vmem>>, vector<1x16x128xf32>
    %3 = vector.shape_cast %2 : vector<1x16x128xf32> to vector<16x128xf32>
    %4 = arith.maximumf %1, %3 : vector<16x128xf32>
    %c2 = arith.constant 2 : index
    %c0_4 = arith.constant 0 : index
    %c0_5 = arith.constant 0 : index
    %5 = vector.load %arg1[%c2, %c0_4, %c0_5] : memref<9x16x128xf32, #tpu.memory_space<vmem>>, vector<1x16x128xf32>
    %6 = vector.shape_cast %5 : vector<1x16x128xf32> to vector<16x128xf32>
    %7 = arith.maximumf %4, %6 : vector<16x128xf32>
    %c3 = arith.constant 3 : index
    %c0_6 = arith.constant 0 : index
    %c0_7 = arith.constant 0 : index
    %8 = vector.load %arg1[%c3, %c0_6, %c0_7] : memref<9x16x128xf32, #tpu.memory_space<vmem>>, vector<1x16x128xf32>
    %9 = vector.shape_cast %8 : vector<1x16x128xf32> to vector<16x128xf32>
    %10 = arith.maximumf %7, %9 : vector<16x128xf32>
    %c4 = arith.constant 4 : index
    %c0_8 = arith.constant 0 : index
    %c0_9 = arith.constant 0 : index
    %11 = vector.load %arg1[%c4, %c0_8, %c0_9] : memref<9x16x128xf32, #tpu.memory_space<vmem>>, vector<1x16x128xf32>
    %12 = vector.shape_cast %11 : vector<1x16x128xf32> to vector<16x128xf32>
    %13 = arith.maximumf %10, %12 : vector<16x128xf32>
    %c5 = arith.constant 5 : index
    %c0_10 = arith.constant 0 : index
    %c0_11 = arith.constant 0 : index
    %14 = vector.load %arg1[%c5, %c0_10, %c0_11] : memref<9x16x128xf32, #tpu.memory_space<vmem>>, vector<1x16x128xf32>
    %15 = vector.shape_cast %14 : vector<1x16x128xf32> to vector<16x128xf32>
    %16 = arith.maximumf %13, %15 : vector<16x128xf32>
    %c6 = arith.constant 6 : index
    %c0_12 = arith.constant 0 : index
    %c0_13 = arith.constant 0 : index
    %17 = vector.load %arg1[%c6, %c0_12, %c0_13] : memref<9x16x128xf32, #tpu.memory_space<vmem>>, vector<1x16x128xf32>
    %18 = vector.shape_cast %17 : vector<1x16x128xf32> to vector<16x128xf32>
    %19 = arith.maximumf %16, %18 : vector<16x128xf32>
    %c7 = arith.constant 7 : index
    %c0_14 = arith.constant 0 : index
    %c0_15 = arith.constant 0 : index
    %20 = vector.load %arg1[%c7, %c0_14, %c0_15] : memref<9x16x128xf32, #tpu.memory_space<vmem>>, vector<1x16x128xf32>
    %21 = vector.shape_cast %20 : vector<1x16x128xf32> to vector<16x128xf32>
    %22 = arith.maximumf %19, %21 : vector<16x128xf32>
    %c8 = arith.constant 8 : index
    %c0_16 = arith.constant 0 : index
    %c0_17 = arith.constant 0 : index
    %23 = vector.load %arg1[%c8, %c0_16, %c0_17] : memref<9x16x128xf32, #tpu.memory_space<vmem>>, vector<1x16x128xf32>
    %24 = vector.shape_cast %23 : vector<1x16x128xf32> to vector<16x128xf32>
    %25 = arith.maximumf %22, %24 : vector<16x128xf32>
    %c0_18 = arith.constant 0 : index
    %c0_19 = arith.constant 0 : index
    %26 = vector.load %arg2[%c0_18, %c0_19] : memref<16x128xf32, #tpu.memory_space<vmem>>, vector<16x128xf32>
    tpu.vector_store %arg2[%c0_18, %c0_19], %25 {strides = array<i32>} : memref<16x128xf32, #tpu.memory_space<vmem>>, vector<16x128xf32>,
    return
  }
  func.func @transform_0(%arg0: i32) -> (i32, i32, i32) {
    %c0_i32 = arith.constant 0 : i32
    %c0_i32_0 = arith.constant 0 : i32
    %c0_i32_1 = arith.constant 0 : i32
    return %c0_i32, %arg0, %c0_i32_0 : i32, i32, i32
  }
  func.func @transform_1(%arg0: i32) -> (i32, i32) {
    %c0_i32 = arith.constant 0 : i32
    %c0_i32_0 = arith.constant 0 : i32
    return %arg0, %c0_i32 : i32, i32
  }
}

module attributes {stable_mosaic.version = 11 : i64} {
  func.func @_fused_matmul_kernel(%arg0: i32, %arg1: i32, %arg2: memref<128x128xbf16, #tpu.memory_space<vmem>>, %arg3: memref<128x128xbf16, #tpu.memory_space<vmem>>, %arg4: memref<1x128xf32, #tpu.memory_space<vmem>>, %arg5: memref<1x128xf32, #tpu.memory_space<vmem>>, %arg6: memref<128x128xf32, #tpu.memory_space<vmem>>, %arg7: memref<128x128xf32, #tpu.memory_space<vmem>>) attributes {dimension_semantics = [#tpu.dimension_semantics<parallel>, #tpu.dimension_semantics<arbitrary>], iteration_bounds = array<i64: 1, 1>, scalar_prefetch = 0 : i64, scratch_operands = 1 : i64, tpu.core_type = #tpu.core_type<tc>, window_params = [{transform_indices = @transform_0, window_bounds = array<i64: 128, 128>}, {transform_indices = @transform_1, window_bounds = array<i64: 128, 128>}, {pipeline_mode = #tpu.pipeline_mode<synchronous>, transform_indices = @transform_2, window_bounds = array<i64: 1, 128>}, {pipeline_mode = #tpu.pipeline_mode<synchronous>, transform_indices = @transform_3, window_bounds = array<i64: 1, 128>}, {transform_indices = @transform_4, window_bounds = array<i64: 128, 128>}]} {
    %c0_i32 = arith.constant 0 : i32
    %0 = arith.cmpi eq, %arg1, %c0_i32 : i32
    %1 = arith.extui %0 : i1 to i32
    %c0_i32_0 = arith.constant 0 : i32
    %2 = arith.cmpi ne, %1, %c0_i32_0 : i32
    scf.if %2 {
      %cst_10 = arith.constant 0.000000e+00 : f32
      %12 = vector.broadcast %cst_10 : f32 to vector<128x128xf32>
      %c0_11 = arith.constant 0 : index
      %c0_12 = arith.constant 0 : index
      %13 = vector.load %arg7[%c0_11, %c0_12] : memref<128x128xf32, #tpu.memory_space<vmem>>, vector<128x128xf32>
      tpu.vector_store %arg7[%c0_11, %c0_12], %12 {strides = array<i32>} : memref<128x128xf32, #tpu.memory_space<vmem>>, vector<128x128xf32>,
    } else {
    }
    %c0 = arith.constant 0 : index
    %c0_1 = arith.constant 0 : index
    %3 = vector.load %arg7[%c0, %c0_1] : memref<128x128xf32, #tpu.memory_space<vmem>>, vector<128x128xf32>
    %c0_2 = arith.constant 0 : index
    %c0_3 = arith.constant 0 : index
    %4 = vector.load %arg2[%c0_2, %c0_3] : memref<128x128xbf16, #tpu.memory_space<vmem>>, vector<128x128xbf16>
    %c0_4 = arith.constant 0 : index
    %c0_5 = arith.constant 0 : index
    %5 = vector.load %arg3[%c0_4, %c0_5] : memref<128x128xbf16, #tpu.memory_space<vmem>>, vector<128x128xbf16>
    %cst = arith.constant dense<0.000000e+00> : vector<128x128xf32>
    %6 = tpu.matmul %4, %5, %cst {dimension_numbers = #tpu.dot_dimension_numbers<[1], [0], [0], [1], [0, 0, 1, 1], [], []>} : vector<128x128xbf16>, vector<128x128xbf16>, vector<128x128xf32> -> vector<128x128xf32>
    %7 = arith.addf %3, %6 : vector<128x128xf32>
    %c0_6 = arith.constant 0 : index
    %c0_7 = arith.constant 0 : index
    %8 = vector.load %arg7[%c0_6, %c0_7] : memref<128x128xf32, #tpu.memory_space<vmem>>, vector<128x128xf32>
    tpu.vector_store %arg7[%c0_6, %c0_7], %7 {strides = array<i32>} : memref<128x128xf32, #tpu.memory_space<vmem>>, vector<128x128xf32>,
    %c0_i32_8 = arith.constant 0 : i32
    %9 = arith.cmpi eq, %arg1, %c0_i32_8 : i32
    %10 = arith.extui %9 : i1 to i32
    %c0_i32_9 = arith.constant 0 : i32
    %11 = arith.cmpi ne, %10, %c0_i32_9 : i32
    scf.if %11 {
      %c0_10 = arith.constant 0 : index
      %c0_11 = arith.constant 0 : index
      %12 = vector.load %arg7[%c0_10, %c0_11] : memref<128x128xf32, #tpu.memory_space<vmem>>, vector<128x128xf32>
      %c0_12 = arith.constant 0 : index
      %c0_13 = arith.constant 0 : index
      %13 = vector.load %arg4[%c0_12, %c0_13] : memref<1x128xf32, #tpu.memory_space<vmem>>, vector<1x128xf32>
      %14 = vector.broadcast %13 : vector<1x128xf32> to vector<128x128xf32>
      %15 = arith.mulf %12, %14 : vector<128x128xf32>
      %c0_14 = arith.constant 0 : index
      %c0_15 = arith.constant 0 : index
      %16 = vector.load %arg5[%c0_14, %c0_15] : memref<1x128xf32, #tpu.memory_space<vmem>>, vector<1x128xf32>
      %17 = vector.broadcast %16 : vector<1x128xf32> to vector<128x128xf32>
      %18 = arith.addf %15, %17 : vector<128x128xf32>
      %cst_16 = arith.constant 0.000000e+00 : f32
      %19 = vector.broadcast %cst_16 : f32 to vector<128x128xf32>
      %20 = arith.maximumf %18, %19 : vector<128x128xf32>
      %c0_17 = arith.constant 0 : index
      %c0_18 = arith.constant 0 : index
      %21 = vector.load %arg6[%c0_17, %c0_18] : memref<128x128xf32, #tpu.memory_space<vmem>>, vector<128x128xf32>
      tpu.vector_store %arg6[%c0_17, %c0_18], %20 {strides = array<i32>} : memref<128x128xf32, #tpu.memory_space<vmem>>, vector<128x128xf32>,
    } else {
    }
    return
  }
  func.func @transform_0(%arg0: i32, %arg1: i32) -> (i32, i32) {
    %c0_i32 = arith.constant 0 : i32
    return %arg0, %arg1 : i32, i32
  }
  func.func @transform_1(%arg0: i32, %arg1: i32) -> (i32, i32) {
    %c0_i32 = arith.constant 0 : i32
    %c0_i32_0 = arith.constant 0 : i32
    return %arg1, %c0_i32 : i32, i32
  }
  func.func @transform_2(%arg0: i32, %arg1: i32) -> (i32, i32) {
    %c0_i32 = arith.constant 0 : i32
    %c0_i32_0 = arith.constant 0 : i32
    %c0_i32_1 = arith.constant 0 : i32
    return %c0_i32, %c0_i32_0 : i32, i32
  }
  func.func @transform_3(%arg0: i32, %arg1: i32) -> (i32, i32) {
    %c0_i32 = arith.constant 0 : i32
    %c0_i32_0 = arith.constant 0 : i32
    %c0_i32_1 = arith.constant 0 : i32
    return %c0_i32, %c0_i32_0 : i32, i32
  }
  func.func @transform_4(%arg0: i32, %arg1: i32) -> (i32, i32) {
    %c0_i32 = arith.constant 0 : i32
    %c0_i32_0 = arith.constant 0 : i32
    return %arg0, %c0_i32 : i32, i32
  }
}

module attributes {stable_mosaic.version = 11 : i64} {
  func.func @_fused_matmul_kernel(%arg0: i32, %arg1: i32, %arg2: memref<128x256xbf16, #tpu.memory_space<vmem>>, %arg3: memref<256x128xbf16, #tpu.memory_space<vmem>>, %arg4: memref<1x128xf32, #tpu.memory_space<vmem>>, %arg5: memref<1x128xf32, #tpu.memory_space<vmem>>, %arg6: memref<128x128xf32, #tpu.memory_space<vmem>>, %arg7: memref<128x128xf32, #tpu.memory_space<vmem>>) attributes {dimension_semantics = [#tpu.dimension_semantics<parallel>, #tpu.dimension_semantics<arbitrary>], iteration_bounds = array<i64: 1, 1>, scalar_prefetch = 0 : i64, scratch_operands = 1 : i64, tpu.core_type = #tpu.core_type<tc>, window_params = [{transform_indices = @transform_0, window_bounds = array<i64: 128, 256>}, {transform_indices = @transform_1, window_bounds = array<i64: 256, 128>}, {pipeline_mode = #tpu.pipeline_mode<synchronous>, transform_indices = @transform_2, window_bounds = array<i64: 1, 128>}, {pipeline_mode = #tpu.pipeline_mode<synchronous>, transform_indices = @transform_3, window_bounds = array<i64: 1, 128>}, {transform_indices = @transform_4, window_bounds = array<i64: 128, 128>}]} {
    %c0_i32 = arith.constant 0 : i32
    %0 = arith.cmpi eq, %arg1, %c0_i32 : i32
    %1 = arith.extui %0 : i1 to i32
    %c0_i32_0 = arith.constant 0 : i32
    %2 = arith.cmpi ne, %1, %c0_i32_0 : i32
    scf.if %2 {
      %cst_10 = arith.constant 0.000000e+00 : f32
      %12 = vector.broadcast %cst_10 : f32 to vector<128x128xf32>
      %c0_11 = arith.constant 0 : index
      %c0_12 = arith.constant 0 : index
      %13 = vector.load %arg7[%c0_11, %c0_12] : memref<128x128xf32, #tpu.memory_space<vmem>>, vector<128x128xf32>
      tpu.vector_store %arg7[%c0_11, %c0_12], %12 {strides = array<i32>} : memref<128x128xf32, #tpu.memory_space<vmem>>, vector<128x128xf32>,
    } else {
    }
    %c0 = arith.constant 0 : index
    %c0_1 = arith.constant 0 : index
    %3 = vector.load %arg7[%c0, %c0_1] : memref<128x128xf32, #tpu.memory_space<vmem>>, vector<128x128xf32>
    %c0_2 = arith.constant 0 : index
    %c0_3 = arith.constant 0 : index
    %4 = vector.load %arg2[%c0_2, %c0_3] : memref<128x256xbf16, #tpu.memory_space<vmem>>, vector<128x256xbf16>
    %c0_4 = arith.constant 0 : index
    %c0_5 = arith.constant 0 : index
    %5 = vector.load %arg3[%c0_4, %c0_5] : memref<256x128xbf16, #tpu.memory_space<vmem>>, vector<256x128xbf16>
    %cst = arith.constant dense<0.000000e+00> : vector<128x128xf32>
    %6 = tpu.matmul %4, %5, %cst {dimension_numbers = #tpu.dot_dimension_numbers<[1], [0], [0], [1], [0, 0, 1, 1], [], []>} : vector<128x256xbf16>, vector<256x128xbf16>, vector<128x128xf32> -> vector<128x128xf32>
    %7 = arith.addf %3, %6 : vector<128x128xf32>
    %c0_6 = arith.constant 0 : index
    %c0_7 = arith.constant 0 : index
    %8 = vector.load %arg7[%c0_6, %c0_7] : memref<128x128xf32, #tpu.memory_space<vmem>>, vector<128x128xf32>
    tpu.vector_store %arg7[%c0_6, %c0_7], %7 {strides = array<i32>} : memref<128x128xf32, #tpu.memory_space<vmem>>, vector<128x128xf32>,
    %c0_i32_8 = arith.constant 0 : i32
    %9 = arith.cmpi eq, %arg1, %c0_i32_8 : i32
    %10 = arith.extui %9 : i1 to i32
    %c0_i32_9 = arith.constant 0 : i32
    %11 = arith.cmpi ne, %10, %c0_i32_9 : i32
    scf.if %11 {
      %c0_10 = arith.constant 0 : index
      %c0_11 = arith.constant 0 : index
      %12 = vector.load %arg7[%c0_10, %c0_11] : memref<128x128xf32, #tpu.memory_space<vmem>>, vector<128x128xf32>
      %c0_12 = arith.constant 0 : index
      %c0_13 = arith.constant 0 : index
      %13 = vector.load %arg4[%c0_12, %c0_13] : memref<1x128xf32, #tpu.memory_space<vmem>>, vector<1x128xf32>
      %14 = vector.broadcast %13 : vector<1x128xf32> to vector<128x128xf32>
      %15 = arith.mulf %12, %14 : vector<128x128xf32>
      %c0_14 = arith.constant 0 : index
      %c0_15 = arith.constant 0 : index
      %16 = vector.load %arg5[%c0_14, %c0_15] : memref<1x128xf32, #tpu.memory_space<vmem>>, vector<1x128xf32>
      %17 = vector.broadcast %16 : vector<1x128xf32> to vector<128x128xf32>
      %18 = arith.addf %15, %17 : vector<128x128xf32>
      %cst_16 = arith.constant 0.000000e+00 : f32
      %19 = vector.broadcast %cst_16 : f32 to vector<128x128xf32>
      %20 = arith.maximumf %18, %19 : vector<128x128xf32>
      %c0_17 = arith.constant 0 : index
      %c0_18 = arith.constant 0 : index
      %21 = vector.load %arg6[%c0_17, %c0_18] : memref<128x128xf32, #tpu.memory_space<vmem>>, vector<128x128xf32>
      tpu.vector_store %arg6[%c0_17, %c0_18], %20 {strides = array<i32>} : memref<128x128xf32, #tpu.memory_space<vmem>>, vector<128x128xf32>,
    } else {
    }
    return
  }
  func.func @transform_0(%arg0: i32, %arg1: i32) -> (i32, i32) {
    %c0_i32 = arith.constant 0 : i32
    return %arg0, %arg1 : i32, i32
  }
  func.func @transform_1(%arg0: i32, %arg1: i32) -> (i32, i32) {
    %c0_i32 = arith.constant 0 : i32
    %c0_i32_0 = arith.constant 0 : i32
    return %arg1, %c0_i32 : i32, i32
  }
  func.func @transform_2(%arg0: i32, %arg1: i32) -> (i32, i32) {
    %c0_i32 = arith.constant 0 : i32
    %c0_i32_0 = arith.constant 0 : i32
    %c0_i32_1 = arith.constant 0 : i32
    return %c0_i32, %c0_i32_0 : i32, i32
  }
  func.func @transform_3(%arg0: i32, %arg1: i32) -> (i32, i32) {
    %c0_i32 = arith.constant 0 : i32
    %c0_i32_0 = arith.constant 0 : i32
    %c0_i32_1 = arith.constant 0 : i32
    return %c0_i32, %c0_i32_0 : i32, i32
  }
  func.func @transform_4(%arg0: i32, %arg1: i32) -> (i32, i32) {
    %c0_i32 = arith.constant 0 : i32
    %c0_i32_0 = arith.constant 0 : i32
    return %arg0, %c0_i32 : i32, i32
  }
}

module attributes {stable_mosaic.version = 11 : i64} {
  func.func @_fused_matmul_kernel(%arg0: i32, %arg1: i32, %arg2: memref<128x128xbf16, #tpu.memory_space<vmem>>, %arg3: memref<128x128xbf16, #tpu.memory_space<vmem>>, %arg4: memref<1x128xf32, #tpu.memory_space<vmem>>, %arg5: memref<1x128xf32, #tpu.memory_space<vmem>>, %arg6: memref<128x128xf32, #tpu.memory_space<vmem>>, %arg7: memref<128x128xf32, #tpu.memory_space<vmem>>) attributes {dimension_semantics = [#tpu.dimension_semantics<parallel>, #tpu.dimension_semantics<arbitrary>], iteration_bounds = array<i64: 1, 1>, scalar_prefetch = 0 : i64, scratch_operands = 1 : i64, tpu.core_type = #tpu.core_type<tc>, window_params = [{transform_indices = @transform_0, window_bounds = array<i64: 128, 128>}, {transform_indices = @transform_1, window_bounds = array<i64: 128, 128>}, {pipeline_mode = #tpu.pipeline_mode<synchronous>, transform_indices = @transform_2, window_bounds = array<i64: 1, 128>}, {pipeline_mode = #tpu.pipeline_mode<synchronous>, transform_indices = @transform_3, window_bounds = array<i64: 1, 128>}, {transform_indices = @transform_4, window_bounds = array<i64: 128, 128>}]} {
    %c0_i32 = arith.constant 0 : i32
    %0 = arith.cmpi eq, %arg1, %c0_i32 : i32
    %1 = arith.extui %0 : i1 to i32
    %c0_i32_0 = arith.constant 0 : i32
    %2 = arith.cmpi ne, %1, %c0_i32_0 : i32
    scf.if %2 {
      %cst_10 = arith.constant 0.000000e+00 : f32
      %12 = vector.broadcast %cst_10 : f32 to vector<128x128xf32>
      %c0_11 = arith.constant 0 : index
      %c0_12 = arith.constant 0 : index
      %13 = vector.load %arg7[%c0_11, %c0_12] : memref<128x128xf32, #tpu.memory_space<vmem>>, vector<128x128xf32>
      tpu.vector_store %arg7[%c0_11, %c0_12], %12 {strides = array<i32>} : memref<128x128xf32, #tpu.memory_space<vmem>>, vector<128x128xf32>,
    } else {
    }
    %c0 = arith.constant 0 : index
    %c0_1 = arith.constant 0 : index
    %3 = vector.load %arg7[%c0, %c0_1] : memref<128x128xf32, #tpu.memory_space<vmem>>, vector<128x128xf32>
    %c0_2 = arith.constant 0 : index
    %c0_3 = arith.constant 0 : index
    %4 = vector.load %arg2[%c0_2, %c0_3] : memref<128x128xbf16, #tpu.memory_space<vmem>>, vector<128x128xbf16>
    %c0_4 = arith.constant 0 : index
    %c0_5 = arith.constant 0 : index
    %5 = vector.load %arg3[%c0_4, %c0_5] : memref<128x128xbf16, #tpu.memory_space<vmem>>, vector<128x128xbf16>
    %cst = arith.constant dense<0.000000e+00> : vector<128x128xf32>
    %6 = tpu.matmul %4, %5, %cst {dimension_numbers = #tpu.dot_dimension_numbers<[1], [0], [0], [1], [0, 0, 1, 1], [], []>} : vector<128x128xbf16>, vector<128x128xbf16>, vector<128x128xf32> -> vector<128x128xf32>
    %7 = arith.addf %3, %6 : vector<128x128xf32>
    %c0_6 = arith.constant 0 : index
    %c0_7 = arith.constant 0 : index
    %8 = vector.load %arg7[%c0_6, %c0_7] : memref<128x128xf32, #tpu.memory_space<vmem>>, vector<128x128xf32>
    tpu.vector_store %arg7[%c0_6, %c0_7], %7 {strides = array<i32>} : memref<128x128xf32, #tpu.memory_space<vmem>>, vector<128x128xf32>,
    %c0_i32_8 = arith.constant 0 : i32
    %9 = arith.cmpi eq, %arg1, %c0_i32_8 : i32
    %10 = arith.extui %9 : i1 to i32
    %c0_i32_9 = arith.constant 0 : i32
    %11 = arith.cmpi ne, %10, %c0_i32_9 : i32
    scf.if %11 {
      %c0_10 = arith.constant 0 : index
      %c0_11 = arith.constant 0 : index
      %12 = vector.load %arg7[%c0_10, %c0_11] : memref<128x128xf32, #tpu.memory_space<vmem>>, vector<128x128xf32>
      %c0_12 = arith.constant 0 : index
      %c0_13 = arith.constant 0 : index
      %13 = vector.load %arg4[%c0_12, %c0_13] : memref<1x128xf32, #tpu.memory_space<vmem>>, vector<1x128xf32>
      %14 = vector.broadcast %13 : vector<1x128xf32> to vector<128x128xf32>
      %15 = arith.mulf %12, %14 : vector<128x128xf32>
      %c0_14 = arith.constant 0 : index
      %c0_15 = arith.constant 0 : index
      %16 = vector.load %arg5[%c0_14, %c0_15] : memref<1x128xf32, #tpu.memory_space<vmem>>, vector<1x128xf32>
      %17 = vector.broadcast %16 : vector<1x128xf32> to vector<128x128xf32>
      %18 = arith.addf %15, %17 : vector<128x128xf32>
      %c0_16 = arith.constant 0 : index
      %c0_17 = arith.constant 0 : index
      %19 = vector.load %arg6[%c0_16, %c0_17] : memref<128x128xf32, #tpu.memory_space<vmem>>, vector<128x128xf32>
      tpu.vector_store %arg6[%c0_16, %c0_17], %18 {strides = array<i32>} : memref<128x128xf32, #tpu.memory_space<vmem>>, vector<128x128xf32>,
    } else {
    }
    return
  }
  func.func @transform_0(%arg0: i32, %arg1: i32) -> (i32, i32) {
    %c0_i32 = arith.constant 0 : i32
    return %arg0, %arg1 : i32, i32
  }
  func.func @transform_1(%arg0: i32, %arg1: i32) -> (i32, i32) {
    %c0_i32 = arith.constant 0 : i32
    %c0_i32_0 = arith.constant 0 : i32
    return %arg1, %c0_i32 : i32, i32
  }
  func.func @transform_2(%arg0: i32, %arg1: i32) -> (i32, i32) {
    %c0_i32 = arith.constant 0 : i32
    %c0_i32_0 = arith.constant 0 : i32
    %c0_i32_1 = arith.constant 0 : i32
    return %c0_i32, %c0_i32_0 : i32, i32
  }
  func.func @transform_3(%arg0: i32, %arg1: i32) -> (i32, i32) {
    %c0_i32 = arith.constant 0 : i32
    %c0_i32_0 = arith.constant 0 : i32
    %c0_i32_1 = arith.constant 0 : i32
    return %c0_i32, %c0_i32_0 : i32, i32
  }
  func.func @transform_4(%arg0: i32, %arg1: i32) -> (i32, i32) {
    %c0_i32 = arith.constant 0 : i32
    %c0_i32_0 = arith.constant 0 : i32
    return %arg0, %c0_i32 : i32, i32
  }
}

module attributes {stable_mosaic.version = 11 : i64} {
  func.func @_fused_matmul_res_kernel(%arg0: i32, %arg1: i32, %arg2: memref<128x128xbf16, #tpu.memory_space<vmem>>, %arg3: memref<128x128xbf16, #tpu.memory_space<vmem>>, %arg4: memref<1x128xf32, #tpu.memory_space<vmem>>, %arg5: memref<1x128xf32, #tpu.memory_space<vmem>>, %arg6: memref<128x128xf32, #tpu.memory_space<vmem>>, %arg7: memref<128x128xf32, #tpu.memory_space<vmem>>, %arg8: memref<128x128xf32, #tpu.memory_space<vmem>>) attributes {dimension_semantics = [#tpu.dimension_semantics<parallel>, #tpu.dimension_semantics<arbitrary>], iteration_bounds = array<i64: 1, 1>, scalar_prefetch = 0 : i64, scratch_operands = 1 : i64, tpu.core_type = #tpu.core_type<tc>, window_params = [{transform_indices = @transform_0, window_bounds = array<i64: 128, 128>}, {transform_indices = @transform_1, window_bounds = array<i64: 128, 128>}, {pipeline_mode = #tpu.pipeline_mode<synchronous>, transform_indices = @transform_2, window_bounds = array<i64: 1, 128>}, {pipeline_mode = #tpu.pipeline_mode<synchronous>, transform_indices = @transform_3, window_bounds = array<i64: 1, 128>}, {transform_indices = @transform_4, window_bounds = array<i64: 128, 128>}, {transform_indices = @transform_5, window_bounds = array<i64: 128, 128>}]} {
    %c0_i32 = arith.constant 0 : i32
    %0 = arith.cmpi eq, %arg1, %c0_i32 : i32
    %1 = arith.extui %0 : i1 to i32
    %c0_i32_0 = arith.constant 0 : i32
    %2 = arith.cmpi ne, %1, %c0_i32_0 : i32
    scf.if %2 {
      %cst_10 = arith.constant 0.000000e+00 : f32
      %12 = vector.broadcast %cst_10 : f32 to vector<128x128xf32>
      %c0_11 = arith.constant 0 : index
      %c0_12 = arith.constant 0 : index
      %13 = vector.load %arg8[%c0_11, %c0_12] : memref<128x128xf32, #tpu.memory_space<vmem>>, vector<128x128xf32>
      tpu.vector_store %arg8[%c0_11, %c0_12], %12 {strides = array<i32>} : memref<128x128xf32, #tpu.memory_space<vmem>>, vector<128x128xf32>,
    } else {
    }
    %c0 = arith.constant 0 : index
    %c0_1 = arith.constant 0 : index
    %3 = vector.load %arg8[%c0, %c0_1] : memref<128x128xf32, #tpu.memory_space<vmem>>, vector<128x128xf32>
    %c0_2 = arith.constant 0 : index
    %c0_3 = arith.constant 0 : index
    %4 = vector.load %arg2[%c0_2, %c0_3] : memref<128x128xbf16, #tpu.memory_space<vmem>>, vector<128x128xbf16>
    %c0_4 = arith.constant 0 : index
    %c0_5 = arith.constant 0 : index
    %5 = vector.load %arg3[%c0_4, %c0_5] : memref<128x128xbf16, #tpu.memory_space<vmem>>, vector<128x128xbf16>
    %cst = arith.constant dense<0.000000e+00> : vector<128x128xf32>
    %6 = tpu.matmul %4, %5, %cst {dimension_numbers = #tpu.dot_dimension_numbers<[1], [0], [0], [1], [0, 0, 1, 1], [], []>} : vector<128x128xbf16>, vector<128x128xbf16>, vector<128x128xf32> -> vector<128x128xf32>
    %7 = arith.addf %3, %6 : vector<128x128xf32>
    %c0_6 = arith.constant 0 : index
    %c0_7 = arith.constant 0 : index
    %8 = vector.load %arg8[%c0_6, %c0_7] : memref<128x128xf32, #tpu.memory_space<vmem>>, vector<128x128xf32>
    tpu.vector_store %arg8[%c0_6, %c0_7], %7 {strides = array<i32>} : memref<128x128xf32, #tpu.memory_space<vmem>>, vector<128x128xf32>,
    %c0_i32_8 = arith.constant 0 : i32
    %9 = arith.cmpi eq, %arg1, %c0_i32_8 : i32
    %10 = arith.extui %9 : i1 to i32
    %c0_i32_9 = arith.constant 0 : i32
    %11 = arith.cmpi ne, %10, %c0_i32_9 : i32
    scf.if %11 {
      %c0_10 = arith.constant 0 : index
      %c0_11 = arith.constant 0 : index
      %12 = vector.load %arg8[%c0_10, %c0_11] : memref<128x128xf32, #tpu.memory_space<vmem>>, vector<128x128xf32>
      %c0_12 = arith.constant 0 : index
      %c0_13 = arith.constant 0 : index
      %13 = vector.load %arg4[%c0_12, %c0_13] : memref<1x128xf32, #tpu.memory_space<vmem>>, vector<1x128xf32>
      %14 = vector.broadcast %13 : vector<1x128xf32> to vector<128x128xf32>
      %15 = arith.mulf %12, %14 : vector<128x128xf32>
      %c0_14 = arith.constant 0 : index
      %c0_15 = arith.constant 0 : index
      %16 = vector.load %arg5[%c0_14, %c0_15] : memref<1x128xf32, #tpu.memory_space<vmem>>, vector<1x128xf32>
      %17 = vector.broadcast %16 : vector<1x128xf32> to vector<128x128xf32>
      %18 = arith.addf %15, %17 : vector<128x128xf32>
      %c0_16 = arith.constant 0 : index
      %c0_17 = arith.constant 0 : index
      %19 = vector.load %arg6[%c0_16, %c0_17] : memref<128x128xf32, #tpu.memory_space<vmem>>, vector<128x128xf32>
      %20 = arith.addf %18, %19 : vector<128x128xf32>
      %cst_18 = arith.constant 0.000000e+00 : f32
      %21 = vector.broadcast %cst_18 : f32 to vector<128x128xf32>
      %22 = arith.maximumf %20, %21 : vector<128x128xf32>
      %c0_19 = arith.constant 0 : index
      %c0_20 = arith.constant 0 : index
      %23 = vector.load %arg7[%c0_19, %c0_20] : memref<128x128xf32, #tpu.memory_space<vmem>>, vector<128x128xf32>
      tpu.vector_store %arg7[%c0_19, %c0_20], %22 {strides = array<i32>} : memref<128x128xf32, #tpu.memory_space<vmem>>, vector<128x128xf32>,
    } else {
    }
    return
  }
  func.func @transform_0(%arg0: i32, %arg1: i32) -> (i32, i32) {
    %c0_i32 = arith.constant 0 : i32
    return %arg0, %arg1 : i32, i32
  }
  func.func @transform_1(%arg0: i32, %arg1: i32) -> (i32, i32) {
    %c0_i32 = arith.constant 0 : i32
    %c0_i32_0 = arith.constant 0 : i32
    return %arg1, %c0_i32 : i32, i32
  }
  func.func @transform_2(%arg0: i32, %arg1: i32) -> (i32, i32) {
    %c0_i32 = arith.constant 0 : i32
    %c0_i32_0 = arith.constant 0 : i32
    %c0_i32_1 = arith.constant 0 : i32
    return %c0_i32, %c0_i32_0 : i32, i32
  }
  func.func @transform_3(%arg0: i32, %arg1: i32) -> (i32, i32) {
    %c0_i32 = arith.constant 0 : i32
    %c0_i32_0 = arith.constant 0 : i32
    %c0_i32_1 = arith.constant 0 : i32
    return %c0_i32, %c0_i32_0 : i32, i32
  }
  func.func @transform_4(%arg0: i32, %arg1: i32) -> (i32, i32) {
    %c0_i32 = arith.constant 0 : i32
    %c0_i32_0 = arith.constant 0 : i32
    return %arg0, %c0_i32 : i32, i32
  }
  func.func @transform_5(%arg0: i32, %arg1: i32) -> (i32, i32) {
    %c0_i32 = arith.constant 0 : i32
    %c0_i32_0 = arith.constant 0 : i32
    return %arg0, %c0_i32 : i32, i32
  }
}

module attributes {stable_mosaic.version = 11 : i64} {
  func.func @_fused_matmul_kernel(%arg0: i32, %arg1: i32, %arg2: memref<32x384xbf16, #tpu.memory_space<vmem>>, %arg3: memref<384x128xbf16, #tpu.memory_space<vmem>>, %arg4: memref<1x128xf32, #tpu.memory_space<vmem>>, %arg5: memref<1x128xf32, #tpu.memory_space<vmem>>, %arg6: memref<32x128xf32, #tpu.memory_space<vmem>>, %arg7: memref<32x128xf32, #tpu.memory_space<vmem>>) attributes {dimension_semantics = [#tpu.dimension_semantics<parallel>, #tpu.dimension_semantics<arbitrary>], iteration_bounds = array<i64: 1, 1>, scalar_prefetch = 0 : i64, scratch_operands = 1 : i64, tpu.core_type = #tpu.core_type<tc>, window_params = [{transform_indices = @transform_0, window_bounds = array<i64: 32, 384>}, {transform_indices = @transform_1, window_bounds = array<i64: 384, 128>}, {pipeline_mode = #tpu.pipeline_mode<synchronous>, transform_indices = @transform_2, window_bounds = array<i64: 1, 128>}, {pipeline_mode = #tpu.pipeline_mode<synchronous>, transform_indices = @transform_3, window_bounds = array<i64: 1, 128>}, {transform_indices = @transform_4, window_bounds = array<i64: 32, 128>}]} {
    %c0_i32 = arith.constant 0 : i32
    %0 = arith.cmpi eq, %arg1, %c0_i32 : i32
    %1 = arith.extui %0 : i1 to i32
    %c0_i32_0 = arith.constant 0 : i32
    %2 = arith.cmpi ne, %1, %c0_i32_0 : i32
    scf.if %2 {
      %cst_10 = arith.constant 0.000000e+00 : f32
      %12 = vector.broadcast %cst_10 : f32 to vector<32x128xf32>
      %c0_11 = arith.constant 0 : index
      %c0_12 = arith.constant 0 : index
      %13 = vector.load %arg7[%c0_11, %c0_12] : memref<32x128xf32, #tpu.memory_space<vmem>>, vector<32x128xf32>
      tpu.vector_store %arg7[%c0_11, %c0_12], %12 {strides = array<i32>} : memref<32x128xf32, #tpu.memory_space<vmem>>, vector<32x128xf32>,
    } else {
    }
    %c0 = arith.constant 0 : index
    %c0_1 = arith.constant 0 : index
    %3 = vector.load %arg7[%c0, %c0_1] : memref<32x128xf32, #tpu.memory_space<vmem>>, vector<32x128xf32>
    %c0_2 = arith.constant 0 : index
    %c0_3 = arith.constant 0 : index
    %4 = vector.load %arg2[%c0_2, %c0_3] : memref<32x384xbf16, #tpu.memory_space<vmem>>, vector<32x384xbf16>
    %c0_4 = arith.constant 0 : index
    %c0_5 = arith.constant 0 : index
    %5 = vector.load %arg3[%c0_4, %c0_5] : memref<384x128xbf16, #tpu.memory_space<vmem>>, vector<384x128xbf16>
    %cst = arith.constant dense<0.000000e+00> : vector<32x128xf32>
    %6 = tpu.matmul %4, %5, %cst {dimension_numbers = #tpu.dot_dimension_numbers<[1], [0], [0], [1], [0, 0, 1, 1], [], []>} : vector<32x384xbf16>, vector<384x128xbf16>, vector<32x128xf32> -> vector<32x128xf32>
    %7 = arith.addf %3, %6 : vector<32x128xf32>
    %c0_6 = arith.constant 0 : index
    %c0_7 = arith.constant 0 : index
    %8 = vector.load %arg7[%c0_6, %c0_7] : memref<32x128xf32, #tpu.memory_space<vmem>>, vector<32x128xf32>
    tpu.vector_store %arg7[%c0_6, %c0_7], %7 {strides = array<i32>} : memref<32x128xf32, #tpu.memory_space<vmem>>, vector<32x128xf32>,
    %c0_i32_8 = arith.constant 0 : i32
    %9 = arith.cmpi eq, %arg1, %c0_i32_8 : i32
    %10 = arith.extui %9 : i1 to i32
    %c0_i32_9 = arith.constant 0 : i32
    %11 = arith.cmpi ne, %10, %c0_i32_9 : i32
    scf.if %11 {
      %c0_10 = arith.constant 0 : index
      %c0_11 = arith.constant 0 : index
      %12 = vector.load %arg7[%c0_10, %c0_11] : memref<32x128xf32, #tpu.memory_space<vmem>>, vector<32x128xf32>
      %c0_12 = arith.constant 0 : index
      %c0_13 = arith.constant 0 : index
      %13 = vector.load %arg4[%c0_12, %c0_13] : memref<1x128xf32, #tpu.memory_space<vmem>>, vector<1x128xf32>
      %14 = vector.broadcast %13 : vector<1x128xf32> to vector<32x128xf32>
      %15 = arith.mulf %12, %14 : vector<32x128xf32>
      %c0_14 = arith.constant 0 : index
      %c0_15 = arith.constant 0 : index
      %16 = vector.load %arg5[%c0_14, %c0_15] : memref<1x128xf32, #tpu.memory_space<vmem>>, vector<1x128xf32>
      %17 = vector.broadcast %16 : vector<1x128xf32> to vector<32x128xf32>
      %18 = arith.addf %15, %17 : vector<32x128xf32>
      %cst_16 = arith.constant 0.000000e+00 : f32
      %19 = vector.broadcast %cst_16 : f32 to vector<32x128xf32>
      %20 = arith.maximumf %18, %19 : vector<32x128xf32>
      %c0_17 = arith.constant 0 : index
      %c0_18 = arith.constant 0 : index
      %21 = vector.load %arg6[%c0_17, %c0_18] : memref<32x128xf32, #tpu.memory_space<vmem>>, vector<32x128xf32>
      tpu.vector_store %arg6[%c0_17, %c0_18], %20 {strides = array<i32>} : memref<32x128xf32, #tpu.memory_space<vmem>>, vector<32x128xf32>,
    } else {
    }
    return
  }
  func.func @transform_0(%arg0: i32, %arg1: i32) -> (i32, i32) {
    %c0_i32 = arith.constant 0 : i32
    return %arg0, %arg1 : i32, i32
  }
  func.func @transform_1(%arg0: i32, %arg1: i32) -> (i32, i32) {
    %c0_i32 = arith.constant 0 : i32
    %c0_i32_0 = arith.constant 0 : i32
    return %arg1, %c0_i32 : i32, i32
  }
  func.func @transform_2(%arg0: i32, %arg1: i32) -> (i32, i32) {
    %c0_i32 = arith.constant 0 : i32
    %c0_i32_0 = arith.constant 0 : i32
    %c0_i32_1 = arith.constant 0 : i32
    return %c0_i32, %c0_i32_0 : i32, i32
  }
  func.func @transform_3(%arg0: i32, %arg1: i32) -> (i32, i32) {
    %c0_i32 = arith.constant 0 : i32
    %c0_i32_0 = arith.constant 0 : i32
    %c0_i32_1 = arith.constant 0 : i32
    return %c0_i32, %c0_i32_0 : i32, i32
  }
  func.func @transform_4(%arg0: i32, %arg1: i32) -> (i32, i32) {
    %c0_i32 = arith.constant 0 : i32
    %c0_i32_0 = arith.constant 0 : i32
    return %arg0, %c0_i32 : i32, i32
  }
}

module attributes {stable_mosaic.version = 11 : i64} {
  func.func @_fused_matmul_res_kernel(%arg0: i32, %arg1: i32, %arg2: memref<32x128xbf16, #tpu.memory_space<vmem>>, %arg3: memref<128x128xbf16, #tpu.memory_space<vmem>>, %arg4: memref<1x128xf32, #tpu.memory_space<vmem>>, %arg5: memref<1x128xf32, #tpu.memory_space<vmem>>, %arg6: memref<32x128xf32, #tpu.memory_space<vmem>>, %arg7: memref<32x128xf32, #tpu.memory_space<vmem>>, %arg8: memref<32x128xf32, #tpu.memory_space<vmem>>) attributes {dimension_semantics = [#tpu.dimension_semantics<parallel>, #tpu.dimension_semantics<arbitrary>], iteration_bounds = array<i64: 1, 1>, scalar_prefetch = 0 : i64, scratch_operands = 1 : i64, tpu.core_type = #tpu.core_type<tc>, window_params = [{transform_indices = @transform_0, window_bounds = array<i64: 32, 128>}, {transform_indices = @transform_1, window_bounds = array<i64: 128, 128>}, {pipeline_mode = #tpu.pipeline_mode<synchronous>, transform_indices = @transform_2, window_bounds = array<i64: 1, 128>}, {pipeline_mode = #tpu.pipeline_mode<synchronous>, transform_indices = @transform_3, window_bounds = array<i64: 1, 128>}, {transform_indices = @transform_4, window_bounds = array<i64: 32, 128>}, {transform_indices = @transform_5, window_bounds = array<i64: 32, 128>}]} {
    %c0_i32 = arith.constant 0 : i32
    %0 = arith.cmpi eq, %arg1, %c0_i32 : i32
    %1 = arith.extui %0 : i1 to i32
    %c0_i32_0 = arith.constant 0 : i32
    %2 = arith.cmpi ne, %1, %c0_i32_0 : i32
    scf.if %2 {
      %cst_10 = arith.constant 0.000000e+00 : f32
      %12 = vector.broadcast %cst_10 : f32 to vector<32x128xf32>
      %c0_11 = arith.constant 0 : index
      %c0_12 = arith.constant 0 : index
      %13 = vector.load %arg8[%c0_11, %c0_12] : memref<32x128xf32, #tpu.memory_space<vmem>>, vector<32x128xf32>
      tpu.vector_store %arg8[%c0_11, %c0_12], %12 {strides = array<i32>} : memref<32x128xf32, #tpu.memory_space<vmem>>, vector<32x128xf32>,
    } else {
    }
    %c0 = arith.constant 0 : index
    %c0_1 = arith.constant 0 : index
    %3 = vector.load %arg8[%c0, %c0_1] : memref<32x128xf32, #tpu.memory_space<vmem>>, vector<32x128xf32>
    %c0_2 = arith.constant 0 : index
    %c0_3 = arith.constant 0 : index
    %4 = vector.load %arg2[%c0_2, %c0_3] : memref<32x128xbf16, #tpu.memory_space<vmem>>, vector<32x128xbf16>
    %c0_4 = arith.constant 0 : index
    %c0_5 = arith.constant 0 : index
    %5 = vector.load %arg3[%c0_4, %c0_5] : memref<128x128xbf16, #tpu.memory_space<vmem>>, vector<128x128xbf16>
    %cst = arith.constant dense<0.000000e+00> : vector<32x128xf32>
    %6 = tpu.matmul %4, %5, %cst {dimension_numbers = #tpu.dot_dimension_numbers<[1], [0], [0], [1], [0, 0, 1, 1], [], []>} : vector<32x128xbf16>, vector<128x128xbf16>, vector<32x128xf32> -> vector<32x128xf32>
    %7 = arith.addf %3, %6 : vector<32x128xf32>
    %c0_6 = arith.constant 0 : index
    %c0_7 = arith.constant 0 : index
    %8 = vector.load %arg8[%c0_6, %c0_7] : memref<32x128xf32, #tpu.memory_space<vmem>>, vector<32x128xf32>
    tpu.vector_store %arg8[%c0_6, %c0_7], %7 {strides = array<i32>} : memref<32x128xf32, #tpu.memory_space<vmem>>, vector<32x128xf32>,
    %c0_i32_8 = arith.constant 0 : i32
    %9 = arith.cmpi eq, %arg1, %c0_i32_8 : i32
    %10 = arith.extui %9 : i1 to i32
    %c0_i32_9 = arith.constant 0 : i32
    %11 = arith.cmpi ne, %10, %c0_i32_9 : i32
    scf.if %11 {
      %c0_10 = arith.constant 0 : index
      %c0_11 = arith.constant 0 : index
      %12 = vector.load %arg8[%c0_10, %c0_11] : memref<32x128xf32, #tpu.memory_space<vmem>>, vector<32x128xf32>
      %c0_12 = arith.constant 0 : index
      %c0_13 = arith.constant 0 : index
      %13 = vector.load %arg4[%c0_12, %c0_13] : memref<1x128xf32, #tpu.memory_space<vmem>>, vector<1x128xf32>
      %14 = vector.broadcast %13 : vector<1x128xf32> to vector<32x128xf32>
      %15 = arith.mulf %12, %14 : vector<32x128xf32>
      %c0_14 = arith.constant 0 : index
      %c0_15 = arith.constant 0 : index
      %16 = vector.load %arg5[%c0_14, %c0_15] : memref<1x128xf32, #tpu.memory_space<vmem>>, vector<1x128xf32>
      %17 = vector.broadcast %16 : vector<1x128xf32> to vector<32x128xf32>
      %18 = arith.addf %15, %17 : vector<32x128xf32>
      %c0_16 = arith.constant 0 : index
      %c0_17 = arith.constant 0 : index
      %19 = vector.load %arg6[%c0_16, %c0_17] : memref<32x128xf32, #tpu.memory_space<vmem>>, vector<32x128xf32>
      %20 = arith.addf %18, %19 : vector<32x128xf32>
      %cst_18 = arith.constant 0.000000e+00 : f32
      %21 = vector.broadcast %cst_18 : f32 to vector<32x128xf32>
      %22 = arith.maximumf %20, %21 : vector<32x128xf32>
      %c0_19 = arith.constant 0 : index
      %c0_20 = arith.constant 0 : index
      %23 = vector.load %arg7[%c0_19, %c0_20] : memref<32x128xf32, #tpu.memory_space<vmem>>, vector<32x128xf32>
      tpu.vector_store %arg7[%c0_19, %c0_20], %22 {strides = array<i32>} : memref<32x128xf32, #tpu.memory_space<vmem>>, vector<32x128xf32>,
    } else {
    }
    return
  }
  func.func @transform_0(%arg0: i32, %arg1: i32) -> (i32, i32) {
    %c0_i32 = arith.constant 0 : i32
    return %arg0, %arg1 : i32, i32
  }
  func.func @transform_1(%arg0: i32, %arg1: i32) -> (i32, i32) {
    %c0_i32 = arith.constant 0 : i32
    %c0_i32_0 = arith.constant 0 : i32
    return %arg1, %c0_i32 : i32, i32
  }
  func.func @transform_2(%arg0: i32, %arg1: i32) -> (i32, i32) {
    %c0_i32 = arith.constant 0 : i32
    %c0_i32_0 = arith.constant 0 : i32
    %c0_i32_1 = arith.constant 0 : i32
    return %c0_i32, %c0_i32_0 : i32, i32
  }
  func.func @transform_3(%arg0: i32, %arg1: i32) -> (i32, i32) {
    %c0_i32 = arith.constant 0 : i32
    %c0_i32_0 = arith.constant 0 : i32
    %c0_i32_1 = arith.constant 0 : i32
    return %c0_i32, %c0_i32_0 : i32, i32
  }
  func.func @transform_4(%arg0: i32, %arg1: i32) -> (i32, i32) {
    %c0_i32 = arith.constant 0 : i32
    %c0_i32_0 = arith.constant 0 : i32
    return %arg0, %c0_i32 : i32, i32
  }
  func.func @transform_5(%arg0: i32, %arg1: i32) -> (i32, i32) {
    %c0_i32 = arith.constant 0 : i32
    %c0_i32_0 = arith.constant 0 : i32
    return %arg0, %c0_i32 : i32, i32
  }
}

module attributes {stable_mosaic.version = 11 : i64} {
  func.func @_fused_matmul_kernel(%arg0: i32, %arg1: i32, %arg2: memref<32x128xbf16, #tpu.memory_space<vmem>>, %arg3: memref<128x128xbf16, #tpu.memory_space<vmem>>, %arg4: memref<1x128xf32, #tpu.memory_space<vmem>>, %arg5: memref<1x128xf32, #tpu.memory_space<vmem>>, %arg6: memref<32x128xf32, #tpu.memory_space<vmem>>, %arg7: memref<32x128xf32, #tpu.memory_space<vmem>>) attributes {dimension_semantics = [#tpu.dimension_semantics<parallel>, #tpu.dimension_semantics<arbitrary>], iteration_bounds = array<i64: 1, 1>, scalar_prefetch = 0 : i64, scratch_operands = 1 : i64, tpu.core_type = #tpu.core_type<tc>, window_params = [{transform_indices = @transform_0, window_bounds = array<i64: 32, 128>}, {transform_indices = @transform_1, window_bounds = array<i64: 128, 128>}, {pipeline_mode = #tpu.pipeline_mode<synchronous>, transform_indices = @transform_2, window_bounds = array<i64: 1, 128>}, {pipeline_mode = #tpu.pipeline_mode<synchronous>, transform_indices = @transform_3, window_bounds = array<i64: 1, 128>}, {transform_indices = @transform_4, window_bounds = array<i64: 32, 128>}]} {
    %c0_i32 = arith.constant 0 : i32
    %0 = arith.cmpi eq, %arg1, %c0_i32 : i32
    %1 = arith.extui %0 : i1 to i32
    %c0_i32_0 = arith.constant 0 : i32
    %2 = arith.cmpi ne, %1, %c0_i32_0 : i32
    scf.if %2 {
      %cst_10 = arith.constant 0.000000e+00 : f32
      %12 = vector.broadcast %cst_10 : f32 to vector<32x128xf32>
      %c0_11 = arith.constant 0 : index
      %c0_12 = arith.constant 0 : index
      %13 = vector.load %arg7[%c0_11, %c0_12] : memref<32x128xf32, #tpu.memory_space<vmem>>, vector<32x128xf32>
      tpu.vector_store %arg7[%c0_11, %c0_12], %12 {strides = array<i32>} : memref<32x128xf32, #tpu.memory_space<vmem>>, vector<32x128xf32>,
    } else {
    }
    %c0 = arith.constant 0 : index
    %c0_1 = arith.constant 0 : index
    %3 = vector.load %arg7[%c0, %c0_1] : memref<32x128xf32, #tpu.memory_space<vmem>>, vector<32x128xf32>
    %c0_2 = arith.constant 0 : index
    %c0_3 = arith.constant 0 : index
    %4 = vector.load %arg2[%c0_2, %c0_3] : memref<32x128xbf16, #tpu.memory_space<vmem>>, vector<32x128xbf16>
    %c0_4 = arith.constant 0 : index
    %c0_5 = arith.constant 0 : index
    %5 = vector.load %arg3[%c0_4, %c0_5] : memref<128x128xbf16, #tpu.memory_space<vmem>>, vector<128x128xbf16>
    %cst = arith.constant dense<0.000000e+00> : vector<32x128xf32>
    %6 = tpu.matmul %4, %5, %cst {dimension_numbers = #tpu.dot_dimension_numbers<[1], [0], [0], [1], [0, 0, 1, 1], [], []>} : vector<32x128xbf16>, vector<128x128xbf16>, vector<32x128xf32> -> vector<32x128xf32>
    %7 = arith.addf %3, %6 : vector<32x128xf32>
    %c0_6 = arith.constant 0 : index
    %c0_7 = arith.constant 0 : index
    %8 = vector.load %arg7[%c0_6, %c0_7] : memref<32x128xf32, #tpu.memory_space<vmem>>, vector<32x128xf32>
    tpu.vector_store %arg7[%c0_6, %c0_7], %7 {strides = array<i32>} : memref<32x128xf32, #tpu.memory_space<vmem>>, vector<32x128xf32>,
    %c0_i32_8 = arith.constant 0 : i32
    %9 = arith.cmpi eq, %arg1, %c0_i32_8 : i32
    %10 = arith.extui %9 : i1 to i32
    %c0_i32_9 = arith.constant 0 : i32
    %11 = arith.cmpi ne, %10, %c0_i32_9 : i32
    scf.if %11 {
      %c0_10 = arith.constant 0 : index
      %c0_11 = arith.constant 0 : index
      %12 = vector.load %arg7[%c0_10, %c0_11] : memref<32x128xf32, #tpu.memory_space<vmem>>, vector<32x128xf32>
      %c0_12 = arith.constant 0 : index
      %c0_13 = arith.constant 0 : index
      %13 = vector.load %arg4[%c0_12, %c0_13] : memref<1x128xf32, #tpu.memory_space<vmem>>, vector<1x128xf32>
      %14 = vector.broadcast %13 : vector<1x128xf32> to vector<32x128xf32>
      %15 = arith.mulf %12, %14 : vector<32x128xf32>
      %c0_14 = arith.constant 0 : index
      %c0_15 = arith.constant 0 : index
      %16 = vector.load %arg5[%c0_14, %c0_15] : memref<1x128xf32, #tpu.memory_space<vmem>>, vector<1x128xf32>
      %17 = vector.broadcast %16 : vector<1x128xf32> to vector<32x128xf32>
      %18 = arith.addf %15, %17 : vector<32x128xf32>
      %c0_16 = arith.constant 0 : index
      %c0_17 = arith.constant 0 : index
      %19 = vector.load %arg6[%c0_16, %c0_17] : memref<32x128xf32, #tpu.memory_space<vmem>>, vector<32x128xf32>
      tpu.vector_store %arg6[%c0_16, %c0_17], %18 {strides = array<i32>} : memref<32x128xf32, #tpu.memory_space<vmem>>, vector<32x128xf32>,
    } else {
    }
    return
  }
  func.func @transform_0(%arg0: i32, %arg1: i32) -> (i32, i32) {
    %c0_i32 = arith.constant 0 : i32
    return %arg0, %arg1 : i32, i32
  }
  func.func @transform_1(%arg0: i32, %arg1: i32) -> (i32, i32) {
    %c0_i32 = arith.constant 0 : i32
    %c0_i32_0 = arith.constant 0 : i32
    return %arg1, %c0_i32 : i32, i32
  }
  func.func @transform_2(%arg0: i32, %arg1: i32) -> (i32, i32) {
    %c0_i32 = arith.constant 0 : i32
    %c0_i32_0 = arith.constant 0 : i32
    %c0_i32_1 = arith.constant 0 : i32
    return %c0_i32, %c0_i32_0 : i32, i32
  }
  func.func @transform_3(%arg0: i32, %arg1: i32) -> (i32, i32) {
    %c0_i32 = arith.constant 0 : i32
    %c0_i32_0 = arith.constant 0 : i32
    %c0_i32_1 = arith.constant 0 : i32
    return %c0_i32, %c0_i32_0 : i32, i32
  }
  func.func @transform_4(%arg0: i32, %arg1: i32) -> (i32, i32) {
    %c0_i32 = arith.constant 0 : i32
    %c0_i32_0 = arith.constant 0 : i32
    return %arg0, %c0_i32 : i32, i32
  }
}

module attributes {stable_mosaic.version = 11 : i64} {
  func.func @_fused_matmul_kernel(%arg0: i32, %arg1: i32, %arg2: memref<32x128xbf16, #tpu.memory_space<vmem>>, %arg3: memref<128x128xbf16, #tpu.memory_space<vmem>>, %arg4: memref<1x128xf32, #tpu.memory_space<vmem>>, %arg5: memref<1x128xf32, #tpu.memory_space<vmem>>, %arg6: memref<32x128xf32, #tpu.memory_space<vmem>>, %arg7: memref<32x128xf32, #tpu.memory_space<vmem>>) attributes {dimension_semantics = [#tpu.dimension_semantics<parallel>, #tpu.dimension_semantics<arbitrary>], iteration_bounds = array<i64: 1, 1>, scalar_prefetch = 0 : i64, scratch_operands = 1 : i64, tpu.core_type = #tpu.core_type<tc>, window_params = [{transform_indices = @transform_0, window_bounds = array<i64: 32, 128>}, {transform_indices = @transform_1, window_bounds = array<i64: 128, 128>}, {pipeline_mode = #tpu.pipeline_mode<synchronous>, transform_indices = @transform_2, window_bounds = array<i64: 1, 128>}, {pipeline_mode = #tpu.pipeline_mode<synchronous>, transform_indices = @transform_3, window_bounds = array<i64: 1, 128>}, {transform_indices = @transform_4, window_bounds = array<i64: 32, 128>}]} {
    %c0_i32 = arith.constant 0 : i32
    %0 = arith.cmpi eq, %arg1, %c0_i32 : i32
    %1 = arith.extui %0 : i1 to i32
    %c0_i32_0 = arith.constant 0 : i32
    %2 = arith.cmpi ne, %1, %c0_i32_0 : i32
    scf.if %2 {
      %cst_10 = arith.constant 0.000000e+00 : f32
      %12 = vector.broadcast %cst_10 : f32 to vector<32x128xf32>
      %c0_11 = arith.constant 0 : index
      %c0_12 = arith.constant 0 : index
      %13 = vector.load %arg7[%c0_11, %c0_12] : memref<32x128xf32, #tpu.memory_space<vmem>>, vector<32x128xf32>
      tpu.vector_store %arg7[%c0_11, %c0_12], %12 {strides = array<i32>} : memref<32x128xf32, #tpu.memory_space<vmem>>, vector<32x128xf32>,
    } else {
    }
    %c0 = arith.constant 0 : index
    %c0_1 = arith.constant 0 : index
    %3 = vector.load %arg7[%c0, %c0_1] : memref<32x128xf32, #tpu.memory_space<vmem>>, vector<32x128xf32>
    %c0_2 = arith.constant 0 : index
    %c0_3 = arith.constant 0 : index
    %4 = vector.load %arg2[%c0_2, %c0_3] : memref<32x128xbf16, #tpu.memory_space<vmem>>, vector<32x128xbf16>
    %c0_4 = arith.constant 0 : index
    %c0_5 = arith.constant 0 : index
    %5 = vector.load %arg3[%c0_4, %c0_5] : memref<128x128xbf16, #tpu.memory_space<vmem>>, vector<128x128xbf16>
    %cst = arith.constant dense<0.000000e+00> : vector<32x128xf32>
    %6 = tpu.matmul %4, %5, %cst {dimension_numbers = #tpu.dot_dimension_numbers<[1], [0], [0], [1], [0, 0, 1, 1], [], []>} : vector<32x128xbf16>, vector<128x128xbf16>, vector<32x128xf32> -> vector<32x128xf32>
    %7 = arith.addf %3, %6 : vector<32x128xf32>
    %c0_6 = arith.constant 0 : index
    %c0_7 = arith.constant 0 : index
    %8 = vector.load %arg7[%c0_6, %c0_7] : memref<32x128xf32, #tpu.memory_space<vmem>>, vector<32x128xf32>
    tpu.vector_store %arg7[%c0_6, %c0_7], %7 {strides = array<i32>} : memref<32x128xf32, #tpu.memory_space<vmem>>, vector<32x128xf32>,
    %c0_i32_8 = arith.constant 0 : i32
    %9 = arith.cmpi eq, %arg1, %c0_i32_8 : i32
    %10 = arith.extui %9 : i1 to i32
    %c0_i32_9 = arith.constant 0 : i32
    %11 = arith.cmpi ne, %10, %c0_i32_9 : i32
    scf.if %11 {
      %c0_10 = arith.constant 0 : index
      %c0_11 = arith.constant 0 : index
      %12 = vector.load %arg7[%c0_10, %c0_11] : memref<32x128xf32, #tpu.memory_space<vmem>>, vector<32x128xf32>
      %c0_12 = arith.constant 0 : index
      %c0_13 = arith.constant 0 : index
      %13 = vector.load %arg4[%c0_12, %c0_13] : memref<1x128xf32, #tpu.memory_space<vmem>>, vector<1x128xf32>
      %14 = vector.broadcast %13 : vector<1x128xf32> to vector<32x128xf32>
      %15 = arith.mulf %12, %14 : vector<32x128xf32>
      %c0_14 = arith.constant 0 : index
      %c0_15 = arith.constant 0 : index
      %16 = vector.load %arg5[%c0_14, %c0_15] : memref<1x128xf32, #tpu.memory_space<vmem>>, vector<1x128xf32>
      %17 = vector.broadcast %16 : vector<1x128xf32> to vector<32x128xf32>
      %18 = arith.addf %15, %17 : vector<32x128xf32>
      %cst_16 = arith.constant 0.000000e+00 : f32
      %19 = vector.broadcast %cst_16 : f32 to vector<32x128xf32>
      %20 = arith.maximumf %18, %19 : vector<32x128xf32>
      %c0_17 = arith.constant 0 : index
      %c0_18 = arith.constant 0 : index
      %21 = vector.load %arg6[%c0_17, %c0_18] : memref<32x128xf32, #tpu.memory_space<vmem>>, vector<32x128xf32>
      tpu.vector_store %arg6[%c0_17, %c0_18], %20 {strides = array<i32>} : memref<32x128xf32, #tpu.memory_space<vmem>>, vector<32x128xf32>,
    } else {
    }
    return
  }
  func.func @transform_0(%arg0: i32, %arg1: i32) -> (i32, i32) {
    %c0_i32 = arith.constant 0 : i32
    return %arg0, %arg1 : i32, i32
  }
  func.func @transform_1(%arg0: i32, %arg1: i32) -> (i32, i32) {
    %c0_i32 = arith.constant 0 : i32
    %c0_i32_0 = arith.constant 0 : i32
    return %arg1, %c0_i32 : i32, i32
  }
  func.func @transform_2(%arg0: i32, %arg1: i32) -> (i32, i32) {
    %c0_i32 = arith.constant 0 : i32
    %c0_i32_0 = arith.constant 0 : i32
    %c0_i32_1 = arith.constant 0 : i32
    return %c0_i32, %c0_i32_0 : i32, i32
  }
  func.func @transform_3(%arg0: i32, %arg1: i32) -> (i32, i32) {
    %c0_i32 = arith.constant 0 : i32
    %c0_i32_0 = arith.constant 0 : i32
    %c0_i32_1 = arith.constant 0 : i32
    return %c0_i32, %c0_i32_0 : i32, i32
  }
  func.func @transform_4(%arg0: i32, %arg1: i32) -> (i32, i32) {
    %c0_i32 = arith.constant 0 : i32
    %c0_i32_0 = arith.constant 0 : i32
    return %arg0, %c0_i32 : i32, i32
  }
}

module attributes {stable_mosaic.version = 11 : i64} {
  func.func @_fused_matmul_kernel(%arg0: i32, %arg1: i32, %arg2: memref<8x128xbf16, #tpu.memory_space<vmem>>, %arg3: memref<128x128xbf16, #tpu.memory_space<vmem>>, %arg4: memref<1x128xf32, #tpu.memory_space<vmem>>, %arg5: memref<1x128xf32, #tpu.memory_space<vmem>>, %arg6: memref<8x128xf32, #tpu.memory_space<vmem>>, %arg7: memref<8x128xf32, #tpu.memory_space<vmem>>) attributes {dimension_semantics = [#tpu.dimension_semantics<parallel>, #tpu.dimension_semantics<arbitrary>], iteration_bounds = array<i64: 1, 5>, scalar_prefetch = 0 : i64, scratch_operands = 1 : i64, tpu.core_type = #tpu.core_type<tc>, window_params = [{transform_indices = @transform_0, window_bounds = array<i64: 8, 128>}, {transform_indices = @transform_1, window_bounds = array<i64: 128, 128>}, {pipeline_mode = #tpu.pipeline_mode<synchronous>, transform_indices = @transform_2, window_bounds = array<i64: 1, 128>}, {pipeline_mode = #tpu.pipeline_mode<synchronous>, transform_indices = @transform_3, window_bounds = array<i64: 1, 128>}, {transform_indices = @transform_4, window_bounds = array<i64: 8, 128>}]} {
    %c0_i32 = arith.constant 0 : i32
    %0 = arith.cmpi eq, %arg1, %c0_i32 : i32
    %1 = arith.extui %0 : i1 to i32
    %c0_i32_0 = arith.constant 0 : i32
    %2 = arith.cmpi ne, %1, %c0_i32_0 : i32
    scf.if %2 {
      %cst_9 = arith.constant 0.000000e+00 : f32
      %12 = vector.broadcast %cst_9 : f32 to vector<8x128xf32>
      %c0_10 = arith.constant 0 : index
      %c0_11 = arith.constant 0 : index
      %13 = vector.load %arg7[%c0_10, %c0_11] : memref<8x128xf32, #tpu.memory_space<vmem>>, vector<8x128xf32>
      tpu.vector_store %arg7[%c0_10, %c0_11], %12 {strides = array<i32>} : memref<8x128xf32, #tpu.memory_space<vmem>>, vector<8x128xf32>,
    } else {
    }
    %c0 = arith.constant 0 : index
    %c0_1 = arith.constant 0 : index
    %3 = vector.load %arg7[%c0, %c0_1] : memref<8x128xf32, #tpu.memory_space<vmem>>, vector<8x128xf32>
    %c0_2 = arith.constant 0 : index
    %c0_3 = arith.constant 0 : index
    %4 = vector.load %arg2[%c0_2, %c0_3] : memref<8x128xbf16, #tpu.memory_space<vmem>>, vector<8x128xbf16>
    %c0_4 = arith.constant 0 : index
    %c0_5 = arith.constant 0 : index
    %5 = vector.load %arg3[%c0_4, %c0_5] : memref<128x128xbf16, #tpu.memory_space<vmem>>, vector<128x128xbf16>
    %cst = arith.constant dense<0.000000e+00> : vector<8x128xf32>
    %6 = tpu.matmul %4, %5, %cst {dimension_numbers = #tpu.dot_dimension_numbers<[1], [0], [0], [1], [0, 0, 1, 1], [], []>} : vector<8x128xbf16>, vector<128x128xbf16>, vector<8x128xf32> -> vector<8x128xf32>
    %7 = arith.addf %3, %6 : vector<8x128xf32>
    %c0_6 = arith.constant 0 : index
    %c0_7 = arith.constant 0 : index
    %8 = vector.load %arg7[%c0_6, %c0_7] : memref<8x128xf32, #tpu.memory_space<vmem>>, vector<8x128xf32>
    tpu.vector_store %arg7[%c0_6, %c0_7], %7 {strides = array<i32>} : memref<8x128xf32, #tpu.memory_space<vmem>>, vector<8x128xf32>,
    %c4_i32 = arith.constant 4 : i32
    %9 = arith.cmpi eq, %arg1, %c4_i32 : i32
    %10 = arith.extui %9 : i1 to i32
    %c0_i32_8 = arith.constant 0 : i32
    %11 = arith.cmpi ne, %10, %c0_i32_8 : i32
    scf.if %11 {
      %c0_9 = arith.constant 0 : index
      %c0_10 = arith.constant 0 : index
      %12 = vector.load %arg7[%c0_9, %c0_10] : memref<8x128xf32, #tpu.memory_space<vmem>>, vector<8x128xf32>
      %c0_11 = arith.constant 0 : index
      %c0_12 = arith.constant 0 : index
      %13 = vector.load %arg4[%c0_11, %c0_12] : memref<1x128xf32, #tpu.memory_space<vmem>>, vector<1x128xf32>
      %14 = vector.broadcast %13 : vector<1x128xf32> to vector<8x128xf32>
      %15 = arith.mulf %12, %14 : vector<8x128xf32>
      %c0_13 = arith.constant 0 : index
      %c0_14 = arith.constant 0 : index
      %16 = vector.load %arg5[%c0_13, %c0_14] : memref<1x128xf32, #tpu.memory_space<vmem>>, vector<1x128xf32>
      %17 = vector.broadcast %16 : vector<1x128xf32> to vector<8x128xf32>
      %18 = arith.addf %15, %17 : vector<8x128xf32>
      %cst_15 = arith.constant 0.000000e+00 : f32
      %19 = vector.broadcast %cst_15 : f32 to vector<8x128xf32>
      %20 = arith.maximumf %18, %19 : vector<8x128xf32>
      %c0_16 = arith.constant 0 : index
      %c0_17 = arith.constant 0 : index
      %21 = vector.load %arg6[%c0_16, %c0_17] : memref<8x128xf32, #tpu.memory_space<vmem>>, vector<8x128xf32>
      tpu.vector_store %arg6[%c0_16, %c0_17], %20 {strides = array<i32>} : memref<8x128xf32, #tpu.memory_space<vmem>>, vector<8x128xf32>,
    } else {
    }
    return
  }
  func.func @transform_0(%arg0: i32, %arg1: i32) -> (i32, i32) {
    %c0_i32 = arith.constant 0 : i32
    return %arg0, %arg1 : i32, i32
  }
  func.func @transform_1(%arg0: i32, %arg1: i32) -> (i32, i32) {
    %c0_i32 = arith.constant 0 : i32
    %c0_i32_0 = arith.constant 0 : i32
    return %arg1, %c0_i32 : i32, i32
  }
  func.func @transform_2(%arg0: i32, %arg1: i32) -> (i32, i32) {
    %c0_i32 = arith.constant 0 : i32
    %c0_i32_0 = arith.constant 0 : i32
    %c0_i32_1 = arith.constant 0 : i32
    return %c0_i32, %c0_i32_0 : i32, i32
  }
  func.func @transform_3(%arg0: i32, %arg1: i32) -> (i32, i32) {
    %c0_i32 = arith.constant 0 : i32
    %c0_i32_0 = arith.constant 0 : i32
    %c0_i32_1 = arith.constant 0 : i32
    return %c0_i32, %c0_i32_0 : i32, i32
  }
  func.func @transform_4(%arg0: i32, %arg1: i32) -> (i32, i32) {
    %c0_i32 = arith.constant 0 : i32
    %c0_i32_0 = arith.constant 0 : i32
    return %arg0, %c0_i32 : i32, i32
  }
}

module attributes {stable_mosaic.version = 11 : i64} {
  func.func @_fused_matmul_kernel(%arg0: i32, %arg1: i32, %arg2: memref<8x128xbf16, #tpu.memory_space<vmem>>, %arg3: memref<128x256xbf16, #tpu.memory_space<vmem>>, %arg4: memref<1x256xf32, #tpu.memory_space<vmem>>, %arg5: memref<1x256xf32, #tpu.memory_space<vmem>>, %arg6: memref<8x256xf32, #tpu.memory_space<vmem>>, %arg7: memref<8x256xf32, #tpu.memory_space<vmem>>) attributes {dimension_semantics = [#tpu.dimension_semantics<parallel>, #tpu.dimension_semantics<arbitrary>], iteration_bounds = array<i64: 1, 1>, scalar_prefetch = 0 : i64, scratch_operands = 1 : i64, tpu.core_type = #tpu.core_type<tc>, window_params = [{transform_indices = @transform_0, window_bounds = array<i64: 8, 128>}, {transform_indices = @transform_1, window_bounds = array<i64: 128, 256>}, {pipeline_mode = #tpu.pipeline_mode<synchronous>, transform_indices = @transform_2, window_bounds = array<i64: 1, 256>}, {pipeline_mode = #tpu.pipeline_mode<synchronous>, transform_indices = @transform_3, window_bounds = array<i64: 1, 256>}, {transform_indices = @transform_4, window_bounds = array<i64: 8, 256>}]} {
    %c0_i32 = arith.constant 0 : i32
    %0 = arith.cmpi eq, %arg1, %c0_i32 : i32
    %1 = arith.extui %0 : i1 to i32
    %c0_i32_0 = arith.constant 0 : i32
    %2 = arith.cmpi ne, %1, %c0_i32_0 : i32
    scf.if %2 {
      %cst_10 = arith.constant 0.000000e+00 : f32
      %12 = vector.broadcast %cst_10 : f32 to vector<8x256xf32>
      %c0_11 = arith.constant 0 : index
      %c0_12 = arith.constant 0 : index
      %13 = vector.load %arg7[%c0_11, %c0_12] : memref<8x256xf32, #tpu.memory_space<vmem>>, vector<8x256xf32>
      tpu.vector_store %arg7[%c0_11, %c0_12], %12 {strides = array<i32>} : memref<8x256xf32, #tpu.memory_space<vmem>>, vector<8x256xf32>,
    } else {
    }
    %c0 = arith.constant 0 : index
    %c0_1 = arith.constant 0 : index
    %3 = vector.load %arg7[%c0, %c0_1] : memref<8x256xf32, #tpu.memory_space<vmem>>, vector<8x256xf32>
    %c0_2 = arith.constant 0 : index
    %c0_3 = arith.constant 0 : index
    %4 = vector.load %arg2[%c0_2, %c0_3] : memref<8x128xbf16, #tpu.memory_space<vmem>>, vector<8x128xbf16>
    %c0_4 = arith.constant 0 : index
    %c0_5 = arith.constant 0 : index
    %5 = vector.load %arg3[%c0_4, %c0_5] : memref<128x256xbf16, #tpu.memory_space<vmem>>, vector<128x256xbf16>
    %cst = arith.constant dense<0.000000e+00> : vector<8x256xf32>
    %6 = tpu.matmul %4, %5, %cst {dimension_numbers = #tpu.dot_dimension_numbers<[1], [0], [0], [1], [0, 0, 1, 1], [], []>} : vector<8x128xbf16>, vector<128x256xbf16>, vector<8x256xf32> -> vector<8x256xf32>
    %7 = arith.addf %3, %6 : vector<8x256xf32>
    %c0_6 = arith.constant 0 : index
    %c0_7 = arith.constant 0 : index
    %8 = vector.load %arg7[%c0_6, %c0_7] : memref<8x256xf32, #tpu.memory_space<vmem>>, vector<8x256xf32>
    tpu.vector_store %arg7[%c0_6, %c0_7], %7 {strides = array<i32>} : memref<8x256xf32, #tpu.memory_space<vmem>>, vector<8x256xf32>,
    %c0_i32_8 = arith.constant 0 : i32
    %9 = arith.cmpi eq, %arg1, %c0_i32_8 : i32
    %10 = arith.extui %9 : i1 to i32
    %c0_i32_9 = arith.constant 0 : i32
    %11 = arith.cmpi ne, %10, %c0_i32_9 : i32
    scf.if %11 {
      %c0_10 = arith.constant 0 : index
      %c0_11 = arith.constant 0 : index
      %12 = vector.load %arg7[%c0_10, %c0_11] : memref<8x256xf32, #tpu.memory_space<vmem>>, vector<8x256xf32>
      %c0_12 = arith.constant 0 : index
      %c0_13 = arith.constant 0 : index
      %13 = vector.load %arg4[%c0_12, %c0_13] : memref<1x256xf32, #tpu.memory_space<vmem>>, vector<1x256xf32>
      %14 = vector.broadcast %13 : vector<1x256xf32> to vector<8x256xf32>
      %15 = arith.mulf %12, %14 : vector<8x256xf32>
      %c0_14 = arith.constant 0 : index
      %c0_15 = arith.constant 0 : index
      %16 = vector.load %arg5[%c0_14, %c0_15] : memref<1x256xf32, #tpu.memory_space<vmem>>, vector<1x256xf32>
      %17 = vector.broadcast %16 : vector<1x256xf32> to vector<8x256xf32>
      %18 = arith.addf %15, %17 : vector<8x256xf32>
      %c0_16 = arith.constant 0 : index
      %c0_17 = arith.constant 0 : index
      %19 = vector.load %arg6[%c0_16, %c0_17] : memref<8x256xf32, #tpu.memory_space<vmem>>, vector<8x256xf32>
      tpu.vector_store %arg6[%c0_16, %c0_17], %18 {strides = array<i32>} : memref<8x256xf32, #tpu.memory_space<vmem>>, vector<8x256xf32>,
    } else {
    }
    return
  }
  func.func @transform_0(%arg0: i32, %arg1: i32) -> (i32, i32) {
    %c0_i32 = arith.constant 0 : i32
    return %arg0, %arg1 : i32, i32
  }
  func.func @transform_1(%arg0: i32, %arg1: i32) -> (i32, i32) {
    %c0_i32 = arith.constant 0 : i32
    %c0_i32_0 = arith.constant 0 : i32
    return %arg1, %c0_i32 : i32, i32
  }
  func.func @transform_2(%arg0: i32, %arg1: i32) -> (i32, i32) {
    %c0_i32 = arith.constant 0 : i32
    %c0_i32_0 = arith.constant 0 : i32
    %c0_i32_1 = arith.constant 0 : i32
    return %c0_i32, %c0_i32_0 : i32, i32
  }
  func.func @transform_3(%arg0: i32, %arg1: i32) -> (i32, i32) {
    %c0_i32 = arith.constant 0 : i32
    %c0_i32_0 = arith.constant 0 : i32
    %c0_i32_1 = arith.constant 0 : i32
    return %c0_i32, %c0_i32_0 : i32, i32
  }
  func.func @transform_4(%arg0: i32, %arg1: i32) -> (i32, i32) {
    %c0_i32 = arith.constant 0 : i32
    %c0_i32_0 = arith.constant 0 : i32
    return %arg0, %c0_i32 : i32, i32
  }
}

module attributes {stable_mosaic.version = 11 : i64} {
  func.func @_fused_matmul_res_kernel(%arg0: i32, %arg1: i32, %arg2: memref<8x128xbf16, #tpu.memory_space<vmem>>, %arg3: memref<128x256xbf16, #tpu.memory_space<vmem>>, %arg4: memref<1x256xf32, #tpu.memory_space<vmem>>, %arg5: memref<1x256xf32, #tpu.memory_space<vmem>>, %arg6: memref<8x256xf32, #tpu.memory_space<vmem>>, %arg7: memref<8x256xf32, #tpu.memory_space<vmem>>, %arg8: memref<8x256xf32, #tpu.memory_space<vmem>>) attributes {dimension_semantics = [#tpu.dimension_semantics<parallel>, #tpu.dimension_semantics<arbitrary>], iteration_bounds = array<i64: 1, 1>, scalar_prefetch = 0 : i64, scratch_operands = 1 : i64, tpu.core_type = #tpu.core_type<tc>, window_params = [{transform_indices = @transform_0, window_bounds = array<i64: 8, 128>}, {transform_indices = @transform_1, window_bounds = array<i64: 128, 256>}, {pipeline_mode = #tpu.pipeline_mode<synchronous>, transform_indices = @transform_2, window_bounds = array<i64: 1, 256>}, {pipeline_mode = #tpu.pipeline_mode<synchronous>, transform_indices = @transform_3, window_bounds = array<i64: 1, 256>}, {transform_indices = @transform_4, window_bounds = array<i64: 8, 256>}, {transform_indices = @transform_5, window_bounds = array<i64: 8, 256>}]} {
    %c0_i32 = arith.constant 0 : i32
    %0 = arith.cmpi eq, %arg1, %c0_i32 : i32
    %1 = arith.extui %0 : i1 to i32
    %c0_i32_0 = arith.constant 0 : i32
    %2 = arith.cmpi ne, %1, %c0_i32_0 : i32
    scf.if %2 {
      %cst_10 = arith.constant 0.000000e+00 : f32
      %12 = vector.broadcast %cst_10 : f32 to vector<8x256xf32>
      %c0_11 = arith.constant 0 : index
      %c0_12 = arith.constant 0 : index
      %13 = vector.load %arg8[%c0_11, %c0_12] : memref<8x256xf32, #tpu.memory_space<vmem>>, vector<8x256xf32>
      tpu.vector_store %arg8[%c0_11, %c0_12], %12 {strides = array<i32>} : memref<8x256xf32, #tpu.memory_space<vmem>>, vector<8x256xf32>,
    } else {
    }
    %c0 = arith.constant 0 : index
    %c0_1 = arith.constant 0 : index
    %3 = vector.load %arg8[%c0, %c0_1] : memref<8x256xf32, #tpu.memory_space<vmem>>, vector<8x256xf32>
    %c0_2 = arith.constant 0 : index
    %c0_3 = arith.constant 0 : index
    %4 = vector.load %arg2[%c0_2, %c0_3] : memref<8x128xbf16, #tpu.memory_space<vmem>>, vector<8x128xbf16>
    %c0_4 = arith.constant 0 : index
    %c0_5 = arith.constant 0 : index
    %5 = vector.load %arg3[%c0_4, %c0_5] : memref<128x256xbf16, #tpu.memory_space<vmem>>, vector<128x256xbf16>
    %cst = arith.constant dense<0.000000e+00> : vector<8x256xf32>
    %6 = tpu.matmul %4, %5, %cst {dimension_numbers = #tpu.dot_dimension_numbers<[1], [0], [0], [1], [0, 0, 1, 1], [], []>} : vector<8x128xbf16>, vector<128x256xbf16>, vector<8x256xf32> -> vector<8x256xf32>
    %7 = arith.addf %3, %6 : vector<8x256xf32>
    %c0_6 = arith.constant 0 : index
    %c0_7 = arith.constant 0 : index
    %8 = vector.load %arg8[%c0_6, %c0_7] : memref<8x256xf32, #tpu.memory_space<vmem>>, vector<8x256xf32>
    tpu.vector_store %arg8[%c0_6, %c0_7], %7 {strides = array<i32>} : memref<8x256xf32, #tpu.memory_space<vmem>>, vector<8x256xf32>,
    %c0_i32_8 = arith.constant 0 : i32
    %9 = arith.cmpi eq, %arg1, %c0_i32_8 : i32
    %10 = arith.extui %9 : i1 to i32
    %c0_i32_9 = arith.constant 0 : i32
    %11 = arith.cmpi ne, %10, %c0_i32_9 : i32
    scf.if %11 {
      %c0_10 = arith.constant 0 : index
      %c0_11 = arith.constant 0 : index
      %12 = vector.load %arg8[%c0_10, %c0_11] : memref<8x256xf32, #tpu.memory_space<vmem>>, vector<8x256xf32>
      %c0_12 = arith.constant 0 : index
      %c0_13 = arith.constant 0 : index
      %13 = vector.load %arg4[%c0_12, %c0_13] : memref<1x256xf32, #tpu.memory_space<vmem>>, vector<1x256xf32>
      %14 = vector.broadcast %13 : vector<1x256xf32> to vector<8x256xf32>
      %15 = arith.mulf %12, %14 : vector<8x256xf32>
      %c0_14 = arith.constant 0 : index
      %c0_15 = arith.constant 0 : index
      %16 = vector.load %arg5[%c0_14, %c0_15] : memref<1x256xf32, #tpu.memory_space<vmem>>, vector<1x256xf32>
      %17 = vector.broadcast %16 : vector<1x256xf32> to vector<8x256xf32>
      %18 = arith.addf %15, %17 : vector<8x256xf32>
      %c0_16 = arith.constant 0 : index
      %c0_17 = arith.constant 0 : index
      %19 = vector.load %arg6[%c0_16, %c0_17] : memref<8x256xf32, #tpu.memory_space<vmem>>, vector<8x256xf32>
      %20 = arith.addf %18, %19 : vector<8x256xf32>
      %cst_18 = arith.constant 0.000000e+00 : f32
      %21 = vector.broadcast %cst_18 : f32 to vector<8x256xf32>
      %22 = arith.maximumf %20, %21 : vector<8x256xf32>
      %c0_19 = arith.constant 0 : index
      %c0_20 = arith.constant 0 : index
      %23 = vector.load %arg7[%c0_19, %c0_20] : memref<8x256xf32, #tpu.memory_space<vmem>>, vector<8x256xf32>
      tpu.vector_store %arg7[%c0_19, %c0_20], %22 {strides = array<i32>} : memref<8x256xf32, #tpu.memory_space<vmem>>, vector<8x256xf32>,
    } else {
    }
    return
  }
  func.func @transform_0(%arg0: i32, %arg1: i32) -> (i32, i32) {
    %c0_i32 = arith.constant 0 : i32
    return %arg0, %arg1 : i32, i32
  }
  func.func @transform_1(%arg0: i32, %arg1: i32) -> (i32, i32) {
    %c0_i32 = arith.constant 0 : i32
    %c0_i32_0 = arith.constant 0 : i32
    return %arg1, %c0_i32 : i32, i32
  }
  func.func @transform_2(%arg0: i32, %arg1: i32) -> (i32, i32) {
    %c0_i32 = arith.constant 0 : i32
    %c0_i32_0 = arith.constant 0 : i32
    %c0_i32_1 = arith.constant 0 : i32
    return %c0_i32, %c0_i32_0 : i32, i32
  }
  func.func @transform_3(%arg0: i32, %arg1: i32) -> (i32, i32) {
    %c0_i32 = arith.constant 0 : i32
    %c0_i32_0 = arith.constant 0 : i32
    %c0_i32_1 = arith.constant 0 : i32
    return %c0_i32, %c0_i32_0 : i32, i32
  }
  func.func @transform_4(%arg0: i32, %arg1: i32) -> (i32, i32) {
    %c0_i32 = arith.constant 0 : i32
    %c0_i32_0 = arith.constant 0 : i32
    return %arg0, %c0_i32 : i32, i32
  }
  func.func @transform_5(%arg0: i32, %arg1: i32) -> (i32, i32) {
    %c0_i32 = arith.constant 0 : i32
    %c0_i32_0 = arith.constant 0 : i32
    return %arg0, %c0_i32 : i32, i32
  }
}

module attributes {stable_mosaic.version = 11 : i64} {
  func.func @_fused_matmul_kernel(%arg0: i32, %arg1: i32, %arg2: memref<8x256xbf16, #tpu.memory_space<vmem>>, %arg3: memref<256x512xbf16, #tpu.memory_space<vmem>>, %arg4: memref<1x512xf32, #tpu.memory_space<vmem>>, %arg5: memref<1x512xf32, #tpu.memory_space<vmem>>, %arg6: memref<8x512xf32, #tpu.memory_space<vmem>>, %arg7: memref<8x512xf32, #tpu.memory_space<vmem>>) attributes {dimension_semantics = [#tpu.dimension_semantics<parallel>, #tpu.dimension_semantics<arbitrary>], iteration_bounds = array<i64: 1, 1>, scalar_prefetch = 0 : i64, scratch_operands = 1 : i64, tpu.core_type = #tpu.core_type<tc>, window_params = [{transform_indices = @transform_0, window_bounds = array<i64: 8, 256>}, {transform_indices = @transform_1, window_bounds = array<i64: 256, 512>}, {pipeline_mode = #tpu.pipeline_mode<synchronous>, transform_indices = @transform_2, window_bounds = array<i64: 1, 512>}, {pipeline_mode = #tpu.pipeline_mode<synchronous>, transform_indices = @transform_3, window_bounds = array<i64: 1, 512>}, {transform_indices = @transform_4, window_bounds = array<i64: 8, 512>}]} {
    %c0_i32 = arith.constant 0 : i32
    %0 = arith.cmpi eq, %arg1, %c0_i32 : i32
    %1 = arith.extui %0 : i1 to i32
    %c0_i32_0 = arith.constant 0 : i32
    %2 = arith.cmpi ne, %1, %c0_i32_0 : i32
    scf.if %2 {
      %cst_10 = arith.constant 0.000000e+00 : f32
      %12 = vector.broadcast %cst_10 : f32 to vector<8x512xf32>
      %c0_11 = arith.constant 0 : index
      %c0_12 = arith.constant 0 : index
      %13 = vector.load %arg7[%c0_11, %c0_12] : memref<8x512xf32, #tpu.memory_space<vmem>>, vector<8x512xf32>
      tpu.vector_store %arg7[%c0_11, %c0_12], %12 {strides = array<i32>} : memref<8x512xf32, #tpu.memory_space<vmem>>, vector<8x512xf32>,
    } else {
    }
    %c0 = arith.constant 0 : index
    %c0_1 = arith.constant 0 : index
    %3 = vector.load %arg7[%c0, %c0_1] : memref<8x512xf32, #tpu.memory_space<vmem>>, vector<8x512xf32>
    %c0_2 = arith.constant 0 : index
    %c0_3 = arith.constant 0 : index
    %4 = vector.load %arg2[%c0_2, %c0_3] : memref<8x256xbf16, #tpu.memory_space<vmem>>, vector<8x256xbf16>
    %c0_4 = arith.constant 0 : index
    %c0_5 = arith.constant 0 : index
    %5 = vector.load %arg3[%c0_4, %c0_5] : memref<256x512xbf16, #tpu.memory_space<vmem>>, vector<256x512xbf16>
    %cst = arith.constant dense<0.000000e+00> : vector<8x512xf32>
    %6 = tpu.matmul %4, %5, %cst {dimension_numbers = #tpu.dot_dimension_numbers<[1], [0], [0], [1], [0, 0, 1, 1], [], []>} : vector<8x256xbf16>, vector<256x512xbf16>, vector<8x512xf32> -> vector<8x512xf32>
    %7 = arith.addf %3, %6 : vector<8x512xf32>
    %c0_6 = arith.constant 0 : index
    %c0_7 = arith.constant 0 : index
    %8 = vector.load %arg7[%c0_6, %c0_7] : memref<8x512xf32, #tpu.memory_space<vmem>>, vector<8x512xf32>
    tpu.vector_store %arg7[%c0_6, %c0_7], %7 {strides = array<i32>} : memref<8x512xf32, #tpu.memory_space<vmem>>, vector<8x512xf32>,
    %c0_i32_8 = arith.constant 0 : i32
    %9 = arith.cmpi eq, %arg1, %c0_i32_8 : i32
    %10 = arith.extui %9 : i1 to i32
    %c0_i32_9 = arith.constant 0 : i32
    %11 = arith.cmpi ne, %10, %c0_i32_9 : i32
    scf.if %11 {
      %c0_10 = arith.constant 0 : index
      %c0_11 = arith.constant 0 : index
      %12 = vector.load %arg7[%c0_10, %c0_11] : memref<8x512xf32, #tpu.memory_space<vmem>>, vector<8x512xf32>
      %c0_12 = arith.constant 0 : index
      %c0_13 = arith.constant 0 : index
      %13 = vector.load %arg4[%c0_12, %c0_13] : memref<1x512xf32, #tpu.memory_space<vmem>>, vector<1x512xf32>
      %14 = vector.broadcast %13 : vector<1x512xf32> to vector<8x512xf32>
      %15 = arith.mulf %12, %14 : vector<8x512xf32>
      %c0_14 = arith.constant 0 : index
      %c0_15 = arith.constant 0 : index
      %16 = vector.load %arg5[%c0_14, %c0_15] : memref<1x512xf32, #tpu.memory_space<vmem>>, vector<1x512xf32>
      %17 = vector.broadcast %16 : vector<1x512xf32> to vector<8x512xf32>
      %18 = arith.addf %15, %17 : vector<8x512xf32>
      %c0_16 = arith.constant 0 : index
      %c0_17 = arith.constant 0 : index
      %19 = vector.load %arg6[%c0_16, %c0_17] : memref<8x512xf32, #tpu.memory_space<vmem>>, vector<8x512xf32>
      tpu.vector_store %arg6[%c0_16, %c0_17], %18 {strides = array<i32>} : memref<8x512xf32, #tpu.memory_space<vmem>>, vector<8x512xf32>,
    } else {
    }
    return
  }
  func.func @transform_0(%arg0: i32, %arg1: i32) -> (i32, i32) {
    %c0_i32 = arith.constant 0 : i32
    return %arg0, %arg1 : i32, i32
  }
  func.func @transform_1(%arg0: i32, %arg1: i32) -> (i32, i32) {
    %c0_i32 = arith.constant 0 : i32
    %c0_i32_0 = arith.constant 0 : i32
    return %arg1, %c0_i32 : i32, i32
  }
  func.func @transform_2(%arg0: i32, %arg1: i32) -> (i32, i32) {
    %c0_i32 = arith.constant 0 : i32
    %c0_i32_0 = arith.constant 0 : i32
    %c0_i32_1 = arith.constant 0 : i32
    return %c0_i32, %c0_i32_0 : i32, i32
  }
  func.func @transform_3(%arg0: i32, %arg1: i32) -> (i32, i32) {
    %c0_i32 = arith.constant 0 : i32
    %c0_i32_0 = arith.constant 0 : i32
    %c0_i32_1 = arith.constant 0 : i32
    return %c0_i32, %c0_i32_0 : i32, i32
  }
  func.func @transform_4(%arg0: i32, %arg1: i32) -> (i32, i32) {
    %c0_i32 = arith.constant 0 : i32
    %c0_i32_0 = arith.constant 0 : i32
    return %arg0, %c0_i32 : i32, i32
  }
}

module attributes {stable_mosaic.version = 11 : i64} {
  func.func @_fused_matmul_kernel(%arg0: i32, %arg1: i32, %arg2: memref<8x256xbf16, #tpu.memory_space<vmem>>, %arg3: memref<256x128xbf16, #tpu.memory_space<vmem>>, %arg4: memref<1x128xf32, #tpu.memory_space<vmem>>, %arg5: memref<1x128xf32, #tpu.memory_space<vmem>>, %arg6: memref<8x128xf32, #tpu.memory_space<vmem>>, %arg7: memref<8x128xf32, #tpu.memory_space<vmem>>) attributes {dimension_semantics = [#tpu.dimension_semantics<parallel>, #tpu.dimension_semantics<arbitrary>], iteration_bounds = array<i64: 1, 1>, scalar_prefetch = 0 : i64, scratch_operands = 1 : i64, tpu.core_type = #tpu.core_type<tc>, window_params = [{transform_indices = @transform_0, window_bounds = array<i64: 8, 256>}, {transform_indices = @transform_1, window_bounds = array<i64: 256, 128>}, {pipeline_mode = #tpu.pipeline_mode<synchronous>, transform_indices = @transform_2, window_bounds = array<i64: 1, 128>}, {pipeline_mode = #tpu.pipeline_mode<synchronous>, transform_indices = @transform_3, window_bounds = array<i64: 1, 128>}, {transform_indices = @transform_4, window_bounds = array<i64: 8, 128>}]} {
    %c0_i32 = arith.constant 0 : i32
    %0 = arith.cmpi eq, %arg1, %c0_i32 : i32
    %1 = arith.extui %0 : i1 to i32
    %c0_i32_0 = arith.constant 0 : i32
    %2 = arith.cmpi ne, %1, %c0_i32_0 : i32
    scf.if %2 {
      %cst_10 = arith.constant 0.000000e+00 : f32
      %12 = vector.broadcast %cst_10 : f32 to vector<8x128xf32>
      %c0_11 = arith.constant 0 : index
      %c0_12 = arith.constant 0 : index
      %13 = vector.load %arg7[%c0_11, %c0_12] : memref<8x128xf32, #tpu.memory_space<vmem>>, vector<8x128xf32>
      tpu.vector_store %arg7[%c0_11, %c0_12], %12 {strides = array<i32>} : memref<8x128xf32, #tpu.memory_space<vmem>>, vector<8x128xf32>,
    } else {
    }
    %c0 = arith.constant 0 : index
    %c0_1 = arith.constant 0 : index
    %3 = vector.load %arg7[%c0, %c0_1] : memref<8x128xf32, #tpu.memory_space<vmem>>, vector<8x128xf32>
    %c0_2 = arith.constant 0 : index
    %c0_3 = arith.constant 0 : index
    %4 = vector.load %arg2[%c0_2, %c0_3] : memref<8x256xbf16, #tpu.memory_space<vmem>>, vector<8x256xbf16>
    %c0_4 = arith.constant 0 : index
    %c0_5 = arith.constant 0 : index
    %5 = vector.load %arg3[%c0_4, %c0_5] : memref<256x128xbf16, #tpu.memory_space<vmem>>, vector<256x128xbf16>
    %cst = arith.constant dense<0.000000e+00> : vector<8x128xf32>
    %6 = tpu.matmul %4, %5, %cst {dimension_numbers = #tpu.dot_dimension_numbers<[1], [0], [0], [1], [0, 0, 1, 1], [], []>} : vector<8x256xbf16>, vector<256x128xbf16>, vector<8x128xf32> -> vector<8x128xf32>
    %7 = arith.addf %3, %6 : vector<8x128xf32>
    %c0_6 = arith.constant 0 : index
    %c0_7 = arith.constant 0 : index
    %8 = vector.load %arg7[%c0_6, %c0_7] : memref<8x128xf32, #tpu.memory_space<vmem>>, vector<8x128xf32>
    tpu.vector_store %arg7[%c0_6, %c0_7], %7 {strides = array<i32>} : memref<8x128xf32, #tpu.memory_space<vmem>>, vector<8x128xf32>,
    %c0_i32_8 = arith.constant 0 : i32
    %9 = arith.cmpi eq, %arg1, %c0_i32_8 : i32
    %10 = arith.extui %9 : i1 to i32
    %c0_i32_9 = arith.constant 0 : i32
    %11 = arith.cmpi ne, %10, %c0_i32_9 : i32
    scf.if %11 {
      %c0_10 = arith.constant 0 : index
      %c0_11 = arith.constant 0 : index
      %12 = vector.load %arg7[%c0_10, %c0_11] : memref<8x128xf32, #tpu.memory_space<vmem>>, vector<8x128xf32>
      %c0_12 = arith.constant 0 : index
      %c0_13 = arith.constant 0 : index
      %13 = vector.load %arg4[%c0_12, %c0_13] : memref<1x128xf32, #tpu.memory_space<vmem>>, vector<1x128xf32>
      %14 = vector.broadcast %13 : vector<1x128xf32> to vector<8x128xf32>
      %15 = arith.mulf %12, %14 : vector<8x128xf32>
      %c0_14 = arith.constant 0 : index
      %c0_15 = arith.constant 0 : index
      %16 = vector.load %arg5[%c0_14, %c0_15] : memref<1x128xf32, #tpu.memory_space<vmem>>, vector<1x128xf32>
      %17 = vector.broadcast %16 : vector<1x128xf32> to vector<8x128xf32>
      %18 = arith.addf %15, %17 : vector<8x128xf32>
      %cst_16 = arith.constant 0.000000e+00 : f32
      %19 = vector.broadcast %cst_16 : f32 to vector<8x128xf32>
      %20 = arith.maximumf %18, %19 : vector<8x128xf32>
      %c0_17 = arith.constant 0 : index
      %c0_18 = arith.constant 0 : index
      %21 = vector.load %arg6[%c0_17, %c0_18] : memref<8x128xf32, #tpu.memory_space<vmem>>, vector<8x128xf32>
      tpu.vector_store %arg6[%c0_17, %c0_18], %20 {strides = array<i32>} : memref<8x128xf32, #tpu.memory_space<vmem>>, vector<8x128xf32>,
    } else {
    }
    return
  }
  func.func @transform_0(%arg0: i32, %arg1: i32) -> (i32, i32) {
    %c0_i32 = arith.constant 0 : i32
    return %arg0, %arg1 : i32, i32
  }
  func.func @transform_1(%arg0: i32, %arg1: i32) -> (i32, i32) {
    %c0_i32 = arith.constant 0 : i32
    %c0_i32_0 = arith.constant 0 : i32
    return %arg1, %c0_i32 : i32, i32
  }
  func.func @transform_2(%arg0: i32, %arg1: i32) -> (i32, i32) {
    %c0_i32 = arith.constant 0 : i32
    %c0_i32_0 = arith.constant 0 : i32
    %c0_i32_1 = arith.constant 0 : i32
    return %c0_i32, %c0_i32_0 : i32, i32
  }
  func.func @transform_3(%arg0: i32, %arg1: i32) -> (i32, i32) {
    %c0_i32 = arith.constant 0 : i32
    %c0_i32_0 = arith.constant 0 : i32
    %c0_i32_1 = arith.constant 0 : i32
    return %c0_i32, %c0_i32_0 : i32, i32
  }
  func.func @transform_4(%arg0: i32, %arg1: i32) -> (i32, i32) {
    %c0_i32 = arith.constant 0 : i32
    %c0_i32_0 = arith.constant 0 : i32
    return %arg0, %c0_i32 : i32, i32
  }
}

module attributes {stable_mosaic.version = 11 : i64} {
  func.func @_fused_matmul_kernel(%arg0: i32, %arg1: i32, %arg2: memref<8x384xbf16, #tpu.memory_space<vmem>>, %arg3: memref<384x128xbf16, #tpu.memory_space<vmem>>, %arg4: memref<1x128xf32, #tpu.memory_space<vmem>>, %arg5: memref<1x128xf32, #tpu.memory_space<vmem>>, %arg6: memref<8x128xf32, #tpu.memory_space<vmem>>, %arg7: memref<8x128xf32, #tpu.memory_space<vmem>>) attributes {dimension_semantics = [#tpu.dimension_semantics<parallel>, #tpu.dimension_semantics<arbitrary>], iteration_bounds = array<i64: 1, 3>, scalar_prefetch = 0 : i64, scratch_operands = 1 : i64, tpu.core_type = #tpu.core_type<tc>, window_params = [{transform_indices = @transform_0, window_bounds = array<i64: 8, 384>}, {transform_indices = @transform_1, window_bounds = array<i64: 384, 128>}, {pipeline_mode = #tpu.pipeline_mode<synchronous>, transform_indices = @transform_2, window_bounds = array<i64: 1, 128>}, {pipeline_mode = #tpu.pipeline_mode<synchronous>, transform_indices = @transform_3, window_bounds = array<i64: 1, 128>}, {transform_indices = @transform_4, window_bounds = array<i64: 8, 128>}]} {
    %c0_i32 = arith.constant 0 : i32
    %0 = arith.cmpi eq, %arg1, %c0_i32 : i32
    %1 = arith.extui %0 : i1 to i32
    %c0_i32_0 = arith.constant 0 : i32
    %2 = arith.cmpi ne, %1, %c0_i32_0 : i32
    scf.if %2 {
      %cst_9 = arith.constant 0.000000e+00 : f32
      %12 = vector.broadcast %cst_9 : f32 to vector<8x128xf32>
      %c0_10 = arith.constant 0 : index
      %c0_11 = arith.constant 0 : index
      %13 = vector.load %arg7[%c0_10, %c0_11] : memref<8x128xf32, #tpu.memory_space<vmem>>, vector<8x128xf32>
      tpu.vector_store %arg7[%c0_10, %c0_11], %12 {strides = array<i32>} : memref<8x128xf32, #tpu.memory_space<vmem>>, vector<8x128xf32>,
    } else {
    }
    %c0 = arith.constant 0 : index
    %c0_1 = arith.constant 0 : index
    %3 = vector.load %arg7[%c0, %c0_1] : memref<8x128xf32, #tpu.memory_space<vmem>>, vector<8x128xf32>
    %c0_2 = arith.constant 0 : index
    %c0_3 = arith.constant 0 : index
    %4 = vector.load %arg2[%c0_2, %c0_3] : memref<8x384xbf16, #tpu.memory_space<vmem>>, vector<8x384xbf16>
    %c0_4 = arith.constant 0 : index
    %c0_5 = arith.constant 0 : index
    %5 = vector.load %arg3[%c0_4, %c0_5] : memref<384x128xbf16, #tpu.memory_space<vmem>>, vector<384x128xbf16>
    %cst = arith.constant dense<0.000000e+00> : vector<8x128xf32>
    %6 = tpu.matmul %4, %5, %cst {dimension_numbers = #tpu.dot_dimension_numbers<[1], [0], [0], [1], [0, 0, 1, 1], [], []>} : vector<8x384xbf16>, vector<384x128xbf16>, vector<8x128xf32> -> vector<8x128xf32>
    %7 = arith.addf %3, %6 : vector<8x128xf32>
    %c0_6 = arith.constant 0 : index
    %c0_7 = arith.constant 0 : index
    %8 = vector.load %arg7[%c0_6, %c0_7] : memref<8x128xf32, #tpu.memory_space<vmem>>, vector<8x128xf32>
    tpu.vector_store %arg7[%c0_6, %c0_7], %7 {strides = array<i32>} : memref<8x128xf32, #tpu.memory_space<vmem>>, vector<8x128xf32>,
    %c2_i32 = arith.constant 2 : i32
    %9 = arith.cmpi eq, %arg1, %c2_i32 : i32
    %10 = arith.extui %9 : i1 to i32
    %c0_i32_8 = arith.constant 0 : i32
    %11 = arith.cmpi ne, %10, %c0_i32_8 : i32
    scf.if %11 {
      %c0_9 = arith.constant 0 : index
      %c0_10 = arith.constant 0 : index
      %12 = vector.load %arg7[%c0_9, %c0_10] : memref<8x128xf32, #tpu.memory_space<vmem>>, vector<8x128xf32>
      %c0_11 = arith.constant 0 : index
      %c0_12 = arith.constant 0 : index
      %13 = vector.load %arg4[%c0_11, %c0_12] : memref<1x128xf32, #tpu.memory_space<vmem>>, vector<1x128xf32>
      %14 = vector.broadcast %13 : vector<1x128xf32> to vector<8x128xf32>
      %15 = arith.mulf %12, %14 : vector<8x128xf32>
      %c0_13 = arith.constant 0 : index
      %c0_14 = arith.constant 0 : index
      %16 = vector.load %arg5[%c0_13, %c0_14] : memref<1x128xf32, #tpu.memory_space<vmem>>, vector<1x128xf32>
      %17 = vector.broadcast %16 : vector<1x128xf32> to vector<8x128xf32>
      %18 = arith.addf %15, %17 : vector<8x128xf32>
      %cst_15 = arith.constant 0.000000e+00 : f32
      %19 = vector.broadcast %cst_15 : f32 to vector<8x128xf32>
      %20 = arith.maximumf %18, %19 : vector<8x128xf32>
      %c0_16 = arith.constant 0 : index
      %c0_17 = arith.constant 0 : index
      %21 = vector.load %arg6[%c0_16, %c0_17] : memref<8x128xf32, #tpu.memory_space<vmem>>, vector<8x128xf32>
      tpu.vector_store %arg6[%c0_16, %c0_17], %20 {strides = array<i32>} : memref<8x128xf32, #tpu.memory_space<vmem>>, vector<8x128xf32>,
    } else {
    }
    return
  }
  func.func @transform_0(%arg0: i32, %arg1: i32) -> (i32, i32) {
    %c0_i32 = arith.constant 0 : i32
    return %arg0, %arg1 : i32, i32
  }
  func.func @transform_1(%arg0: i32, %arg1: i32) -> (i32, i32) {
    %c0_i32 = arith.constant 0 : i32
    %c0_i32_0 = arith.constant 0 : i32
    return %arg1, %c0_i32 : i32, i32
  }
  func.func @transform_2(%arg0: i32, %arg1: i32) -> (i32, i32) {
    %c0_i32 = arith.constant 0 : i32
    %c0_i32_0 = arith.constant 0 : i32
    %c0_i32_1 = arith.constant 0 : i32
    return %c0_i32, %c0_i32_0 : i32, i32
  }
  func.func @transform_3(%arg0: i32, %arg1: i32) -> (i32, i32) {
    %c0_i32 = arith.constant 0 : i32
    %c0_i32_0 = arith.constant 0 : i32
    %c0_i32_1 = arith.constant 0 : i32
    return %c0_i32, %c0_i32_0 : i32, i32
  }
  func.func @transform_4(%arg0: i32, %arg1: i32) -> (i32, i32) {
    %c0_i32 = arith.constant 0 : i32
    %c0_i32_0 = arith.constant 0 : i32
    return %arg0, %c0_i32 : i32, i32
  }
}

module attributes {stable_mosaic.version = 11 : i64} {
  func.func @_fused_matmul_res_kernel(%arg0: i32, %arg1: i32, %arg2: memref<8x128xbf16, #tpu.memory_space<vmem>>, %arg3: memref<128x512xbf16, #tpu.memory_space<vmem>>, %arg4: memref<1x512xf32, #tpu.memory_space<vmem>>, %arg5: memref<1x512xf32, #tpu.memory_space<vmem>>, %arg6: memref<8x512xf32, #tpu.memory_space<vmem>>, %arg7: memref<8x512xf32, #tpu.memory_space<vmem>>, %arg8: memref<8x512xf32, #tpu.memory_space<vmem>>) attributes {dimension_semantics = [#tpu.dimension_semantics<parallel>, #tpu.dimension_semantics<arbitrary>], iteration_bounds = array<i64: 1, 1>, scalar_prefetch = 0 : i64, scratch_operands = 1 : i64, tpu.core_type = #tpu.core_type<tc>, window_params = [{transform_indices = @transform_0, window_bounds = array<i64: 8, 128>}, {transform_indices = @transform_1, window_bounds = array<i64: 128, 512>}, {pipeline_mode = #tpu.pipeline_mode<synchronous>, transform_indices = @transform_2, window_bounds = array<i64: 1, 512>}, {pipeline_mode = #tpu.pipeline_mode<synchronous>, transform_indices = @transform_3, window_bounds = array<i64: 1, 512>}, {transform_indices = @transform_4, window_bounds = array<i64: 8, 512>}, {transform_indices = @transform_5, window_bounds = array<i64: 8, 512>}]} {
    %c0_i32 = arith.constant 0 : i32
    %0 = arith.cmpi eq, %arg1, %c0_i32 : i32
    %1 = arith.extui %0 : i1 to i32
    %c0_i32_0 = arith.constant 0 : i32
    %2 = arith.cmpi ne, %1, %c0_i32_0 : i32
    scf.if %2 {
      %cst_10 = arith.constant 0.000000e+00 : f32
      %12 = vector.broadcast %cst_10 : f32 to vector<8x512xf32>
      %c0_11 = arith.constant 0 : index
      %c0_12 = arith.constant 0 : index
      %13 = vector.load %arg8[%c0_11, %c0_12] : memref<8x512xf32, #tpu.memory_space<vmem>>, vector<8x512xf32>
      tpu.vector_store %arg8[%c0_11, %c0_12], %12 {strides = array<i32>} : memref<8x512xf32, #tpu.memory_space<vmem>>, vector<8x512xf32>,
    } else {
    }
    %c0 = arith.constant 0 : index
    %c0_1 = arith.constant 0 : index
    %3 = vector.load %arg8[%c0, %c0_1] : memref<8x512xf32, #tpu.memory_space<vmem>>, vector<8x512xf32>
    %c0_2 = arith.constant 0 : index
    %c0_3 = arith.constant 0 : index
    %4 = vector.load %arg2[%c0_2, %c0_3] : memref<8x128xbf16, #tpu.memory_space<vmem>>, vector<8x128xbf16>
    %c0_4 = arith.constant 0 : index
    %c0_5 = arith.constant 0 : index
    %5 = vector.load %arg3[%c0_4, %c0_5] : memref<128x512xbf16, #tpu.memory_space<vmem>>, vector<128x512xbf16>
    %cst = arith.constant dense<0.000000e+00> : vector<8x512xf32>
    %6 = tpu.matmul %4, %5, %cst {dimension_numbers = #tpu.dot_dimension_numbers<[1], [0], [0], [1], [0, 0, 1, 1], [], []>} : vector<8x128xbf16>, vector<128x512xbf16>, vector<8x512xf32> -> vector<8x512xf32>
    %7 = arith.addf %3, %6 : vector<8x512xf32>
    %c0_6 = arith.constant 0 : index
    %c0_7 = arith.constant 0 : index
    %8 = vector.load %arg8[%c0_6, %c0_7] : memref<8x512xf32, #tpu.memory_space<vmem>>, vector<8x512xf32>
    tpu.vector_store %arg8[%c0_6, %c0_7], %7 {strides = array<i32>} : memref<8x512xf32, #tpu.memory_space<vmem>>, vector<8x512xf32>,
    %c0_i32_8 = arith.constant 0 : i32
    %9 = arith.cmpi eq, %arg1, %c0_i32_8 : i32
    %10 = arith.extui %9 : i1 to i32
    %c0_i32_9 = arith.constant 0 : i32
    %11 = arith.cmpi ne, %10, %c0_i32_9 : i32
    scf.if %11 {
      %c0_10 = arith.constant 0 : index
      %c0_11 = arith.constant 0 : index
      %12 = vector.load %arg8[%c0_10, %c0_11] : memref<8x512xf32, #tpu.memory_space<vmem>>, vector<8x512xf32>
      %c0_12 = arith.constant 0 : index
      %c0_13 = arith.constant 0 : index
      %13 = vector.load %arg4[%c0_12, %c0_13] : memref<1x512xf32, #tpu.memory_space<vmem>>, vector<1x512xf32>
      %14 = vector.broadcast %13 : vector<1x512xf32> to vector<8x512xf32>
      %15 = arith.mulf %12, %14 : vector<8x512xf32>
      %c0_14 = arith.constant 0 : index
      %c0_15 = arith.constant 0 : index
      %16 = vector.load %arg5[%c0_14, %c0_15] : memref<1x512xf32, #tpu.memory_space<vmem>>, vector<1x512xf32>
      %17 = vector.broadcast %16 : vector<1x512xf32> to vector<8x512xf32>
      %18 = arith.addf %15, %17 : vector<8x512xf32>
      %c0_16 = arith.constant 0 : index
      %c0_17 = arith.constant 0 : index
      %19 = vector.load %arg6[%c0_16, %c0_17] : memref<8x512xf32, #tpu.memory_space<vmem>>, vector<8x512xf32>
      %20 = arith.addf %18, %19 : vector<8x512xf32>
      %cst_18 = arith.constant 0.000000e+00 : f32
      %21 = vector.broadcast %cst_18 : f32 to vector<8x512xf32>
      %22 = arith.maximumf %20, %21 : vector<8x512xf32>
      %c0_19 = arith.constant 0 : index
      %c0_20 = arith.constant 0 : index
      %23 = vector.load %arg7[%c0_19, %c0_20] : memref<8x512xf32, #tpu.memory_space<vmem>>, vector<8x512xf32>
      tpu.vector_store %arg7[%c0_19, %c0_20], %22 {strides = array<i32>} : memref<8x512xf32, #tpu.memory_space<vmem>>, vector<8x512xf32>,
    } else {
    }
    return
  }
  func.func @transform_0(%arg0: i32, %arg1: i32) -> (i32, i32) {
    %c0_i32 = arith.constant 0 : i32
    return %arg0, %arg1 : i32, i32
  }
  func.func @transform_1(%arg0: i32, %arg1: i32) -> (i32, i32) {
    %c0_i32 = arith.constant 0 : i32
    %c0_i32_0 = arith.constant 0 : i32
    return %arg1, %c0_i32 : i32, i32
  }
  func.func @transform_2(%arg0: i32, %arg1: i32) -> (i32, i32) {
    %c0_i32 = arith.constant 0 : i32
    %c0_i32_0 = arith.constant 0 : i32
    %c0_i32_1 = arith.constant 0 : i32
    return %c0_i32, %c0_i32_0 : i32, i32
  }
  func.func @transform_3(%arg0: i32, %arg1: i32) -> (i32, i32) {
    %c0_i32 = arith.constant 0 : i32
    %c0_i32_0 = arith.constant 0 : i32
    %c0_i32_1 = arith.constant 0 : i32
    return %c0_i32, %c0_i32_0 : i32, i32
  }
  func.func @transform_4(%arg0: i32, %arg1: i32) -> (i32, i32) {
    %c0_i32 = arith.constant 0 : i32
    %c0_i32_0 = arith.constant 0 : i32
    return %arg0, %c0_i32 : i32, i32
  }
  func.func @transform_5(%arg0: i32, %arg1: i32) -> (i32, i32) {
    %c0_i32 = arith.constant 0 : i32
    %c0_i32_0 = arith.constant 0 : i32
    return %arg0, %c0_i32 : i32, i32
  }
}

</mosaic_0001>

<bundles_post_ra>
// kernel: _lambda_.22
= control target key start
LH: loop header
LB: loop body
LE: loop exit
PB: predicated region body
PF: predicated region fallthrough
CT: control target
= control target key end

     0   :  { %s142_s0 = inlined_call_operand.vmem [shape: f32[9,16,128], index: 0, kind: input, shape index: {}]   ;;  %s143_s1 = inlined_call_operand.vmem [shape: f32[16,128], index: 1, kind: output, shape index: {}]  }
   0x1   :  { %v8_v0 = vld [vmem:[%s142_s0] sm:$0xff]  ;;  %v56_v1 = vld [vmem:[%s142_s0 + $0x10] sm:$0xff]  ;;  %v9_v6 = vld [vmem:[%s142_s0 + $0x8] sm:$0xff] }
   0x2   :  { %v58_v2 = vld [vmem:[%s142_s0 + $0x20] sm:$0xff]  ;;  %v13_v3 = vmax.f32 %v8_v0, %v56_v1  ;;  %v60_v4 = vld [vmem:[%s142_s0 + $0x30] sm:$0xff]  ;;  %v57_v7 = vld [vmem:[%s142_s0 + $0x18] sm:$0xff] }
   0x3   :  { %v59_v8 = vld [vmem:[%s142_s0 + $0x28] sm:$0xff]  ;;  %v62_v9 = vld [vmem:[%s142_s0 + $0x40] sm:$0xff]  ;;  %v14_v10 = vmax.f32 %v9_v6, %v57_v7  ;;  %v61_v12 = vld [vmem:[%s142_s0 + $0x38] sm:$0xff] }
   0x4   :  { %v18_v5 = vmax.f32 %v13_v3, %v58_v2  ;;  %v64_v13 = vld [vmem:[%s142_s0 + $0x50] sm:$0xff]  ;;  %v63_v16 = vld [vmem:[%s142_s0 + $0x48] sm:$0xff]  ;;  %v66_v17 = vld [vmem:[%s142_s0 + $0x60] sm:$0xff] }
   0x5   :  { %v19_v14 = vmax.f32 %v14_v10, %v59_v8  ;;  %v65_v20 = vld [vmem:[%s142_s0 + $0x58] sm:$0xff]  ;;  %v68_v21 = vld [vmem:[%s142_s0 + $0x70] sm:$0xff]  ;;  %v67_v24 = vld [vmem:[%s142_s0 + $0x68] sm:$0xff] }
   0x6   :  { %v23_v11 = vmax.f32 %v18_v5, %v60_v4  ;;  %v70_v25 = vld [vmem:[%s142_s0 + $0x80] sm:$0xff]  ;;  %v69_v28 = vld [vmem:[%s142_s0 + $0x78] sm:$0xff]  ;;  %v71_v31 = vld [vmem:[%s142_s0 + $0x88] sm:$0xff] }
   0x7   :  { %v24_v18 = vmax.f32 %v19_v14, %v61_v12 }
   0x8   :  { %v28_v15 = vmax.f32 %v23_v11, %v62_v9 }
   0x9   :  { %v29_v22 = vmax.f32 %v24_v18, %v63_v16 }
   0xa   :  { %v33_v19 = vmax.f32 %v28_v15, %v64_v13 }
   0xb   :  { %v34_v26 = vmax.f32 %v29_v22, %v65_v20 }
   0xc   :  { %v38_v23 = vmax.f32 %v33_v19, %v66_v17 }
   0xd   :  { %v39_v29 = vmax.f32 %v34_v26, %v67_v24 }
   0xe   :  { %v43_v27 = vmax.f32 %v38_v23, %v68_v21 }
   0xf   :  { %v44_v32 = vmax.f32 %v39_v29, %v69_v28 }
  0x10   :  { %v48_v30 = vmax.f32 %v43_v27, %v70_v25 }
  0x11   :  { %v49_v33 = vmax.f32 %v44_v32, %v71_v31 }
  0x12   :  { %50 = vst [vmem:[%s143_s1] sm:$0xff] %v48_v30 }
  0x13   :  { %51 = vst [vmem:[%s143_s1 + $0x8] sm:$0xff] %v49_v33 }

// kernel: _lambda_.21
= control target key start
LH: loop header
LB: loop body
LE: loop exit
PB: predicated region body
PF: predicated region fallthrough
CT: control target
= control target key end

     0   :  { %s1460_s15 = smov 0   ;;  %s1462_s16 = smov 0   ;;  %s1690_s0 = inlined_call_operand.vmem [shape: bf16[512,256], index: 0, kind: input, shape index: {}]   ;;  %s1691_s1 = inlined_call_operand.vmem [shape: bf16[256,128], index: 1, kind: input, shape index: {}]   ;;  %s1692_s2 = inlined_call_operand.vmem [shape: f32[1,128], index: 2, kind: input, shape index: {}]   ;;  %s1693_s3 = inlined_call_operand.vmem [shape: f32[1,128], index: 3, kind: input, shape index: {}]   ;;  %s1694_s4 = inlined_call_operand.vmem [shape: f32[512,128], index: 4, kind: output, shape index: {}]  }
   0x1   :  { %s1464_s17 = smov 0  }
   0x2 LB: > { %s26_s18 = sadd.s32 1, %s1429_s16  ;;  %p1136_p0 = scmp.ge.s32.totalorder %s1433_s17, 1  ;;  %s1433_s17 = sphi %s1464_s17, %s14_s17   ;;  %s1429_s16 = sphi %s1462_s16, %s1696_s16   ;;  %s1425_s15 = sphi %s1460_s15, %s1695_s15  }
   0x3   : > { %p28_p1 = scmp.ge.s32.totalorder %s26_s18, 2  ;;  %p194_p2 = scmp.lt.s32.totalorder %s1433_s17, 3 }
   0x5   : > { %s1698_s18 = smov (%p28_p1, %s26_s18), 0  ;;  %p195_p3 = pnand %p1136_p0, %p194_p2 }
   0x6   : > { %v1347_v0 = vld [vmem:[%s1691_s1 + $0x40] sm:$0xff] (!%p195_p3)   ;;  %s1137_s21 = sshll.u32 (!%p195_p3), %s1425_s15, 5  ;;  %v1349_v2 = vld [vmem:[%s1691_s1 + $0x48] sm:$0xff] (!%p195_p3)   ;;  %v1351_v4 = vld [vmem:[%s1691_s1 + $0x50] sm:$0xff] (!%p195_p3)  }
   0x7   : > { %198 = sbr.rel (%p195_p3) target bundleno = 320 (0x140), region = 36  ;;  %v1348_v1 = vld [vmem:[%s1691_s1] sm:$0xff] (!%p195_p3)   ;;  %1195 = vmatprep.subr.bf16.mxu0 (!%p195_p3), %v1347_v0  ;;  %1307 = vmatprep.subr.bf16.mxu1 (!%p195_p3), %v1347_v0  ;;  %v1350_v3 = vld [vmem:[%s1691_s1 + $0x8] sm:$0xff] (!%p195_p3)   ;;  %p232_p4 = scmp.lt.s32.totalorder (!%p195_p3), %s1137_s21, 63  ;;  %v1352_v5 = vld [vmem:[%s1691_s1 + $0x10] sm:$0xff] (!%p195_p3)  }
   0x8   : > { %1196 = vmatpush3.bf16.msra.mxu0 (!%p195_p3), %v1348_v1  ;;  %1315 = vmatpush3.bf16.msra.mxu1 (!%p195_p3), %v1348_v1  ;;  %v1353_v6 = vld [vmem:[%s1691_s1 + $0x58] sm:$0xff] (!%p195_p3)   ;;  %v1355_v8 = vld [vmem:[%s1691_s1 + $0x60] sm:$0xff] (!%p195_p3)   ;;  %v1357_v10 = vld [vmem:[%s1691_s1 + $0x68] sm:$0xff] (!%p195_p3)  }
   0x9   : > { %1197 = vmatprep.subr.bf16.mxu0 (!%p195_p3), %v1349_v2  ;;  %1308 = vmatprep.subr.bf16.mxu1 (!%p195_p3), %v1349_v2  ;;  %v1354_v7 = vld [vmem:[%s1691_s1 + $0x18] sm:$0xff] (!%p195_p3)   ;;  %v1356_v9 = vld [vmem:[%s1691_s1 + $0x20] sm:$0xff] (!%p195_p3)   ;;  %v1358_v13 = vld [vmem:[%s1691_s1 + $0x28] sm:$0xff] (!%p195_p3)  }
   0xa   : > { %v1359_v14 = vld [vmem:[%s1691_s1 + $0x70] sm:$0xff] (!%p195_p3)   ;;  %v1361_v16 = vld [vmem:[%s1691_s1 + $0x78] sm:$0xff] (!%p195_p3)   ;;  %v1571_v51 = vld [vmem:[%s1692_s2] ss:$0 sm:$0xff] (!%p195_p3) }
   0xb   : > { %v1360_v15 = vld [vmem:[%s1691_s1 + $0x30] sm:$0xff] (!%p195_p3)   ;;  %v1362_v17 = vld [vmem:[%s1691_s1 + $0x38] sm:$0xff] (!%p195_p3)   ;;  %v1576_v57 = vld [vmem:[%s1693_s3] ss:$0 sm:$0xff] (!%p195_p3) }
   0xc   : > { %1198 = vmatpush3.bf16.msra.mxu0 (!%p195_p3), %v1350_v3  ;;  %1316 = vmatpush3.bf16.msra.mxu1 (!%p195_p3), %v1350_v3 }
   0xd   : > { %1199 = vmatprep.subr.bf16.mxu0 (!%p195_p3), %v1351_v4  ;;  %1309 = vmatprep.subr.bf16.mxu1 (!%p195_p3), %v1351_v4 }
   0xe   : > { %s1700_s21 = smov (!%p232_p4, %s1137_s21), 63 }
   0xf   : > { %s1194_s10 = sshll.u32 %s1700_s21, 3 }
  0x10   : > { %1200 = vmatpush3.bf16.msra.mxu0 %v1352_v5  ;;  %1317 = vmatpush3.bf16.msra.mxu1 %v1352_v5  ;;  %s1513_s15 = scalar_lea.vmem %s1690_s0, %s1194_s10 }
  0x11   : > { %1201 = vmatprep.subr.bf16.mxu0 %v1353_v6  ;;  %1310 = vmatprep.subr.bf16.mxu1 %v1353_v6  ;;  %v1365_v11 = vld [vmem:[%s1513_s15 + $0x4] ss:$8 sps:$4 sm:$0xff]   ;;  %v1363_v18 = vld [vmem:[%s1513_s15] ss:$8 sps:$4 sm:$0xff]   ;;  %v1369_v20 = vld [vmem:[%s1513_s15 + $0x14] ss:$8 sps:$4 sm:$0xff]  }
  0x12   : > { %v1368_v12 = vld [vmem:[%s1513_s15 + $0x84] ss:$8 sps:$4 sm:$0xff]   ;;  %675 = vmatprep.mubr.bf16.mxu0 %v1365_v11  ;;  %v1366_v19 = vld [vmem:[%s1513_s15 + $0x80] ss:$8 sps:$4 sm:$0xff]   ;;  %v1371_v21 = vld [vmem:[%s1513_s15 + $0x94] ss:$8 sps:$4 sm:$0xff]  }
  0x13   : > { %739 = vmatprep.mubr.bf16.mxu1 %v1368_v12  ;;  %v1373_v22 = vld [vmem:[%s1513_s15 + $0x10] ss:$8 sps:$4 sm:$0xff]   ;;  %v1375_v24 = vld [vmem:[%s1513_s15 + $0x24] ss:$8 sps:$4 sm:$0xff]   ;;  %v1379_v26 = vld [vmem:[%s1513_s15 + $0x20] ss:$8 sps:$4 sm:$0xff]  }
  0x14   : > { %1202 = vmatpush3.bf16.msra.mxu0 %v1354_v7  ;;  %1318 = vmatpush3.bf16.msra.mxu1 %v1354_v7  ;;  %v1374_v23 = vld [vmem:[%s1513_s15 + $0x90] ss:$8 sps:$4 sm:$0xff]   ;;  %v1377_v25 = vld [vmem:[%s1513_s15 + $0xa4] ss:$8 sps:$4 sm:$0xff]   ;;  %v1380_v27 = vld [vmem:[%s1513_s15 + $0xa0] ss:$8 sps:$4 sm:$0xff]  }
  0x15   : > { %1203 = vmatprep.subr.bf16.mxu0 %v1355_v8  ;;  %1311 = vmatprep.subr.bf16.mxu1 %v1355_v8  ;;  %v1381_v28 = vld [vmem:[%s1513_s15 + $0x34] ss:$8 sps:$4 sm:$0xff]   ;;  %v1385_v30 = vld [vmem:[%s1513_s15 + $0x30] ss:$8 sps:$4 sm:$0xff]   ;;  %v1387_v32 = vld [vmem:[%s1513_s15 + $0x44] ss:$8 sps:$4 sm:$0xff]  }
  0x16   : > { %v1383_v29 = vld [vmem:[%s1513_s15 + $0xb4] ss:$8 sps:$4 sm:$0xff]   ;;  %v1386_v31 = vld [vmem:[%s1513_s15 + $0xb0] ss:$8 sps:$4 sm:$0xff]   ;;  %v1389_v33 = vld [vmem:[%s1513_s15 + $0xc4] ss:$8 sps:$4 sm:$0xff]  }
  0x17   : > { %v1391_v34 = vld [vmem:[%s1513_s15 + $0x40] ss:$8 sps:$4 sm:$0xff]   ;;  %v1393_v36 = vld [vmem:[%s1513_s15 + $0x54] ss:$8 sps:$4 sm:$0xff]   ;;  %v1397_v38 = vld [vmem:[%s1513_s15 + $0x50] ss:$8 sps:$4 sm:$0xff]  }
  0x18   : > { %1204 = vmatpush3.bf16.msra.mxu0 %v1356_v9  ;;  %1319 = vmatpush3.bf16.msra.mxu1 %v1356_v9  ;;  %v1392_v35 = vld [vmem:[%s1513_s15 + $0xc0] ss:$8 sps:$4 sm:$0xff]   ;;  %v1395_v37 = vld [vmem:[%s1513_s15 + $0xd4] ss:$8 sps:$4 sm:$0xff]   ;;  %v1398_v39 = vld [vmem:[%s1513_s15 + $0xd0] ss:$8 sps:$4 sm:$0xff]  }
  0x19   : > { %1205 = vmatprep.subr.bf16.mxu0 %v1357_v10  ;;  %1312 = vmatprep.subr.bf16.mxu1 %v1357_v10  ;;  %v1399_v40 = vld [vmem:[%s1513_s15 + $0x64] ss:$8 sps:$4 sm:$0xff]   ;;  %v1403_v42 = vld [vmem:[%s1513_s15 + $0x60] ss:$8 sps:$4 sm:$0xff]   ;;  %v1405_v44 = vld [vmem:[%s1513_s15 + $0x74] ss:$8 sps:$4 sm:$0xff]  }
  0x1a   : > { %v1401_v41 = vld [vmem:[%s1513_s15 + $0xe4] ss:$8 sps:$4 sm:$0xff]   ;;  %v1404_v43 = vld [vmem:[%s1513_s15 + $0xe0] ss:$8 sps:$4 sm:$0xff]   ;;  %v1407_v45 = vld [vmem:[%s1513_s15 + $0xf4] ss:$8 sps:$4 sm:$0xff]  }
  0x1b   : > { %v1409_v46 = vld [vmem:[%s1513_s15 + $0x70] ss:$8 sps:$4 sm:$0xff]  }
  0x1c   : > { %1206 = vmatpush3.bf16.msra.mxu0 %v1358_v13  ;;  %1320 = vmatpush3.bf16.msra.mxu1 %v1358_v13  ;;  %v1410_v47 = vld [vmem:[%s1513_s15 + $0xf0] ss:$8 sps:$4 sm:$0xff]   ;;  %s1589_s15 = scalar_lea.vmem %s1694_s4, %s1194_s10 }
  0x1d   : > { %1207 = vmatprep.subr.bf16.mxu0 %v1359_v14  ;;  %1313 = vmatprep.subr.bf16.mxu1 %v1359_v14 }
  0x20   : > { %1208 = vmatpush3.bf16.msra.mxu0 %v1360_v15  ;;  %1321 = vmatpush3.bf16.msra.mxu1 %v1360_v15 }
  0x21   : > { %1209 = vmatprep.subr.bf16.mxu0 %v1361_v16  ;;  %1314 = vmatprep.subr.bf16.mxu1 %v1361_v16 }
  0x24   : > { %1210 = vmatpush3.bf16.msra.mxu0 %v1362_v17  ;;  %1322 = vmatpush3.bf16.msra.mxu1 %v1362_v17 }
  0x27   : > { %676 = vmatmul.mubr.bf16.vlgmr.msra.gmra.mrb[0].mxu0 %v1363_v18  ;;  %740 = vmatmul.mubr.bf16.vlgmr.msra.gmra.mrb[0].mxu1 %v1366_v19 }
  0x28   : > { %683 = vmatprep.mubr.bf16.mxu0 %v1369_v20  ;;  %747 = vmatprep.mubr.bf16.mxu1 %v1371_v21 }
  0x2f   : > { %684 = vmatmul.mubr.bf16.gmra.mrb[4].mxu0 %v1373_v22  ;;  %748 = vmatmul.mubr.bf16.gmra.mrb[4].mxu1 %v1374_v23 }
  0x30   : > { %691 = vmatprep.mubr.bf16.mxu0 %v1375_v24  ;;  %755 = vmatprep.mubr.bf16.mxu1 %v1377_v25 }
  0x37   : > { %692 = vmatmul.mubr.bf16.gmra.mrb[8].mxu0 %v1379_v26  ;;  %756 = vmatmul.mubr.bf16.gmra.mrb[8].mxu1 %v1380_v27 }
  0x38   : > { %699 = vmatprep.mubr.bf16.mxu0 %v1381_v28  ;;  %763 = vmatprep.mubr.bf16.mxu1 %v1383_v29 }
  0x3f   : > { %700 = vmatmul.mubr.bf16.gmra.mrb[12].mxu0 %v1385_v30  ;;  %764 = vmatmul.mubr.bf16.gmra.mrb[12].mxu1 %v1386_v31 }
  0x40   : > { %707 = vmatprep.mubr.bf16.mxu0 %v1387_v32  ;;  %771 = vmatprep.mubr.bf16.mxu1 %v1389_v33 }
  0x47   : > { %708 = vmatmul.mubr.bf16.gmra.mrb[16].mxu0 %v1391_v34  ;;  %772 = vmatmul.mubr.bf16.gmra.mrb[16].mxu1 %v1392_v35 }
  0x48   : > { %715 = vmatprep.mubr.bf16.mxu0 %v1393_v36  ;;  %779 = vmatprep.mubr.bf16.mxu1 %v1395_v37 }
  0x4f   : > { %716 = vmatmul.mubr.bf16.gmra.mrb[20].mxu0 %v1397_v38  ;;  %780 = vmatmul.mubr.bf16.gmra.mrb[20].mxu1 %v1398_v39 }
  0x50   : > { %723 = vmatprep.mubr.bf16.mxu0 %v1399_v40  ;;  %787 = vmatprep.mubr.bf16.mxu1 %v1401_v41 }
  0x57   : > { %724 = vmatmul.mubr.bf16.gmra.mrb[24].mxu0 %v1403_v42  ;;  %788 = vmatmul.mubr.bf16.gmra.mrb[24].mxu1 %v1404_v43 }
  0x58   : > { %731 = vmatprep.mubr.bf16.mxu0 %v1405_v44  ;;  %795 = vmatprep.mubr.bf16.mxu1 %v1407_v45 }
  0x5f   : > { %732 = vmatmul.mubr.bf16.gmra.mrb[28].mxu0 %v1409_v46  ;;  %796 = vmatmul.mubr.bf16.gmra.mrb[28].mxu1 %v1410_v47 }
  0xfa   : > { %v1211_v48 = vpop.f32.mrb[0].mxu0  ;;  %v1259_v49 = vpop.f32.mrb[0].mxu1 }
  0xfb   : > { %v1212_v50 = vpop.f32.mrb[1].mxu0  ;;  %v1260_v52 = vpop.f32.mrb[1].mxu1 }
  0xfc   : > { %v1213_v53 = vadd.f32 %v1212_v50, %v1211_v48  ;;  %v1261_v54 = vadd.f32 %v1260_v52, %v1259_v49  ;;  %v1214_v55 = vpop.f32.mrb[2].mxu0  ;;  %v1262_v56 = vpop.f32.mrb[2].mxu1 }
  0xfd   : > { %v1215_v58 = vpop.f32.mrb[3].mxu0  ;;  %v1263_v59 = vpop.f32.mrb[3].mxu1 }
  0xfe   : > { %v910_v60 = vmul.f32 %v1213_v53, %v1571_v51  ;;  %v926_v61 = vmul.f32 %v1261_v54, %v1571_v51  ;;  %v1216_v62 = vadd.f32 %v1215_v58, %v1214_v55  ;;  %v1264_v63 = vadd.f32 %v1263_v59, %v1262_v56 }
 0x100   : > { %v949_v0 = vadd.f32 %v1576_v57, %v910_v60  ;;  %v965_v1 = vadd.f32 %v1576_v57, %v926_v61  ;;  %v911_v2 = vmul.f32 %v1216_v62, %v1571_v51  ;;  %v927_v3 = vmul.f32 %v1264_v63, %v1571_v51 }
 0x102   : > { %v981_v4 = vmax.f32 %v949_v0, 0.0  ;;  %v997_v5 = vmax.f32 %v965_v1, 0.0  ;;  %v950_v6 = vadd.f32 %v1576_v57, %v911_v2  ;;  %v966_v7 = vadd.f32 %v1576_v57, %v927_v3  ;;  %v1217_v8 = vpop.f32.mrb[4].mxu0  ;;  %v1265_v9 = vpop.f32.mrb[4].mxu1 }
 0x103   : > { %v1218_v10 = vpop.f32.mrb[5].mxu0  ;;  %v1266_v11 = vpop.f32.mrb[5].mxu1 }
 0x104   : > { %1013 = vst [vmem:[%s1589_s15] sm:$0xff] %v981_v4  ;;  %1029 = vst [vmem:[%s1589_s15 + $0x80] sm:$0xff] %v997_v5  ;;  %v982_v12 = vmax.f32 %v950_v6, 0.0  ;;  %v998_v13 = vmax.f32 %v966_v7, 0.0  ;;  %v1219_v14 = vadd.f32 %v1218_v10, %v1217_v8  ;;  %v1267_v15 = vadd.f32 %v1266_v11, %v1265_v9  ;;  %v1220_v16 = vpop.f32.mrb[6].mxu0  ;;  %v1268_v17 = vpop.f32.mrb[6].mxu1 }
 0x105   : > { %v1221_v18 = vpop.f32.mrb[7].mxu0  ;;  %v1269_v19 = vpop.f32.mrb[7].mxu1 }
 0x106   : > { %1014 = vst [vmem:[%s1589_s15 + $0x8] sm:$0xff] %v982_v12  ;;  %1030 = vst [vmem:[%s1589_s15 + $0x88] sm:$0xff] %v998_v13  ;;  %v912_v20 = vmul.f32 %v1219_v14, %v1571_v51  ;;  %v928_v21 = vmul.f32 %v1267_v15, %v1571_v51  ;;  %v1222_v22 = vadd.f32 %v1221_v18, %v1220_v16 }
 0x107   : > { %v1270_v23 = vadd.f32 %v1269_v19, %v1268_v17 }
 0x108   : > { %v951_v24 = vadd.f32 %v1576_v57, %v912_v20  ;;  %v967_v25 = vadd.f32 %v1576_v57, %v928_v21  ;;  %v913_v26 = vmul.f32 %v1222_v22, %v1571_v51 }
 0x109   : > { %v929_v27 = vmul.f32 %v1270_v23, %v1571_v51 }
 0x10a   : > { %v983_v28 = vmax.f32 %v951_v24, 0.0  ;;  %v999_v29 = vmax.f32 %v967_v25, 0.0  ;;  %v952_v30 = vadd.f32 %v1576_v57, %v913_v26  ;;  %v1223_v32 = vpop.f32.mrb[8].mxu0  ;;  %v1271_v33 = vpop.f32.mrb[8].mxu1 }
 0x10b   : > { %v968_v31 = vadd.f32 %v1576_v57, %v929_v27  ;;  %v1224_v34 = vpop.f32.mrb[9].mxu0  ;;  %v1272_v35 = vpop.f32.mrb[9].mxu1 }
 0x10c   : > { %1015 = vst [vmem:[%s1589_s15 + $0x10] sm:$0xff] %v983_v28  ;;  %1031 = vst [vmem:[%s1589_s15 + $0x90] sm:$0xff] %v999_v29  ;;  %v984_v36 = vmax.f32 %v952_v30, 0.0  ;;  %v1225_v38 = vadd.f32 %v1224_v34, %v1223_v32  ;;  %v1273_v39 = vadd.f32 %v1272_v35, %v1271_v33  ;;  %v1226_v40 = vpop.f32.mrb[10].mxu0  ;;  %v1274_v41 = vpop.f32.mrb[10].mxu1 }
 0x10d   : > { %v1000_v37 = vmax.f32 %v968_v31, 0.0  ;;  %v1227_v42 = vpop.f32.mrb[11].mxu0  ;;  %v1275_v43 = vpop.f32.mrb[11].mxu1 }
 0x10e   : > { %1016 = vst [vmem:[%s1589_s15 + $0x18] sm:$0xff] %v984_v36  ;;  %v914_v44 = vmul.f32 %v1225_v38, %v1571_v51  ;;  %v930_v45 = vmul.f32 %v1273_v39, %v1571_v51  ;;  %v1228_v46 = vadd.f32 %v1227_v42, %v1226_v40  ;;  %v1276_v47 = vadd.f32 %v1275_v43, %v1274_v41 }
 0x10f   : > { %1032 = vst [vmem:[%s1589_s15 + $0x98] sm:$0xff] %v1000_v37 }
 0x110   : > { %v953_v48 = vadd.f32 %v1576_v57, %v914_v44  ;;  %v969_v49 = vadd.f32 %v1576_v57, %v930_v45  ;;  %v915_v50 = vmul.f32 %v1228_v46, %v1571_v51  ;;  %v931_v52 = vmul.f32 %v1276_v47, %v1571_v51 }
 0x112   : > { %v985_v53 = vmax.f32 %v953_v48, 0.0  ;;  %v1001_v54 = vmax.f32 %v969_v49, 0.0  ;;  %v954_v55 = vadd.f32 %v1576_v57, %v915_v50  ;;  %v970_v56 = vadd.f32 %v1576_v57, %v931_v52  ;;  %v1229_v58 = vpop.f32.mrb[12].mxu0  ;;  %v1277_v59 = vpop.f32.mrb[12].mxu1 }
 0x113   : > { %v1230_v60 = vpop.f32.mrb[13].mxu0  ;;  %v1278_v61 = vpop.f32.mrb[13].mxu1 }
 0x114   : > { %1017 = vst [vmem:[%s1589_s15 + $0x20] sm:$0xff] %v985_v53  ;;  %1033 = vst [vmem:[%s1589_s15 + $0xa0] sm:$0xff] %v1001_v54  ;;  %v986_v62 = vmax.f32 %v954_v55, 0.0  ;;  %v1002_v63 = vmax.f32 %v970_v56, 0.0  ;;  %v1231_v0 = vadd.f32 %v1230_v60, %v1229_v58  ;;  %v1279_v1 = vadd.f32 %v1278_v61, %v1277_v59  ;;  %v1232_v2 = vpop.f32.mrb[14].mxu0  ;;  %v1280_v3 = vpop.f32.mrb[14].mxu1 }
 0x115   : > { %v1233_v4 = vpop.f32.mrb[15].mxu0  ;;  %v1281_v5 = vpop.f32.mrb[15].mxu1 }
 0x116   : > { %1018 = vst [vmem:[%s1589_s15 + $0x28] sm:$0xff] %v986_v62  ;;  %1034 = vst [vmem:[%s1589_s15 + $0xa8] sm:$0xff] %v1002_v63  ;;  %v916_v6 = vmul.f32 %v1231_v0, %v1571_v51  ;;  %v932_v7 = vmul.f32 %v1279_v1, %v1571_v51  ;;  %v1234_v8 = vadd.f32 %v1233_v4, %v1232_v2 }
 0x117   : > { %v1282_v9 = vadd.f32 %v1281_v5, %v1280_v3 }
 0x118   : > { %v955_v10 = vadd.f32 %v1576_v57, %v916_v6  ;;  %v971_v11 = vadd.f32 %v1576_v57, %v932_v7  ;;  %v917_v12 = vmul.f32 %v1234_v8, %v1571_v51 }
 0x119   : > { %v933_v13 = vmul.f32 %v1282_v9, %v1571_v51 }
 0x11a   : > { %v987_v14 = vmax.f32 %v955_v10, 0.0  ;;  %v1003_v15 = vmax.f32 %v971_v11, 0.0  ;;  %v956_v16 = vadd.f32 %v1576_v57, %v917_v12  ;;  %v1235_v18 = vpop.f32.mrb[16].mxu0  ;;  %v1283_v19 = vpop.f32.mrb[16].mxu1 }
 0x11b   : > { %v972_v17 = vadd.f32 %v1576_v57, %v933_v13  ;;  %v1236_v20 = vpop.f32.mrb[17].mxu0  ;;  %v1284_v21 = vpop.f32.mrb[17].mxu1 }
 0x11c   : > { %1019 = vst [vmem:[%s1589_s15 + $0x30] sm:$0xff] %v987_v14  ;;  %1035 = vst [vmem:[%s1589_s15 + $0xb0] sm:$0xff] %v1003_v15  ;;  %v988_v22 = vmax.f32 %v956_v16, 0.0  ;;  %v1237_v24 = vadd.f32 %v1236_v20, %v1235_v18  ;;  %v1285_v25 = vadd.f32 %v1284_v21, %v1283_v19  ;;  %v1238_v26 = vpop.f32.mrb[18].mxu0  ;;  %v1286_v27 = vpop.f32.mrb[18].mxu1 }
 0x11d   : > { %v1004_v23 = vmax.f32 %v972_v17, 0.0  ;;  %v1239_v28 = vpop.f32.mrb[19].mxu0  ;;  %v1287_v29 = vpop.f32.mrb[19].mxu1 }
 0x11e   : > { %1020 = vst [vmem:[%s1589_s15 + $0x38] sm:$0xff] %v988_v22  ;;  %v918_v30 = vmul.f32 %v1237_v24, %v1571_v51  ;;  %v934_v31 = vmul.f32 %v1285_v25, %v1571_v51  ;;  %v1240_v32 = vadd.f32 %v1239_v28, %v1238_v26  ;;  %v1288_v33 = vadd.f32 %v1287_v29, %v1286_v27 }
 0x11f   : > { %1036 = vst [vmem:[%s1589_s15 + $0xb8] sm:$0xff] %v1004_v23 }
 0x120   : > { %v957_v34 = vadd.f32 %v1576_v57, %v918_v30  ;;  %v973_v35 = vadd.f32 %v1576_v57, %v934_v31  ;;  %v919_v36 = vmul.f32 %v1240_v32, %v1571_v51  ;;  %v935_v37 = vmul.f32 %v1288_v33, %v1571_v51 }
 0x122   : > { %v989_v38 = vmax.f32 %v957_v34, 0.0  ;;  %v1005_v39 = vmax.f32 %v973_v35, 0.0  ;;  %v958_v40 = vadd.f32 %v1576_v57, %v919_v36  ;;  %v974_v41 = vadd.f32 %v1576_v57, %v935_v37  ;;  %v1241_v42 = vpop.f32.mrb[20].mxu0  ;;  %v1289_v43 = vpop.f32.mrb[20].mxu1 }
 0x123   : > { %v1242_v44 = vpop.f32.mrb[21].mxu0  ;;  %v1290_v45 = vpop.f32.mrb[21].mxu1 }
 0x124   : > { %1021 = vst [vmem:[%s1589_s15 + $0x40] sm:$0xff] %v989_v38  ;;  %1037 = vst [vmem:[%s1589_s15 + $0xc0] sm:$0xff] %v1005_v39  ;;  %v990_v46 = vmax.f32 %v958_v40, 0.0  ;;  %v1006_v47 = vmax.f32 %v974_v41, 0.0  ;;  %v1243_v48 = vadd.f32 %v1242_v44, %v1241_v42  ;;  %v1291_v49 = vadd.f32 %v1290_v45, %v1289_v43  ;;  %v1244_v50 = vpop.f32.mrb[22].mxu0  ;;  %v1292_v52 = vpop.f32.mrb[22].mxu1 }
 0x125   : > { %v1245_v53 = vpop.f32.mrb[23].mxu0  ;;  %v1293_v54 = vpop.f32.mrb[23].mxu1 }
 0x126   : > { %1022 = vst [vmem:[%s1589_s15 + $0x48] sm:$0xff] %v990_v46  ;;  %1038 = vst [vmem:[%s1589_s15 + $0xc8] sm:$0xff] %v1006_v47  ;;  %v920_v55 = vmul.f32 %v1243_v48, %v1571_v51  ;;  %v936_v56 = vmul.f32 %v1291_v49, %v1571_v51  ;;  %v1246_v58 = vadd.f32 %v1245_v53, %v1244_v50 }
 0x127   : > { %v1294_v59 = vadd.f32 %v1293_v54, %v1292_v52 }
 0x128   : > { %v959_v60 = vadd.f32 %v1576_v57, %v920_v55  ;;  %v975_v61 = vadd.f32 %v1576_v57, %v936_v56  ;;  %v921_v62 = vmul.f32 %v1246_v58, %v1571_v51 }
 0x129   : > { %v937_v63 = vmul.f32 %v1294_v59, %v1571_v51 }
 0x12a   : > { %v991_v0 = vmax.f32 %v959_v60, 0.0  ;;  %v1007_v1 = vmax.f32 %v975_v61, 0.0  ;;  %v960_v2 = vadd.f32 %v1576_v57, %v921_v62  ;;  %v1247_v4 = vpop.f32.mrb[24].mxu0  ;;  %v1295_v5 = vpop.f32.mrb[24].mxu1 }
 0x12b   : > { %v976_v3 = vadd.f32 %v1576_v57, %v937_v63  ;;  %v1248_v6 = vpop.f32.mrb[25].mxu0  ;;  %v1296_v7 = vpop.f32.mrb[25].mxu1 }
 0x12c   : > { %1023 = vst [vmem:[%s1589_s15 + $0x50] sm:$0xff] %v991_v0  ;;  %1039 = vst [vmem:[%s1589_s15 + $0xd0] sm:$0xff] %v1007_v1  ;;  %v992_v8 = vmax.f32 %v960_v2, 0.0  ;;  %v1249_v10 = vadd.f32 %v1248_v6, %v1247_v4  ;;  %v1297_v11 = vadd.f32 %v1296_v7, %v1295_v5  ;;  %v1250_v12 = vpop.f32.mrb[26].mxu0  ;;  %v1298_v13 = vpop.f32.mrb[26].mxu1 }
 0x12d   : > { %v1008_v9 = vmax.f32 %v976_v3, 0.0  ;;  %v1251_v14 = vpop.f32.mrb[27].mxu0  ;;  %v1299_v15 = vpop.f32.mrb[27].mxu1 }
 0x12e   : > { %1024 = vst [vmem:[%s1589_s15 + $0x58] sm:$0xff] %v992_v8  ;;  %v922_v16 = vmul.f32 %v1249_v10, %v1571_v51  ;;  %v938_v17 = vmul.f32 %v1297_v11, %v1571_v51  ;;  %v1252_v18 = vadd.f32 %v1251_v14, %v1250_v12  ;;  %v1300_v19 = vadd.f32 %v1299_v15, %v1298_v13 }
 0x12f   : > { %1040 = vst [vmem:[%s1589_s15 + $0xd8] sm:$0xff] %v1008_v9 }
 0x130   : > { %v961_v20 = vadd.f32 %v1576_v57, %v922_v16  ;;  %v977_v21 = vadd.f32 %v1576_v57, %v938_v17  ;;  %v923_v22 = vmul.f32 %v1252_v18, %v1571_v51  ;;  %v939_v23 = vmul.f32 %v1300_v19, %v1571_v51 }
 0x132   : > { %v993_v24 = vmax.f32 %v961_v20, 0.0  ;;  %v1009_v25 = vmax.f32 %v977_v21, 0.0  ;;  %v962_v26 = vadd.f32 %v1576_v57, %v923_v22  ;;  %v978_v27 = vadd.f32 %v1576_v57, %v939_v23  ;;  %v1253_v28 = vpop.f32.mrb[28].mxu0  ;;  %v1301_v29 = vpop.f32.mrb[28].mxu1 }
 0x133   : > { %v1254_v30 = vpop.f32.mrb[29].mxu0  ;;  %v1302_v31 = vpop.f32.mrb[29].mxu1 }
 0x134   : > { %1025 = vst [vmem:[%s1589_s15 + $0x60] sm:$0xff] %v993_v24  ;;  %1041 = vst [vmem:[%s1589_s15 + $0xe0] sm:$0xff] %v1009_v25  ;;  %v994_v32 = vmax.f32 %v962_v26, 0.0  ;;  %v1010_v33 = vmax.f32 %v978_v27, 0.0  ;;  %v1255_v34 = vadd.f32 %v1254_v30, %v1253_v28  ;;  %v1303_v35 = vadd.f32 %v1302_v31, %v1301_v29  ;;  %v1256_v36 = vpop.f32.mrb[30].mxu0  ;;  %v1304_v37 = vpop.f32.mrb[30].mxu1 }
 0x135   : > { %v1257_v38 = vpop.f32.mrb[31].mxu0  ;;  %v1305_v39 = vpop.f32.mrb[31].mxu1 }
 0x136   : > { %1026 = vst [vmem:[%s1589_s15 + $0x68] sm:$0xff] %v994_v32  ;;  %1042 = vst [vmem:[%s1589_s15 + $0xe8] sm:$0xff] %v1010_v33  ;;  %v924_v40 = vmul.f32 %v1255_v34, %v1571_v51  ;;  %v940_v41 = vmul.f32 %v1303_v35, %v1571_v51  ;;  %v1258_v42 = vadd.f32 %v1257_v38, %v1256_v36 }
 0x137   : > { %v1306_v43 = vadd.f32 %v1305_v39, %v1304_v37 }
 0x138   : > { %v963_v44 = vadd.f32 %v1576_v57, %v924_v40  ;;  %v979_v45 = vadd.f32 %v1576_v57, %v940_v41  ;;  %v925_v46 = vmul.f32 %v1258_v42, %v1571_v51 }
 0x139   : > { %v941_v47 = vmul.f32 %v1306_v43, %v1571_v51 }
 0x13a   : > { %v995_v48 = vmax.f32 %v963_v44, 0.0  ;;  %v1011_v49 = vmax.f32 %v979_v45, 0.0  ;;  %v964_v50 = vadd.f32 %v1576_v57, %v925_v46 }
 0x13b   : > { %v980_v52 = vadd.f32 %v1576_v57, %v941_v47 }
 0x13c   : > { %1027 = vst [vmem:[%s1589_s15 + $0x70] sm:$0xff] %v995_v48  ;;  %1043 = vst [vmem:[%s1589_s15 + $0xf0] sm:$0xff] %v1011_v49  ;;  %v996_v53 = vmax.f32 %v964_v50, 0.0 }
 0x13d   : > { %v1012_v54 = vmax.f32 %v980_v52, 0.0 }
 0x13e   : > { %1028 = vst [vmem:[%s1589_s15 + $0x78] sm:$0xff] %v996_v53 }
 0x13f   : > { %1044 = vst [vmem:[%s1589_s15 + $0xf8] sm:$0xff] %v1012_v54 }
 0x140 PF: > { %s14_s17 = sadd.s32 1, %s1433_s17   ;;  %s1695_s15 = smov %s1429_s16 }
 0x141   : > { %p11_p5 = scmp.ge.s32.totalorder %s14_s17, 4   ;;  %s1696_s16 = smov %s1698_s18 }
 0x143   :  { %13 = sbr.rel (!%p11_p5) target bundleno = 2 (0x2), region = 77 }

// kernel: _lambda_.23
= control target key start
LH: loop header
LB: loop body
LE: loop exit
PB: predicated region body
PF: predicated region fallthrough
CT: control target
= control target key end

     0   :  { %s655_s1 = inlined_call_operand.vmem [shape: bf16[128,128], index: 1, kind: input, shape index: {}]   ;;  %s656_s0 = inlined_call_operand.vmem [shape: bf16[128,128], index: 0, kind: input, shape index: {}]   ;;  %s657_s2 = inlined_call_operand.vmem [shape: f32[1,128], index: 2, kind: input, shape index: {}]   ;;  %s658_s3 = inlined_call_operand.vmem [shape: f32[1,128], index: 3, kind: input, shape index: {}]   ;;  %s659_s4 = inlined_call_operand.vmem [shape: f32[128,128], index: 4, kind: output, shape index: {}]  }
   0x1   :  { %v494_v0 = vld [vmem:[%s655_s1] sm:$0xff]   ;;  %v495_v1 = vld [vmem:[%s655_s1 + $0x8] sm:$0xff]   ;;  %v496_v2 = vld [vmem:[%s655_s1 + $0x10] sm:$0xff]  }
   0x2   :  { %446 = vmatprep.subr.bf16.mxu0 %v494_v0  ;;  %478 = vmatprep.subr.bf16.mxu1 %v494_v0  ;;  %v497_v3 = vld [vmem:[%s655_s1 + $0x18] sm:$0xff]   ;;  %v502_v4 = vld [vmem:[%s656_s0] sm:$0xff]   ;;  %v499_v7 = vld [vmem:[%s655_s1 + $0x28] sm:$0xff]  }
   0x3   :  { %447 = vmatpush3.bf16.msra.mxu0 %v494_v0  ;;  %486 = vmatpush3.bf16.msra.mxu1 %v494_v0  ;;  %v503_v5 = vld [vmem:[%s656_s0 + $0x20] sm:$0xff]   ;;  %v500_v8 = vld [vmem:[%s655_s1 + $0x30] sm:$0xff]   ;;  %v501_v9 = vld [vmem:[%s655_s1 + $0x38] sm:$0xff]  }
   0x4   :  { %448 = vmatprep.subr.bf16.mxu0 %v495_v1  ;;  %479 = vmatprep.subr.bf16.mxu1 %v495_v1  ;;  %v498_v6 = vld [vmem:[%s655_s1 + $0x20] sm:$0xff]   ;;  %v504_v10 = vld [vmem:[%s656_s0 + $0x8] sm:$0xff]   ;;  %v506_v12 = vld [vmem:[%s656_s0 + $0x10] sm:$0xff]  }
   0x5   :  { %462 = vmatprep.mubr.bf16.mxu0 %v502_v4  ;;  %470 = vmatprep.mubr.bf16.mxu1 %v503_v5  ;;  %v505_v11 = vld [vmem:[%s656_s0 + $0x28] sm:$0xff]   ;;  %v507_v13 = vld [vmem:[%s656_s0 + $0x30] sm:$0xff]   ;;  %v508_v14 = vld [vmem:[%s656_s0 + $0x18] sm:$0xff]  }
   0x6   :  { %v509_v15 = vld [vmem:[%s656_s0 + $0x38] sm:$0xff]   ;;  %v428_v16 = vld [vmem:[%s657_s2] ss:$0 sm:$0xff] }
   0x7   :  { %449 = vmatpush3.bf16.msra.mxu0 %v495_v1  ;;  %487 = vmatpush3.bf16.msra.mxu1 %v495_v1  ;;  %v589_v18 = vld [vmem:[%s658_s3] ss:$0 sm:$0xff] }
   0x8   :  { %450 = vmatprep.subr.bf16.mxu0 %v496_v2  ;;  %480 = vmatprep.subr.bf16.mxu1 %v496_v2 }
   0xb   :  { %451 = vmatpush3.bf16.msra.mxu0 %v496_v2  ;;  %488 = vmatpush3.bf16.msra.mxu1 %v496_v2 }
   0xc   :  { %452 = vmatprep.subr.bf16.mxu0 %v497_v3  ;;  %481 = vmatprep.subr.bf16.mxu1 %v497_v3 }
   0xf   :  { %453 = vmatpush3.bf16.msra.mxu0 %v497_v3  ;;  %489 = vmatpush3.bf16.msra.mxu1 %v497_v3 }
  0x10   :  { %454 = vmatprep.subr.bf16.mxu0 %v498_v6  ;;  %482 = vmatprep.subr.bf16.mxu1 %v498_v6 }
  0x13   :  { %455 = vmatpush3.bf16.msra.mxu0 %v498_v6  ;;  %490 = vmatpush3.bf16.msra.mxu1 %v498_v6 }
  0x14   :  { %456 = vmatprep.subr.bf16.mxu0 %v499_v7  ;;  %483 = vmatprep.subr.bf16.mxu1 %v499_v7 }
  0x17   :  { %457 = vmatpush3.bf16.msra.mxu0 %v499_v7  ;;  %491 = vmatpush3.bf16.msra.mxu1 %v499_v7 }
  0x18   :  { %458 = vmatprep.subr.bf16.mxu0 %v500_v8  ;;  %484 = vmatprep.subr.bf16.mxu1 %v500_v8 }
  0x1b   :  { %459 = vmatpush3.bf16.msra.mxu0 %v500_v8  ;;  %492 = vmatpush3.bf16.msra.mxu1 %v500_v8 }
  0x1c   :  { %460 = vmatprep.subr.bf16.mxu0 %v501_v9  ;;  %485 = vmatprep.subr.bf16.mxu1 %v501_v9 }
  0x1f   :  { %461 = vmatpush3.bf16.msra.mxu0 %v501_v9  ;;  %493 = vmatpush3.bf16.msra.mxu1 %v501_v9 }
  0x22   :  { %463 = vmatmul.mubr.bf16.vlgmr.msra.gmra.mrb[0].mxu0 %v504_v10  ;;  %471 = vmatmul.mubr.bf16.vlgmr.msra.gmra.mrb[0].mxu1 %v505_v11 }
  0x23   :  { %466 = vmatprep.mubr.bf16.mxu0 %v506_v12  ;;  %474 = vmatprep.mubr.bf16.mxu1 %v507_v13 }
  0x2a   :  { %467 = vmatmul.mubr.bf16.gmra.mrb[4].mxu0 %v508_v14  ;;  %475 = vmatmul.mubr.bf16.gmra.mrb[4].mxu1 %v509_v15 }
  0xf5   :  { %v464_v17 = vpop.f32.mrb[0].mxu0  ;;  %v472_v19 = vpop.f32.mrb[0].mxu1 }
  0xf6   :  { %v339_v20 = vmul.f32 %v464_v17, %v428_v16  ;;  %v347_v21 = vmul.f32 %v472_v19, %v428_v16  ;;  %v216_v22 = vpop.f32.mrb[1].mxu0  ;;  %v248_v23 = vpop.f32.mrb[1].mxu1 }
  0xf7   :  { %v337_v24 = vmul.f32 %v428_v16, %v216_v22  ;;  %v345_v25 = vmul.f32 %v428_v16, %v248_v23  ;;  %v465_v26 = vpop.f32.mrb[2].mxu0  ;;  %v473_v27 = vpop.f32.mrb[2].mxu1 }
  0xf8   :  { %v362_v28 = vadd.f32 %v589_v18, %v339_v20  ;;  %v370_v29 = vadd.f32 %v589_v18, %v347_v21  ;;  %v340_v30 = vmul.f32 %v465_v26, %v428_v16  ;;  %v348_v31 = vmul.f32 %v473_v27, %v428_v16  ;;  %v219_v32 = vpop.f32.mrb[3].mxu0  ;;  %v251_v33 = vpop.f32.mrb[3].mxu1 }
  0xf9   :  { %v360_v34 = vadd.f32 %v589_v18, %v337_v24  ;;  %v368_v35 = vadd.f32 %v589_v18, %v345_v25  ;;  %v338_v36 = vmul.f32 %v428_v16, %v219_v32  ;;  %v346_v37 = vmul.f32 %v428_v16, %v251_v33 }
  0xfa   :  { %v378_v38 = vmax.f32 %v362_v28, 0.0  ;;  %v386_v39 = vmax.f32 %v370_v29, 0.0  ;;  %v363_v40 = vadd.f32 %v589_v18, %v340_v30  ;;  %v371_v41 = vadd.f32 %v589_v18, %v348_v31 }
  0xfb   :  { %v376_v42 = vmax.f32 %v360_v34, 0.0  ;;  %v384_v43 = vmax.f32 %v368_v35, 0.0  ;;  %v361_v44 = vadd.f32 %v589_v18, %v338_v36  ;;  %v369_v45 = vadd.f32 %v589_v18, %v346_v37 }
  0xfc   :  { %394 = vst [vmem:[%s659_s4 + $0x10] sm:$0xff] %v378_v38  ;;  %402 = vst [vmem:[%s659_s4 + $0x50] sm:$0xff] %v386_v39  ;;  %v379_v46 = vmax.f32 %v363_v40, 0.0  ;;  %v387_v47 = vmax.f32 %v371_v41, 0.0 }
  0xfd   :  { %392 = vst [vmem:[%s659_s4] sm:$0xff] %v376_v42  ;;  %400 = vst [vmem:[%s659_s4 + $0x40] sm:$0xff] %v384_v43  ;;  %v377_v48 = vmax.f32 %v361_v44, 0.0  ;;  %v385_v49 = vmax.f32 %v369_v45, 0.0  ;;  %v468_v50 = vpop.f32.mrb[4].mxu0  ;;  %v476_v51 = vpop.f32.mrb[4].mxu1 }
  0xfe   :  { %395 = vst [vmem:[%s659_s4 + $0x18] sm:$0xff] %v379_v46  ;;  %403 = vst [vmem:[%s659_s4 + $0x58] sm:$0xff] %v387_v47  ;;  %v343_v52 = vmul.f32 %v468_v50, %v428_v16  ;;  %v351_v53 = vmul.f32 %v476_v51, %v428_v16  ;;  %v232_v54 = vpop.f32.mrb[5].mxu0  ;;  %v264_v55 = vpop.f32.mrb[5].mxu1 }
  0xff   :  { %393 = vst [vmem:[%s659_s4 + $0x8] sm:$0xff] %v377_v48  ;;  %401 = vst [vmem:[%s659_s4 + $0x48] sm:$0xff] %v385_v49  ;;  %v341_v56 = vmul.f32 %v428_v16, %v232_v54  ;;  %v349_v57 = vmul.f32 %v428_v16, %v264_v55  ;;  %v469_v58 = vpop.f32.mrb[6].mxu0  ;;  %v477_v59 = vpop.f32.mrb[6].mxu1 }
 0x100   :  { %v366_v60 = vadd.f32 %v589_v18, %v343_v52  ;;  %v374_v61 = vadd.f32 %v589_v18, %v351_v53  ;;  %v344_v62 = vmul.f32 %v469_v58, %v428_v16  ;;  %v352_v63 = vmul.f32 %v477_v59, %v428_v16  ;;  %v235_v0 = vpop.f32.mrb[7].mxu0  ;;  %v267_v1 = vpop.f32.mrb[7].mxu1 }
 0x101   :  { %v364_v2 = vadd.f32 %v589_v18, %v341_v56  ;;  %v372_v3 = vadd.f32 %v589_v18, %v349_v57  ;;  %v342_v4 = vmul.f32 %v428_v16, %v235_v0  ;;  %v350_v5 = vmul.f32 %v428_v16, %v267_v1 }
 0x102   :  { %v382_v6 = vmax.f32 %v366_v60, 0.0  ;;  %v390_v7 = vmax.f32 %v374_v61, 0.0  ;;  %v367_v8 = vadd.f32 %v589_v18, %v344_v62  ;;  %v375_v9 = vadd.f32 %v589_v18, %v352_v63 }
 0x103   :  { %v380_v10 = vmax.f32 %v364_v2, 0.0  ;;  %v388_v11 = vmax.f32 %v372_v3, 0.0  ;;  %v365_v12 = vadd.f32 %v589_v18, %v342_v4  ;;  %v373_v13 = vadd.f32 %v589_v18, %v350_v5 }
 0x104   :  { %398 = vst [vmem:[%s659_s4 + $0x30] sm:$0xff] %v382_v6  ;;  %406 = vst [vmem:[%s659_s4 + $0x70] sm:$0xff] %v390_v7  ;;  %v383_v14 = vmax.f32 %v367_v8, 0.0  ;;  %v391_v15 = vmax.f32 %v375_v9, 0.0 }
 0x105   :  { %396 = vst [vmem:[%s659_s4 + $0x20] sm:$0xff] %v380_v10  ;;  %404 = vst [vmem:[%s659_s4 + $0x60] sm:$0xff] %v388_v11  ;;  %v381_v16 = vmax.f32 %v365_v12, 0.0  ;;  %v389_v17 = vmax.f32 %v373_v13, 0.0 }
 0x106   :  { %399 = vst [vmem:[%s659_s4 + $0x38] sm:$0xff] %v383_v14  ;;  %407 = vst [vmem:[%s659_s4 + $0x78] sm:$0xff] %v391_v15 }
 0x107   :  { %397 = vst [vmem:[%s659_s4 + $0x28] sm:$0xff] %v381_v16  ;;  %405 = vst [vmem:[%s659_s4 + $0x68] sm:$0xff] %v389_v17 }

// kernel: _lambda_.25
= control target key start
LH: loop header
LB: loop body
LE: loop exit
PB: predicated region body
PF: predicated region fallthrough
CT: control target
= control target key end

     0   :  { %s621_s1 = inlined_call_operand.vmem [shape: bf16[128,128], index: 1, kind: input, shape index: {}]   ;;  %s622_s0 = inlined_call_operand.vmem [shape: bf16[128,128], index: 0, kind: input, shape index: {}]   ;;  %s623_s2 = inlined_call_operand.vmem [shape: f32[1,128], index: 2, kind: input, shape index: {}]   ;;  %s624_s3 = inlined_call_operand.vmem [shape: f32[1,128], index: 3, kind: input, shape index: {}]   ;;  %s625_s4 = inlined_call_operand.vmem [shape: f32[128,128], index: 4, kind: output, shape index: {}]  }
   0x1   :  { %v478_v0 = vld [vmem:[%s621_s1] sm:$0xff]   ;;  %v479_v1 = vld [vmem:[%s621_s1 + $0x8] sm:$0xff]   ;;  %v480_v2 = vld [vmem:[%s621_s1 + $0x10] sm:$0xff]  }
   0x2   :  { %430 = vmatprep.subr.bf16.mxu0 %v478_v0  ;;  %462 = vmatprep.subr.bf16.mxu1 %v478_v0  ;;  %v481_v3 = vld [vmem:[%s621_s1 + $0x18] sm:$0xff]   ;;  %v486_v4 = vld [vmem:[%s622_s0] sm:$0xff]   ;;  %v483_v7 = vld [vmem:[%s621_s1 + $0x28] sm:$0xff]  }
   0x3   :  { %431 = vmatpush3.bf16.msra.mxu0 %v478_v0  ;;  %470 = vmatpush3.bf16.msra.mxu1 %v478_v0  ;;  %v487_v5 = vld [vmem:[%s622_s0 + $0x20] sm:$0xff]   ;;  %v484_v8 = vld [vmem:[%s621_s1 + $0x30] sm:$0xff]   ;;  %v485_v9 = vld [vmem:[%s621_s1 + $0x38] sm:$0xff]  }
   0x4   :  { %432 = vmatprep.subr.bf16.mxu0 %v479_v1  ;;  %463 = vmatprep.subr.bf16.mxu1 %v479_v1  ;;  %v482_v6 = vld [vmem:[%s621_s1 + $0x20] sm:$0xff]   ;;  %v488_v10 = vld [vmem:[%s622_s0 + $0x8] sm:$0xff]   ;;  %v490_v12 = vld [vmem:[%s622_s0 + $0x10] sm:$0xff]  }
   0x5   :  { %446 = vmatprep.mubr.bf16.mxu0 %v486_v4  ;;  %454 = vmatprep.mubr.bf16.mxu1 %v487_v5  ;;  %v489_v11 = vld [vmem:[%s622_s0 + $0x28] sm:$0xff]   ;;  %v491_v13 = vld [vmem:[%s622_s0 + $0x30] sm:$0xff]   ;;  %v492_v14 = vld [vmem:[%s622_s0 + $0x18] sm:$0xff]  }
   0x6   :  { %v493_v15 = vld [vmem:[%s622_s0 + $0x38] sm:$0xff]   ;;  %v412_v16 = vld [vmem:[%s623_s2] ss:$0 sm:$0xff] }
   0x7   :  { %433 = vmatpush3.bf16.msra.mxu0 %v479_v1  ;;  %471 = vmatpush3.bf16.msra.mxu1 %v479_v1  ;;  %v413_v18 = vld [vmem:[%s624_s3] ss:$0 sm:$0xff] }
   0x8   :  { %434 = vmatprep.subr.bf16.mxu0 %v480_v2  ;;  %464 = vmatprep.subr.bf16.mxu1 %v480_v2 }
   0xb   :  { %435 = vmatpush3.bf16.msra.mxu0 %v480_v2  ;;  %472 = vmatpush3.bf16.msra.mxu1 %v480_v2 }
   0xc   :  { %436 = vmatprep.subr.bf16.mxu0 %v481_v3  ;;  %465 = vmatprep.subr.bf16.mxu1 %v481_v3 }
   0xf   :  { %437 = vmatpush3.bf16.msra.mxu0 %v481_v3  ;;  %473 = vmatpush3.bf16.msra.mxu1 %v481_v3 }
  0x10   :  { %438 = vmatprep.subr.bf16.mxu0 %v482_v6  ;;  %466 = vmatprep.subr.bf16.mxu1 %v482_v6 }
  0x13   :  { %439 = vmatpush3.bf16.msra.mxu0 %v482_v6  ;;  %474 = vmatpush3.bf16.msra.mxu1 %v482_v6 }
  0x14   :  { %440 = vmatprep.subr.bf16.mxu0 %v483_v7  ;;  %467 = vmatprep.subr.bf16.mxu1 %v483_v7 }
  0x17   :  { %441 = vmatpush3.bf16.msra.mxu0 %v483_v7  ;;  %475 = vmatpush3.bf16.msra.mxu1 %v483_v7 }
  0x18   :  { %442 = vmatprep.subr.bf16.mxu0 %v484_v8  ;;  %468 = vmatprep.subr.bf16.mxu1 %v484_v8 }
  0x1b   :  { %443 = vmatpush3.bf16.msra.mxu0 %v484_v8  ;;  %476 = vmatpush3.bf16.msra.mxu1 %v484_v8 }
  0x1c   :  { %444 = vmatprep.subr.bf16.mxu0 %v485_v9  ;;  %469 = vmatprep.subr.bf16.mxu1 %v485_v9 }
  0x1f   :  { %445 = vmatpush3.bf16.msra.mxu0 %v485_v9  ;;  %477 = vmatpush3.bf16.msra.mxu1 %v485_v9 }
  0x22   :  { %447 = vmatmul.mubr.bf16.vlgmr.msra.gmra.mrb[0].mxu0 %v488_v10  ;;  %455 = vmatmul.mubr.bf16.vlgmr.msra.gmra.mrb[0].mxu1 %v489_v11 }
  0x23   :  { %450 = vmatprep.mubr.bf16.mxu0 %v490_v12  ;;  %458 = vmatprep.mubr.bf16.mxu1 %v491_v13 }
  0x2a   :  { %451 = vmatmul.mubr.bf16.gmra.mrb[4].mxu0 %v492_v14  ;;  %459 = vmatmul.mubr.bf16.gmra.mrb[4].mxu1 %v493_v15 }
  0xf5   :  { %v448_v17 = vpop.f32.mrb[0].mxu0  ;;  %v456_v19 = vpop.f32.mrb[0].mxu1 }
  0xf6   :  { %v339_v20 = vmul.f32 %v448_v17, %v412_v16  ;;  %v347_v21 = vmul.f32 %v456_v19, %v412_v16  ;;  %v216_v22 = vpop.f32.mrb[1].mxu0  ;;  %v248_v23 = vpop.f32.mrb[1].mxu1 }
  0xf7   :  { %v337_v24 = vmul.f32 %v412_v16, %v216_v22  ;;  %v345_v25 = vmul.f32 %v412_v16, %v248_v23  ;;  %v449_v26 = vpop.f32.mrb[2].mxu0  ;;  %v457_v27 = vpop.f32.mrb[2].mxu1 }
  0xf8   :  { %v362_v28 = vadd.f32 %v413_v18, %v339_v20  ;;  %v370_v29 = vadd.f32 %v413_v18, %v347_v21  ;;  %v340_v30 = vmul.f32 %v449_v26, %v412_v16  ;;  %v348_v31 = vmul.f32 %v457_v27, %v412_v16  ;;  %v219_v32 = vpop.f32.mrb[3].mxu0  ;;  %v251_v33 = vpop.f32.mrb[3].mxu1 }
  0xf9   :  { %v360_v34 = vadd.f32 %v413_v18, %v337_v24  ;;  %v368_v35 = vadd.f32 %v413_v18, %v345_v25  ;;  %v338_v36 = vmul.f32 %v412_v16, %v219_v32  ;;  %v346_v37 = vmul.f32 %v412_v16, %v251_v33 }
  0xfa   :  { %378 = vst [vmem:[%s625_s4 + $0x10] sm:$0xff] %v362_v28  ;;  %386 = vst [vmem:[%s625_s4 + $0x50] sm:$0xff] %v370_v29  ;;  %v363_v38 = vadd.f32 %v413_v18, %v340_v30  ;;  %v371_v39 = vadd.f32 %v413_v18, %v348_v31 }
  0xfb   :  { %376 = vst [vmem:[%s625_s4] sm:$0xff] %v360_v34  ;;  %384 = vst [vmem:[%s625_s4 + $0x40] sm:$0xff] %v368_v35  ;;  %v361_v40 = vadd.f32 %v413_v18, %v338_v36  ;;  %v369_v41 = vadd.f32 %v413_v18, %v346_v37 }
  0xfc   :  { %379 = vst [vmem:[%s625_s4 + $0x18] sm:$0xff] %v363_v38  ;;  %387 = vst [vmem:[%s625_s4 + $0x58] sm:$0xff] %v371_v39 }
  0xfd   :  { %377 = vst [vmem:[%s625_s4 + $0x8] sm:$0xff] %v361_v40  ;;  %385 = vst [vmem:[%s625_s4 + $0x48] sm:$0xff] %v369_v41  ;;  %v452_v42 = vpop.f32.mrb[4].mxu0  ;;  %v460_v43 = vpop.f32.mrb[4].mxu1 }
  0xfe   :  { %v343_v44 = vmul.f32 %v452_v42, %v412_v16  ;;  %v351_v45 = vmul.f32 %v460_v43, %v412_v16  ;;  %v232_v46 = vpop.f32.mrb[5].mxu0  ;;  %v264_v47 = vpop.f32.mrb[5].mxu1 }
  0xff   :  { %v341_v48 = vmul.f32 %v412_v16, %v232_v46  ;;  %v349_v49 = vmul.f32 %v412_v16, %v264_v47  ;;  %v453_v50 = vpop.f32.mrb[6].mxu0  ;;  %v461_v51 = vpop.f32.mrb[6].mxu1 }
 0x100   :  { %v366_v52 = vadd.f32 %v413_v18, %v343_v44  ;;  %v374_v53 = vadd.f32 %v413_v18, %v351_v45  ;;  %v344_v54 = vmul.f32 %v453_v50, %v412_v16  ;;  %v352_v55 = vmul.f32 %v461_v51, %v412_v16  ;;  %v235_v56 = vpop.f32.mrb[7].mxu0  ;;  %v267_v57 = vpop.f32.mrb[7].mxu1 }
 0x101   :  { %v364_v58 = vadd.f32 %v413_v18, %v341_v48  ;;  %v372_v59 = vadd.f32 %v413_v18, %v349_v49  ;;  %v342_v60 = vmul.f32 %v412_v16, %v235_v56  ;;  %v350_v61 = vmul.f32 %v412_v16, %v267_v57 }
 0x102   :  { %382 = vst [vmem:[%s625_s4 + $0x30] sm:$0xff] %v366_v52  ;;  %390 = vst [vmem:[%s625_s4 + $0x70] sm:$0xff] %v374_v53  ;;  %v367_v62 = vadd.f32 %v413_v18, %v344_v54  ;;  %v375_v63 = vadd.f32 %v413_v18, %v352_v55 }
 0x103   :  { %380 = vst [vmem:[%s625_s4 + $0x20] sm:$0xff] %v364_v58  ;;  %388 = vst [vmem:[%s625_s4 + $0x60] sm:$0xff] %v372_v59  ;;  %v365_v0 = vadd.f32 %v413_v18, %v342_v60  ;;  %v373_v1 = vadd.f32 %v413_v18, %v350_v61 }
 0x104   :  { %383 = vst [vmem:[%s625_s4 + $0x38] sm:$0xff] %v367_v62  ;;  %391 = vst [vmem:[%s625_s4 + $0x78] sm:$0xff] %v375_v63 }
 0x105   :  { %381 = vst [vmem:[%s625_s4 + $0x28] sm:$0xff] %v365_v0  ;;  %389 = vst [vmem:[%s625_s4 + $0x68] sm:$0xff] %v373_v1 }

// kernel: _lambda_.24
= control target key start
LH: loop header
LB: loop body
LE: loop exit
PB: predicated region body
PF: predicated region fallthrough
CT: control target
= control target key end

     0   :  { %s873_s1 = inlined_call_operand.vmem [shape: bf16[256,128], index: 1, kind: input, shape index: {}]   ;;  %s874_s0 = inlined_call_operand.vmem [shape: bf16[128,256], index: 0, kind: input, shape index: {}]   ;;  %s875_s2 = inlined_call_operand.vmem [shape: f32[1,128], index: 2, kind: input, shape index: {}]   ;;  %s876_s3 = inlined_call_operand.vmem [shape: f32[1,128], index: 3, kind: input, shape index: {}]   ;;  %s877_s4 = inlined_call_operand.vmem [shape: f32[128,128], index: 4, kind: output, shape index: {}]  }
   0x1   :  { %v622_v0 = vld [vmem:[%s873_s1 + $0x40] sm:$0xff]   ;;  %v624_v2 = vld [vmem:[%s873_s1 + $0x48] sm:$0xff]   ;;  %v626_v4 = vld [vmem:[%s873_s1 + $0x50] sm:$0xff]  }
   0x2   :  { %v623_v1 = vld [vmem:[%s873_s1] sm:$0xff]   ;;  %542 = vmatprep.subr.bf16.mxu0 %v622_v0  ;;  %606 = vmatprep.subr.bf16.mxu1 %v622_v0  ;;  %v625_v3 = vld [vmem:[%s873_s1 + $0x8] sm:$0xff]   ;;  %v627_v5 = vld [vmem:[%s873_s1 + $0x10] sm:$0xff]  }
   0x3   :  { %543 = vmatpush3.bf16.msra.mxu0 %v623_v1  ;;  %614 = vmatpush3.bf16.msra.mxu1 %v623_v1  ;;  %v628_v6 = vld [vmem:[%s873_s1 + $0x58] sm:$0xff]   ;;  %v630_v8 = vld [vmem:[%s873_s1 + $0x60] sm:$0xff]   ;;  %v632_v10 = vld [vmem:[%s873_s1 + $0x68] sm:$0xff]  }
   0x4   :  { %544 = vmatprep.subr.bf16.mxu0 %v624_v2  ;;  %607 = vmatprep.subr.bf16.mxu1 %v624_v2  ;;  %v629_v7 = vld [vmem:[%s873_s1 + $0x18] sm:$0xff]   ;;  %v631_v9 = vld [vmem:[%s873_s1 + $0x20] sm:$0xff]   ;;  %v633_v13 = vld [vmem:[%s873_s1 + $0x28] sm:$0xff]  }
   0x5   :  { %v640_v11 = vld [vmem:[%s874_s0 + $0x4] ss:$8 sps:$4 sm:$0xff]   ;;  %v634_v14 = vld [vmem:[%s873_s1 + $0x70] sm:$0xff]   ;;  %v636_v16 = vld [vmem:[%s873_s1 + $0x78] sm:$0xff]  }
   0x6   :  { %v643_v12 = vld [vmem:[%s874_s0 + $0x44] ss:$8 sps:$4 sm:$0xff]   ;;  %310 = vmatprep.mubr.bf16.mxu0 %v640_v11  ;;  %v635_v15 = vld [vmem:[%s873_s1 + $0x30] sm:$0xff]   ;;  %v637_v17 = vld [vmem:[%s873_s1 + $0x38] sm:$0xff]  }
   0x7   :  { %545 = vmatpush3.bf16.msra.mxu0 %v625_v3  ;;  %615 = vmatpush3.bf16.msra.mxu1 %v625_v3  ;;  %v638_v18 = vld [vmem:[%s874_s0] ss:$8 sps:$4 sm:$0xff]   ;;  %v644_v20 = vld [vmem:[%s874_s0 + $0x14] ss:$8 sps:$4 sm:$0xff]   ;;  %v648_v22 = vld [vmem:[%s874_s0 + $0x10] ss:$8 sps:$4 sm:$0xff]  }
   0x8   :  { %546 = vmatprep.subr.bf16.mxu0 %v626_v4  ;;  %608 = vmatprep.subr.bf16.mxu1 %v626_v4  ;;  %v641_v19 = vld [vmem:[%s874_s0 + $0x40] ss:$8 sps:$4 sm:$0xff]   ;;  %v646_v21 = vld [vmem:[%s874_s0 + $0x54] ss:$8 sps:$4 sm:$0xff]   ;;  %v649_v23 = vld [vmem:[%s874_s0 + $0x50] ss:$8 sps:$4 sm:$0xff]  }
   0x9   :  { %342 = vmatprep.mubr.bf16.mxu1 %v643_v12  ;;  %v650_v24 = vld [vmem:[%s874_s0 + $0x24] ss:$8 sps:$4 sm:$0xff]   ;;  %v654_v26 = vld [vmem:[%s874_s0 + $0x20] ss:$8 sps:$4 sm:$0xff]   ;;  %v656_v28 = vld [vmem:[%s874_s0 + $0x34] ss:$8 sps:$4 sm:$0xff]  }
   0xa   :  { %v652_v25 = vld [vmem:[%s874_s0 + $0x64] ss:$8 sps:$4 sm:$0xff]   ;;  %v655_v27 = vld [vmem:[%s874_s0 + $0x60] ss:$8 sps:$4 sm:$0xff]   ;;  %v658_v29 = vld [vmem:[%s874_s0 + $0x74] ss:$8 sps:$4 sm:$0xff]  }
   0xb   :  { %547 = vmatpush3.bf16.msra.mxu0 %v627_v5  ;;  %616 = vmatpush3.bf16.msra.mxu1 %v627_v5  ;;  %v660_v30 = vld [vmem:[%s874_s0 + $0x30] ss:$8 sps:$4 sm:$0xff]   ;;  %v786_v35 = vld [vmem:[%s875_s2] ss:$0 sm:$0xff] }
   0xc   :  { %548 = vmatprep.subr.bf16.mxu0 %v628_v6  ;;  %609 = vmatprep.subr.bf16.mxu1 %v628_v6  ;;  %v661_v31 = vld [vmem:[%s874_s0 + $0x70] ss:$8 sps:$4 sm:$0xff]   ;;  %v791_v41 = vld [vmem:[%s876_s3] ss:$0 sm:$0xff] }
   0xf   :  { %549 = vmatpush3.bf16.msra.mxu0 %v629_v7  ;;  %617 = vmatpush3.bf16.msra.mxu1 %v629_v7 }
  0x10   :  { %550 = vmatprep.subr.bf16.mxu0 %v630_v8  ;;  %610 = vmatprep.subr.bf16.mxu1 %v630_v8 }
  0x13   :  { %551 = vmatpush3.bf16.msra.mxu0 %v631_v9  ;;  %618 = vmatpush3.bf16.msra.mxu1 %v631_v9 }
  0x14   :  { %552 = vmatprep.subr.bf16.mxu0 %v632_v10  ;;  %611 = vmatprep.subr.bf16.mxu1 %v632_v10 }
  0x17   :  { %553 = vmatpush3.bf16.msra.mxu0 %v633_v13  ;;  %619 = vmatpush3.bf16.msra.mxu1 %v633_v13 }
  0x18   :  { %554 = vmatprep.subr.bf16.mxu0 %v634_v14  ;;  %612 = vmatprep.subr.bf16.mxu1 %v634_v14 }
  0x1b   :  { %555 = vmatpush3.bf16.msra.mxu0 %v635_v15  ;;  %620 = vmatpush3.bf16.msra.mxu1 %v635_v15 }
  0x1c   :  { %556 = vmatprep.subr.bf16.mxu0 %v636_v16  ;;  %613 = vmatprep.subr.bf16.mxu1 %v636_v16 }
  0x1f   :  { %557 = vmatpush3.bf16.msra.mxu0 %v637_v17  ;;  %621 = vmatpush3.bf16.msra.mxu1 %v637_v17 }
  0x22   :  { %311 = vmatmul.mubr.bf16.vlgmr.msra.gmra.mrb[0].mxu0 %v638_v18  ;;  %343 = vmatmul.mubr.bf16.vlgmr.msra.gmra.mrb[0].mxu1 %v641_v19 }
  0x23   :  { %318 = vmatprep.mubr.bf16.mxu0 %v644_v20  ;;  %350 = vmatprep.mubr.bf16.mxu1 %v646_v21 }
  0x2a   :  { %319 = vmatmul.mubr.bf16.gmra.mrb[4].mxu0 %v648_v22  ;;  %351 = vmatmul.mubr.bf16.gmra.mrb[4].mxu1 %v649_v23 }
  0x2b   :  { %326 = vmatprep.mubr.bf16.mxu0 %v650_v24  ;;  %358 = vmatprep.mubr.bf16.mxu1 %v652_v25 }
  0x32   :  { %327 = vmatmul.mubr.bf16.gmra.mrb[8].mxu0 %v654_v26  ;;  %359 = vmatmul.mubr.bf16.gmra.mrb[8].mxu1 %v655_v27 }
  0x33   :  { %334 = vmatprep.mubr.bf16.mxu0 %v656_v28  ;;  %366 = vmatprep.mubr.bf16.mxu1 %v658_v29 }
  0x3a   :  { %335 = vmatmul.mubr.bf16.gmra.mrb[12].mxu0 %v660_v30  ;;  %367 = vmatmul.mubr.bf16.gmra.mrb[12].mxu1 %v661_v31 }
  0xf5   :  { %v558_v32 = vpop.f32.mrb[0].mxu0  ;;  %v582_v33 = vpop.f32.mrb[0].mxu1 }
  0xf6   :  { %v559_v34 = vpop.f32.mrb[1].mxu0  ;;  %v583_v36 = vpop.f32.mrb[1].mxu1 }
  0xf7   :  { %v560_v37 = vadd.f32 %v559_v34, %v558_v32  ;;  %v584_v38 = vadd.f32 %v583_v36, %v582_v33  ;;  %v561_v39 = vpop.f32.mrb[2].mxu0  ;;  %v585_v40 = vpop.f32.mrb[2].mxu1 }
  0xf8   :  { %v562_v42 = vpop.f32.mrb[3].mxu0  ;;  %v586_v43 = vpop.f32.mrb[3].mxu1 }
  0xf9   :  { %v433_v44 = vmul.f32 %v560_v37, %v786_v35  ;;  %v441_v45 = vmul.f32 %v584_v38, %v786_v35  ;;  %v563_v46 = vadd.f32 %v562_v42, %v561_v39  ;;  %v587_v47 = vadd.f32 %v586_v43, %v585_v40 }
  0xfb   :  { %v456_v48 = vadd.f32 %v791_v41, %v433_v44  ;;  %v464_v49 = vadd.f32 %v791_v41, %v441_v45  ;;  %v434_v50 = vmul.f32 %v563_v46, %v786_v35  ;;  %v442_v51 = vmul.f32 %v587_v47, %v786_v35 }
  0xfd   :  { %v472_v52 = vmax.f32 %v456_v48, 0.0  ;;  %v480_v53 = vmax.f32 %v464_v49, 0.0  ;;  %v457_v54 = vadd.f32 %v791_v41, %v434_v50  ;;  %v465_v55 = vadd.f32 %v791_v41, %v442_v51  ;;  %v564_v56 = vpop.f32.mrb[4].mxu0  ;;  %v588_v57 = vpop.f32.mrb[4].mxu1 }
  0xfe   :  { %v565_v58 = vpop.f32.mrb[5].mxu0  ;;  %v589_v59 = vpop.f32.mrb[5].mxu1 }
  0xff   :  { %488 = vst [vmem:[%s877_s4] sm:$0xff] %v472_v52  ;;  %496 = vst [vmem:[%s877_s4 + $0x40] sm:$0xff] %v480_v53  ;;  %v473_v60 = vmax.f32 %v457_v54, 0.0  ;;  %v481_v61 = vmax.f32 %v465_v55, 0.0  ;;  %v566_v62 = vadd.f32 %v565_v58, %v564_v56  ;;  %v590_v63 = vadd.f32 %v589_v59, %v588_v57  ;;  %v567_v0 = vpop.f32.mrb[6].mxu0  ;;  %v591_v1 = vpop.f32.mrb[6].mxu1 }
 0x100   :  { %v568_v2 = vpop.f32.mrb[7].mxu0  ;;  %v592_v3 = vpop.f32.mrb[7].mxu1 }
 0x101   :  { %489 = vst [vmem:[%s877_s4 + $0x8] sm:$0xff] %v473_v60  ;;  %497 = vst [vmem:[%s877_s4 + $0x48] sm:$0xff] %v481_v61  ;;  %v435_v4 = vmul.f32 %v566_v62, %v786_v35  ;;  %v443_v5 = vmul.f32 %v590_v63, %v786_v35  ;;  %v569_v6 = vadd.f32 %v568_v2, %v567_v0 }
 0x102   :  { %v593_v7 = vadd.f32 %v592_v3, %v591_v1 }
 0x103   :  { %v458_v8 = vadd.f32 %v791_v41, %v435_v4  ;;  %v466_v9 = vadd.f32 %v791_v41, %v443_v5  ;;  %v436_v10 = vmul.f32 %v569_v6, %v786_v35 }
 0x104   :  { %v444_v11 = vmul.f32 %v593_v7, %v786_v35 }
 0x105   :  { %v474_v12 = vmax.f32 %v458_v8, 0.0  ;;  %v482_v13 = vmax.f32 %v466_v9, 0.0  ;;  %v459_v14 = vadd.f32 %v791_v41, %v436_v10  ;;  %v570_v16 = vpop.f32.mrb[8].mxu0  ;;  %v594_v17 = vpop.f32.mrb[8].mxu1 }
 0x106   :  { %v467_v15 = vadd.f32 %v791_v41, %v444_v11  ;;  %v571_v18 = vpop.f32.mrb[9].mxu0  ;;  %v595_v19 = vpop.f32.mrb[9].mxu1 }
 0x107   :  { %490 = vst [vmem:[%s877_s4 + $0x10] sm:$0xff] %v474_v12  ;;  %498 = vst [vmem:[%s877_s4 + $0x50] sm:$0xff] %v482_v13  ;;  %v475_v20 = vmax.f32 %v459_v14, 0.0  ;;  %v572_v22 = vadd.f32 %v571_v18, %v570_v16  ;;  %v596_v23 = vadd.f32 %v595_v19, %v594_v17  ;;  %v573_v24 = vpop.f32.mrb[10].mxu0  ;;  %v597_v25 = vpop.f32.mrb[10].mxu1 }
 0x108   :  { %v483_v21 = vmax.f32 %v467_v15, 0.0  ;;  %v574_v26 = vpop.f32.mrb[11].mxu0  ;;  %v598_v27 = vpop.f32.mrb[11].mxu1 }
 0x109   :  { %491 = vst [vmem:[%s877_s4 + $0x18] sm:$0xff] %v475_v20  ;;  %v437_v28 = vmul.f32 %v572_v22, %v786_v35  ;;  %v445_v29 = vmul.f32 %v596_v23, %v786_v35  ;;  %v575_v30 = vadd.f32 %v574_v26, %v573_v24  ;;  %v599_v31 = vadd.f32 %v598_v27, %v597_v25 }
 0x10a   :  { %499 = vst [vmem:[%s877_s4 + $0x58] sm:$0xff] %v483_v21 }
 0x10b   :  { %v460_v32 = vadd.f32 %v791_v41, %v437_v28  ;;  %v468_v33 = vadd.f32 %v791_v41, %v445_v29  ;;  %v438_v34 = vmul.f32 %v575_v30, %v786_v35  ;;  %v446_v36 = vmul.f32 %v599_v31, %v786_v35 }
 0x10d   :  { %v476_v37 = vmax.f32 %v460_v32, 0.0  ;;  %v484_v38 = vmax.f32 %v468_v33, 0.0  ;;  %v461_v39 = vadd.f32 %v791_v41, %v438_v34  ;;  %v469_v40 = vadd.f32 %v791_v41, %v446_v36  ;;  %v576_v42 = vpop.f32.mrb[12].mxu0  ;;  %v600_v43 = vpop.f32.mrb[12].mxu1 }
 0x10e   :  { %v577_v44 = vpop.f32.mrb[13].mxu0  ;;  %v601_v45 = vpop.f32.mrb[13].mxu1 }
 0x10f   :  { %492 = vst [vmem:[%s877_s4 + $0x20] sm:$0xff] %v476_v37  ;;  %500 = vst [vmem:[%s877_s4 + $0x60] sm:$0xff] %v484_v38  ;;  %v477_v46 = vmax.f32 %v461_v39, 0.0  ;;  %v485_v47 = vmax.f32 %v469_v40, 0.0  ;;  %v578_v48 = vadd.f32 %v577_v44, %v576_v42  ;;  %v602_v49 = vadd.f32 %v601_v45, %v600_v43  ;;  %v579_v50 = vpop.f32.mrb[14].mxu0  ;;  %v603_v51 = vpop.f32.mrb[14].mxu1 }
 0x110   :  { %v580_v52 = vpop.f32.mrb[15].mxu0  ;;  %v604_v53 = vpop.f32.mrb[15].mxu1 }
 0x111   :  { %493 = vst [vmem:[%s877_s4 + $0x28] sm:$0xff] %v477_v46  ;;  %501 = vst [vmem:[%s877_s4 + $0x68] sm:$0xff] %v485_v47  ;;  %v439_v54 = vmul.f32 %v578_v48, %v786_v35  ;;  %v447_v55 = vmul.f32 %v602_v49, %v786_v35  ;;  %v581_v56 = vadd.f32 %v580_v52, %v579_v50 }
 0x112   :  { %v605_v57 = vadd.f32 %v604_v53, %v603_v51 }
 0x113   :  { %v462_v58 = vadd.f32 %v791_v41, %v439_v54  ;;  %v470_v59 = vadd.f32 %v791_v41, %v447_v55  ;;  %v440_v60 = vmul.f32 %v581_v56, %v786_v35 }
 0x114   :  { %v448_v61 = vmul.f32 %v605_v57, %v786_v35 }
 0x115   :  { %v478_v62 = vmax.f32 %v462_v58, 0.0  ;;  %v486_v63 = vmax.f32 %v470_v59, 0.0  ;;  %v463_v0 = vadd.f32 %v791_v41, %v440_v60 }
 0x116   :  { %v471_v1 = vadd.f32 %v791_v41, %v448_v61 }
 0x117   :  { %494 = vst [vmem:[%s877_s4 + $0x30] sm:$0xff] %v478_v62  ;;  %502 = vst [vmem:[%s877_s4 + $0x70] sm:$0xff] %v486_v63  ;;  %v479_v2 = vmax.f32 %v463_v0, 0.0 }
 0x118   :  { %v487_v3 = vmax.f32 %v471_v1, 0.0 }
 0x119   :  { %495 = vst [vmem:[%s877_s4 + $0x38] sm:$0xff] %v479_v2 }
 0x11a   :  { %503 = vst [vmem:[%s877_s4 + $0x78] sm:$0xff] %v487_v3 }

// kernel: _lambda_.26
= control target key start
LH: loop header
LB: loop body
LE: loop exit
PB: predicated region body
PF: predicated region fallthrough
CT: control target
= control target key end

     0   :  { %s761_s1 = inlined_call_operand.vmem [shape: bf16[128,128], index: 1, kind: input, shape index: {}]   ;;  %s762_s0 = inlined_call_operand.vmem [shape: bf16[128,128], index: 0, kind: input, shape index: {}]   ;;  %s763_s2 = inlined_call_operand.vmem [shape: f32[1,128], index: 2, kind: input, shape index: {}]   ;;  %s764_s3 = inlined_call_operand.vmem [shape: f32[1,128], index: 3, kind: input, shape index: {}]   ;;  %s765_s4 = inlined_call_operand.vmem [shape: f32[128,128], index: 4, kind: input, shape index: {}]   ;;  %s766_s5 = inlined_call_operand.vmem [shape: f32[128,128], index: 5, kind: output, shape index: {}]  }
   0x1   :  { %v529_v0 = vld [vmem:[%s761_s1] sm:$0xff]   ;;  %v530_v1 = vld [vmem:[%s761_s1 + $0x8] sm:$0xff]   ;;  %v531_v2 = vld [vmem:[%s761_s1 + $0x10] sm:$0xff]  }
   0x2   :  { %481 = vmatprep.subr.bf16.mxu0 %v529_v0  ;;  %513 = vmatprep.subr.bf16.mxu1 %v529_v0  ;;  %v532_v3 = vld [vmem:[%s761_s1 + $0x18] sm:$0xff]   ;;  %v537_v4 = vld [vmem:[%s762_s0] sm:$0xff]   ;;  %v534_v7 = vld [vmem:[%s761_s1 + $0x28] sm:$0xff]  }
   0x3   :  { %482 = vmatpush3.bf16.msra.mxu0 %v529_v0  ;;  %521 = vmatpush3.bf16.msra.mxu1 %v529_v0  ;;  %v538_v5 = vld [vmem:[%s762_s0 + $0x20] sm:$0xff]   ;;  %v535_v8 = vld [vmem:[%s761_s1 + $0x30] sm:$0xff]   ;;  %v536_v9 = vld [vmem:[%s761_s1 + $0x38] sm:$0xff]  }
   0x4   :  { %483 = vmatprep.subr.bf16.mxu0 %v530_v1  ;;  %514 = vmatprep.subr.bf16.mxu1 %v530_v1  ;;  %v533_v6 = vld [vmem:[%s761_s1 + $0x20] sm:$0xff]   ;;  %v539_v10 = vld [vmem:[%s762_s0 + $0x8] sm:$0xff]   ;;  %v541_v12 = vld [vmem:[%s762_s0 + $0x10] sm:$0xff]  }
   0x5   :  { %497 = vmatprep.mubr.bf16.mxu0 %v537_v4  ;;  %505 = vmatprep.mubr.bf16.mxu1 %v538_v5  ;;  %v540_v11 = vld [vmem:[%s762_s0 + $0x28] sm:$0xff]   ;;  %v542_v13 = vld [vmem:[%s762_s0 + $0x30] sm:$0xff]   ;;  %v543_v14 = vld [vmem:[%s762_s0 + $0x18] sm:$0xff]  }
   0x6   :  { %v544_v15 = vld [vmem:[%s762_s0 + $0x38] sm:$0xff]   ;;  %v626_v16 = vld [vmem:[%s763_s2] ss:$0 sm:$0xff]  ;;  %v381_v24 = vld [vmem:[%s765_s4 + $0x10] sm:$0xff] }
   0x7   :  { %484 = vmatpush3.bf16.msra.mxu0 %v530_v1  ;;  %522 = vmatpush3.bf16.msra.mxu1 %v530_v1  ;;  %v631_v18 = vld [vmem:[%s764_s3] ss:$0 sm:$0xff]  ;;  %v389_v25 = vld [vmem:[%s765_s4 + $0x50] sm:$0xff]  ;;  %v382_v40 = vld [vmem:[%s765_s4 + $0x18] sm:$0xff] }
   0x8   :  { %485 = vmatprep.subr.bf16.mxu0 %v531_v2  ;;  %515 = vmatprep.subr.bf16.mxu1 %v531_v2  ;;  %v379_v32 = vld [vmem:[%s765_s4] sm:$0xff]  ;;  %v390_v41 = vld [vmem:[%s765_s4 + $0x58] sm:$0xff]  ;;  %v380_v48 = vld [vmem:[%s765_s4 + $0x8] sm:$0xff] }
   0x9   :  { %v387_v33 = vld [vmem:[%s765_s4 + $0x40] sm:$0xff]  ;;  %v388_v49 = vld [vmem:[%s765_s4 + $0x48] sm:$0xff] }
   0xb   :  { %486 = vmatpush3.bf16.msra.mxu0 %v531_v2  ;;  %523 = vmatpush3.bf16.msra.mxu1 %v531_v2 }
   0xc   :  { %487 = vmatprep.subr.bf16.mxu0 %v532_v3  ;;  %516 = vmatprep.subr.bf16.mxu1 %v532_v3 }
   0xf   :  { %488 = vmatpush3.bf16.msra.mxu0 %v532_v3  ;;  %524 = vmatpush3.bf16.msra.mxu1 %v532_v3 }
  0x10   :  { %489 = vmatprep.subr.bf16.mxu0 %v533_v6  ;;  %517 = vmatprep.subr.bf16.mxu1 %v533_v6 }
  0x13   :  { %490 = vmatpush3.bf16.msra.mxu0 %v533_v6  ;;  %525 = vmatpush3.bf16.msra.mxu1 %v533_v6 }
  0x14   :  { %491 = vmatprep.subr.bf16.mxu0 %v534_v7  ;;  %518 = vmatprep.subr.bf16.mxu1 %v534_v7 }
  0x17   :  { %492 = vmatpush3.bf16.msra.mxu0 %v534_v7  ;;  %526 = vmatpush3.bf16.msra.mxu1 %v534_v7 }
  0x18   :  { %493 = vmatprep.subr.bf16.mxu0 %v535_v8  ;;  %519 = vmatprep.subr.bf16.mxu1 %v535_v8 }
  0x1b   :  { %494 = vmatpush3.bf16.msra.mxu0 %v535_v8  ;;  %527 = vmatpush3.bf16.msra.mxu1 %v535_v8  ;;  %v385_v8 = vld [vmem:[%s765_s4 + $0x30] sm:$0xff] }
  0x1c   :  { %495 = vmatprep.subr.bf16.mxu0 %v536_v9  ;;  %520 = vmatprep.subr.bf16.mxu1 %v536_v9 }
  0x1f   :  { %496 = vmatpush3.bf16.msra.mxu0 %v536_v9  ;;  %528 = vmatpush3.bf16.msra.mxu1 %v536_v9  ;;  %v393_v9 = vld [vmem:[%s765_s4 + $0x70] sm:$0xff] }
  0x22   :  { %498 = vmatmul.mubr.bf16.vlgmr.msra.gmra.mrb[0].mxu0 %v539_v10  ;;  %506 = vmatmul.mubr.bf16.vlgmr.msra.gmra.mrb[0].mxu1 %v540_v11 }
  0x23   :  { %501 = vmatprep.mubr.bf16.mxu0 %v541_v12  ;;  %509 = vmatprep.mubr.bf16.mxu1 %v542_v13 }
  0x2a   :  { %502 = vmatmul.mubr.bf16.gmra.mrb[4].mxu0 %v543_v14  ;;  %510 = vmatmul.mubr.bf16.gmra.mrb[4].mxu1 %v544_v15 }
  0xf5   :  { %v499_v17 = vpop.f32.mrb[0].mxu0  ;;  %v507_v19 = vpop.f32.mrb[0].mxu1 }
  0xf6   :  { %v342_v20 = vmul.f32 %v499_v17, %v626_v16  ;;  %v350_v21 = vmul.f32 %v507_v19, %v626_v16  ;;  %v219_v22 = vpop.f32.mrb[1].mxu0  ;;  %v251_v23 = vpop.f32.mrb[1].mxu1  ;;  %v383_v17 = vld [vmem:[%s765_s4 + $0x20] sm:$0xff] }
  0xf7   :  { %v340_v26 = vmul.f32 %v626_v16, %v219_v22  ;;  %v348_v27 = vmul.f32 %v626_v16, %v251_v23  ;;  %v500_v28 = vpop.f32.mrb[2].mxu0  ;;  %v508_v29 = vpop.f32.mrb[2].mxu1  ;;  %v391_v19 = vld [vmem:[%s765_s4 + $0x60] sm:$0xff] }
  0xf8   :  { %v365_v30 = vadd.f32 %v631_v18, %v342_v20  ;;  %v373_v31 = vadd.f32 %v631_v18, %v350_v21  ;;  %v343_v34 = vmul.f32 %v500_v28, %v626_v16  ;;  %v351_v35 = vmul.f32 %v508_v29, %v626_v16  ;;  %v222_v36 = vpop.f32.mrb[3].mxu0  ;;  %v254_v37 = vpop.f32.mrb[3].mxu1 }
  0xf9   :  { %v363_v38 = vadd.f32 %v631_v18, %v340_v26  ;;  %v371_v39 = vadd.f32 %v631_v18, %v348_v27  ;;  %v341_v42 = vmul.f32 %v626_v16, %v222_v36  ;;  %v349_v43 = vmul.f32 %v626_v16, %v254_v37  ;;  %v386_v26 = vld [vmem:[%s765_s4 + $0x38] sm:$0xff] }
  0xfa   :  { %v397_v44 = vadd.f32 %v381_v24, %v365_v30  ;;  %v405_v45 = vadd.f32 %v389_v25, %v373_v31  ;;  %v366_v46 = vadd.f32 %v631_v18, %v343_v34  ;;  %v374_v47 = vadd.f32 %v631_v18, %v351_v35  ;;  %v394_v27 = vld [vmem:[%s765_s4 + $0x78] sm:$0xff]  ;;  %v384_v34 = vld [vmem:[%s765_s4 + $0x28] sm:$0xff] }
  0xfb   :  { %v395_v50 = vadd.f32 %v379_v32, %v363_v38  ;;  %v403_v51 = vadd.f32 %v387_v33, %v371_v39  ;;  %v364_v52 = vadd.f32 %v631_v18, %v341_v42  ;;  %v372_v53 = vadd.f32 %v631_v18, %v349_v43  ;;  %v392_v35 = vld [vmem:[%s765_s4 + $0x68] sm:$0xff] }
  0xfc   :  { %v413_v54 = vmax.f32 %v397_v44, 0.0  ;;  %v421_v55 = vmax.f32 %v405_v45, 0.0  ;;  %v398_v56 = vadd.f32 %v382_v40, %v366_v46  ;;  %v406_v57 = vadd.f32 %v390_v41, %v374_v47 }
  0xfd   :  { %v411_v58 = vmax.f32 %v395_v50, 0.0  ;;  %v419_v59 = vmax.f32 %v403_v51, 0.0  ;;  %v396_v60 = vadd.f32 %v380_v48, %v364_v52  ;;  %v404_v61 = vadd.f32 %v388_v49, %v372_v53  ;;  %v503_v62 = vpop.f32.mrb[4].mxu0  ;;  %v511_v63 = vpop.f32.mrb[4].mxu1 }
  0xfe   :  { %429 = vst [vmem:[%s766_s5 + $0x10] sm:$0xff] %v413_v54  ;;  %437 = vst [vmem:[%s766_s5 + $0x50] sm:$0xff] %v421_v55  ;;  %v414_v0 = vmax.f32 %v398_v56, 0.0  ;;  %v422_v1 = vmax.f32 %v406_v57, 0.0  ;;  %v346_v2 = vmul.f32 %v503_v62, %v626_v16  ;;  %v354_v3 = vmul.f32 %v511_v63, %v626_v16  ;;  %v235_v4 = vpop.f32.mrb[5].mxu0  ;;  %v267_v5 = vpop.f32.mrb[5].mxu1 }
  0xff   :  { %427 = vst [vmem:[%s766_s5] sm:$0xff] %v411_v58  ;;  %435 = vst [vmem:[%s766_s5 + $0x40] sm:$0xff] %v419_v59  ;;  %v412_v6 = vmax.f32 %v396_v60, 0.0  ;;  %v420_v7 = vmax.f32 %v404_v61, 0.0  ;;  %v344_v10 = vmul.f32 %v626_v16, %v235_v4  ;;  %v352_v11 = vmul.f32 %v626_v16, %v267_v5  ;;  %v504_v12 = vpop.f32.mrb[6].mxu0  ;;  %v512_v13 = vpop.f32.mrb[6].mxu1 }
 0x100   :  { %430 = vst [vmem:[%s766_s5 + $0x18] sm:$0xff] %v414_v0  ;;  %438 = vst [vmem:[%s766_s5 + $0x58] sm:$0xff] %v422_v1  ;;  %v369_v14 = vadd.f32 %v631_v18, %v346_v2  ;;  %v377_v15 = vadd.f32 %v631_v18, %v354_v3  ;;  %v347_v20 = vmul.f32 %v504_v12, %v626_v16  ;;  %v238_v22 = vpop.f32.mrb[7].mxu0  ;;  %v270_v23 = vpop.f32.mrb[7].mxu1 }
 0x101   :  { %v355_v21 = vmul.f32 %v512_v13, %v626_v16  ;;  %428 = vst [vmem:[%s766_s5 + $0x8] sm:$0xff] %v412_v6  ;;  %436 = vst [vmem:[%s766_s5 + $0x48] sm:$0xff] %v420_v7  ;;  %v367_v24 = vadd.f32 %v631_v18, %v344_v10  ;;  %v375_v25 = vadd.f32 %v631_v18, %v352_v11 }
 0x102   :  { %v345_v28 = vmul.f32 %v626_v16, %v238_v22  ;;  %v353_v29 = vmul.f32 %v626_v16, %v270_v23  ;;  %v401_v30 = vadd.f32 %v385_v8, %v369_v14  ;;  %v409_v31 = vadd.f32 %v393_v9, %v377_v15 }
 0x103   :  { %v370_v32 = vadd.f32 %v631_v18, %v347_v20  ;;  %v378_v33 = vadd.f32 %v631_v18, %v355_v21  ;;  %v399_v36 = vadd.f32 %v383_v17, %v367_v24  ;;  %v407_v37 = vadd.f32 %v391_v19, %v375_v25 }
 0x104   :  { %v368_v38 = vadd.f32 %v631_v18, %v345_v28  ;;  %v376_v16 = vadd.f32 %v631_v18, %v353_v29  ;;  %v417_v39 = vmax.f32 %v401_v30, 0.0  ;;  %v425_v40 = vmax.f32 %v409_v31, 0.0 }
 0x105   :  { %v402_v41 = vadd.f32 %v386_v26, %v370_v32  ;;  %v410_v42 = vadd.f32 %v394_v27, %v378_v33  ;;  %v415_v43 = vmax.f32 %v399_v36, 0.0  ;;  %v423_v44 = vmax.f32 %v407_v37, 0.0 }
 0x106   :  { %v400_v45 = vadd.f32 %v384_v34, %v368_v38  ;;  %v408_v46 = vadd.f32 %v392_v35, %v376_v16  ;;  %433 = vst [vmem:[%s766_s5 + $0x30] sm:$0xff] %v417_v39  ;;  %441 = vst [vmem:[%s766_s5 + $0x70] sm:$0xff] %v425_v40 }
 0x107   :  { %v418_v47 = vmax.f32 %v402_v41, 0.0  ;;  %v426_v48 = vmax.f32 %v410_v42, 0.0  ;;  %431 = vst [vmem:[%s766_s5 + $0x20] sm:$0xff] %v415_v43  ;;  %439 = vst [vmem:[%s766_s5 + $0x60] sm:$0xff] %v423_v44 }
 0x108   :  { %v416_v18 = vmax.f32 %v400_v45, 0.0  ;;  %v424_v49 = vmax.f32 %v408_v46, 0.0 }
 0x109   :  { %434 = vst [vmem:[%s766_s5 + $0x38] sm:$0xff] %v418_v47  ;;  %442 = vst [vmem:[%s766_s5 + $0x78] sm:$0xff] %v426_v48 }
 0x10a   :  { %432 = vst [vmem:[%s766_s5 + $0x28] sm:$0xff] %v416_v18  ;;  %440 = vst [vmem:[%s766_s5 + $0x68] sm:$0xff] %v424_v49 }

// kernel: _lambda_.31
= control target key start
LH: loop header
LB: loop body
LE: loop exit
PB: predicated region body
PF: predicated region fallthrough
CT: control target
= control target key end

     0   :  { %s664_s1 = inlined_call_operand.vmem [shape: bf16[384,128], index: 1, kind: input, shape index: {}]   ;;  %s665_s0 = inlined_call_operand.vmem [shape: bf16[32,384], index: 0, kind: input, shape index: {}]   ;;  %s666_s2 = inlined_call_operand.vmem [shape: f32[1,128], index: 2, kind: input, shape index: {}]   ;;  %s667_s3 = inlined_call_operand.vmem [shape: f32[1,128], index: 3, kind: input, shape index: {}]   ;;  %s668_s4 = inlined_call_operand.vmem [shape: f32[32,128], index: 4, kind: output, shape index: {}]  }
   0x1   :  { %v499_v0 = vld [vmem:[%s664_s1 + $0x40] sm:$0xff]   ;;  %v502_v3 = vld [vmem:[%s664_s1 + $0x48] sm:$0xff]   ;;  %v505_v6 = vld [vmem:[%s664_s1 + $0x50] sm:$0xff]  }
   0x2   :  { %v500_v1 = vld [vmem:[%s664_s1] sm:$0xff]   ;;  %441 = vmatprep.subr.bf16.mxu0 %v499_v0  ;;  %v503_v4 = vld [vmem:[%s664_s1 + $0x8] sm:$0xff]   ;;  %v506_v7 = vld [vmem:[%s664_s1 + $0x10] sm:$0xff]  }
   0x3   :  { %v501_v2 = vld [vmem:[%s664_s1 + $0x80] sm:$0xff]   ;;  %442 = vmatpush3.bf16.msra.mxu0 %v500_v1  ;;  %v504_v5 = vld [vmem:[%s664_s1 + $0x88] sm:$0xff]   ;;  %v507_v8 = vld [vmem:[%s664_s1 + $0x90] sm:$0xff]  }
   0x4   :  { %479 = vmatprep.subr.bf16.mxu1 %v501_v2  ;;  %443 = vmatprep.subr.bf16.mxu0 %v502_v3  ;;  %v508_v9 = vld [vmem:[%s664_s1 + $0x58] sm:$0xff]   ;;  %v511_v12 = vld [vmem:[%s664_s1 + $0x60] sm:$0xff]   ;;  %v514_v15 = vld [vmem:[%s664_s1 + $0x68] sm:$0xff]  }
   0x5   :  { %480 = vmatpush3.bf16.msra.mxu1 %v501_v2  ;;  %v509_v10 = vld [vmem:[%s664_s1 + $0x18] sm:$0xff]   ;;  %v513_v13 = vld [vmem:[%s664_s1 + $0xa0] sm:$0xff]   ;;  %v516_v16 = vld [vmem:[%s664_s1 + $0xa8] sm:$0xff]  }
   0x6   :  { %481 = vmatprep.subr.bf16.mxu1 %v504_v5  ;;  %v510_v11 = vld [vmem:[%s664_s1 + $0x98] sm:$0xff]   ;;  %v512_v14 = vld [vmem:[%s664_s1 + $0x20] sm:$0xff]   ;;  %v515_v17 = vld [vmem:[%s664_s1 + $0x28] sm:$0xff]  }
   0x7   :  { %444 = vmatpush3.bf16.msra.mxu0 %v503_v4  ;;  %v517_v18 = vld [vmem:[%s664_s1 + $0x70] sm:$0xff]   ;;  %v520_v21 = vld [vmem:[%s664_s1 + $0x78] sm:$0xff]   ;;  %v523_v26 = vld [vmem:[%s665_s0] ss:$12 sps:$4 sm:$0xff]  }
   0x8   :  { %445 = vmatprep.subr.bf16.mxu0 %v505_v6  ;;  %v518_v19 = vld [vmem:[%s664_s1 + $0x30] sm:$0xff]   ;;  %v522_v22 = vld [vmem:[%s664_s1 + $0xb8] sm:$0xff]   ;;  %v527_v28 = vld [vmem:[%s665_s0 + $0x20] ss:$12 sps:$4 sm:$0xff]  }
   0x9   :  { %482 = vmatpush3.bf16.msra.mxu1 %v504_v5  ;;  %v519_v20 = vld [vmem:[%s664_s1 + $0xb0] sm:$0xff]   ;;  %v521_v25 = vld [vmem:[%s664_s1 + $0x38] sm:$0xff]   ;;  %v439_v37 = vld [vmem:[%s666_s2] ss:$0 sm:$0xff] }
   0xa   :  { %483 = vmatprep.subr.bf16.mxu1 %v507_v8  ;;  %v525_v23 = vld [vmem:[%s665_s0 + $0x4] ss:$12 sps:$4 sm:$0xff]   ;;  %v526_v24 = vld [vmem:[%s665_s0 + $0x8] ss:$12 sps:$4 sm:$0xff]   ;;  %v440_v41 = vld [vmem:[%s667_s3] ss:$0 sm:$0xff] }
   0xb   :  { %446 = vmatpush3.bf16.msra.mxu0 %v506_v7  ;;  %294 = vmatprep.mubr.bf16.mxu0 %v525_v23  ;;  %v528_v27 = vld [vmem:[%s665_s0 + $0x1c] ss:$12 sps:$4 sm:$0xff]   ;;  %v530_v29 = vld [vmem:[%s665_s0 + $0x18] ss:$12 sps:$4 sm:$0xff]  }
   0xc   :  { %447 = vmatprep.subr.bf16.mxu0 %v508_v9  ;;  %495 = vmatprep.mubr.bf16.mxu1 %v526_v24 }
   0xd   :  { %484 = vmatpush3.bf16.msra.mxu1 %v507_v8 }
   0xe   :  { %485 = vmatprep.subr.bf16.mxu1 %v510_v11 }
   0xf   :  { %448 = vmatpush3.bf16.msra.mxu0 %v509_v10 }
  0x10   :  { %449 = vmatprep.subr.bf16.mxu0 %v511_v12 }
  0x11   :  { %486 = vmatpush3.bf16.msra.mxu1 %v510_v11 }
  0x12   :  { %487 = vmatprep.subr.bf16.mxu1 %v513_v13 }
  0x13   :  { %450 = vmatpush3.bf16.msra.mxu0 %v512_v14 }
  0x14   :  { %451 = vmatprep.subr.bf16.mxu0 %v514_v15 }
  0x15   :  { %488 = vmatpush3.bf16.msra.mxu1 %v513_v13 }
  0x16   :  { %489 = vmatprep.subr.bf16.mxu1 %v516_v16 }
  0x17   :  { %452 = vmatpush3.bf16.msra.mxu0 %v515_v17 }
  0x18   :  { %453 = vmatprep.subr.bf16.mxu0 %v517_v18 }
  0x19   :  { %490 = vmatpush3.bf16.msra.mxu1 %v516_v16 }
  0x1a   :  { %491 = vmatprep.subr.bf16.mxu1 %v519_v20 }
  0x1b   :  { %454 = vmatpush3.bf16.msra.mxu0 %v518_v19 }
  0x1c   :  { %455 = vmatprep.subr.bf16.mxu0 %v520_v21 }
  0x1d   :  { %492 = vmatpush3.bf16.msra.mxu1 %v519_v20 }
  0x1e   :  { %493 = vmatprep.subr.bf16.mxu1 %v522_v22 }
  0x1f   :  { %456 = vmatpush3.bf16.msra.mxu0 %v521_v25 }
  0x21   :  { %494 = vmatpush3.bf16.msra.mxu1 %v522_v22 }
  0x22   :  { %295 = vmatmul.mubr.bf16.vlgmr.msra.gmra.mrb[0].mxu0 %v523_v26 }
  0x23   :  { %302 = vmatprep.mubr.bf16.mxu0 %v528_v27 }
  0x24   :  { %496 = vmatmul.mubr.bf16.vlgmr.msra.gmra.mrb[0].mxu1 %v527_v28 }
  0x2a   :  { %303 = vmatmul.mubr.bf16.gmra.mrb[4].mxu0 %v530_v29 }
  0xf5   :  { %v457_v30 = vpop.f32.mrb[0].mxu0 }
  0xf6   :  { %v458_v31 = vpop.f32.mrb[1].mxu0 }
  0xf7   :  { %v459_v32 = vadd.f32 %v458_v31, %v457_v30  ;;  %v460_v33 = vpop.f32.mrb[2].mxu0  ;;  %v497_v34 = vpop.f32.mrb[0].mxu1 }
  0xf8   :  { %v461_v35 = vpop.f32.mrb[3].mxu0  ;;  %v345_v36 = vpop.f32.mrb[1].mxu1 }
  0xf9   :  { %v462_v38 = vadd.f32 %v461_v35, %v460_v33  ;;  %v346_v39 = vadd.f32 %v459_v32, %v345_v36  ;;  %v498_v40 = vpop.f32.mrb[2].mxu1 }
  0xfa   :  { %v348_v42 = vpop.f32.mrb[3].mxu1 }
  0xfb   :  { %v382_v43 = vmul.f32 %v439_v37, %v346_v39  ;;  %v349_v44 = vadd.f32 %v462_v38, %v348_v42 }
  0xfd   :  { %v393_v45 = vadd.f32 %v440_v41, %v382_v43  ;;  %v383_v46 = vmul.f32 %v439_v37, %v349_v44  ;;  %v463_v47 = vpop.f32.mrb[4].mxu0 }
  0xfe   :  { %v464_v48 = vpop.f32.mrb[5].mxu0 }
  0xff   :  { %v397_v49 = vmax.f32 %v393_v45, 0.0  ;;  %v394_v50 = vadd.f32 %v440_v41, %v383_v46  ;;  %v465_v51 = vadd.f32 %v464_v48, %v463_v47  ;;  %v466_v52 = vpop.f32.mrb[6].mxu0 }
 0x100   :  { %v467_v53 = vpop.f32.mrb[7].mxu0 }
 0x101   :  { %401 = vst [vmem:[%s668_s4] sm:$0xff] %v397_v49  ;;  %v398_v54 = vmax.f32 %v394_v50, 0.0  ;;  %v354_v55 = vadd.f32 %v497_v34, %v465_v51  ;;  %v468_v56 = vadd.f32 %v467_v53, %v466_v52 }
 0x103   :  { %402 = vst [vmem:[%s668_s4 + $0x8] sm:$0xff] %v398_v54  ;;  %v384_v57 = vmul.f32 %v439_v37, %v354_v55  ;;  %v357_v58 = vadd.f32 %v498_v40, %v468_v56 }
 0x105   :  { %v395_v59 = vadd.f32 %v440_v41, %v384_v57  ;;  %v385_v60 = vmul.f32 %v439_v37, %v357_v58 }
 0x107   :  { %v399_v61 = vmax.f32 %v395_v59, 0.0  ;;  %v396_v62 = vadd.f32 %v440_v41, %v385_v60 }
 0x109   :  { %403 = vst [vmem:[%s668_s4 + $0x10] sm:$0xff] %v399_v61  ;;  %v400_v63 = vmax.f32 %v396_v62, 0.0 }
 0x10b   :  { %404 = vst [vmem:[%s668_s4 + $0x18] sm:$0xff] %v400_v63 }

// kernel: _lambda_.33
= control target key start
LH: loop header
LB: loop body
LE: loop exit
PB: predicated region body
PF: predicated region fallthrough
CT: control target
= control target key end

     0   :  { %s361_s1 = inlined_call_operand.vmem [shape: bf16[128,128], index: 1, kind: input, shape index: {}]   ;;  %s362_s0 = inlined_call_operand.vmem [shape: bf16[32,128], index: 0, kind: input, shape index: {}]   ;;  %s363_s2 = inlined_call_operand.vmem [shape: f32[1,128], index: 2, kind: input, shape index: {}]   ;;  %s364_s3 = inlined_call_operand.vmem [shape: f32[1,128], index: 3, kind: input, shape index: {}]   ;;  %s365_s4 = inlined_call_operand.vmem [shape: f32[32,128], index: 4, kind: input, shape index: {}]   ;;  %s366_s5 = inlined_call_operand.vmem [shape: f32[32,128], index: 5, kind: output, shape index: {}]  }
   0x1   :  { %v261_v0 = vld [vmem:[%s361_s1] sm:$0xff]   ;;  %v262_v1 = vld [vmem:[%s361_s1 + $0x8] sm:$0xff]   ;;  %v263_v2 = vld [vmem:[%s361_s1 + $0x10] sm:$0xff]  }
   0x2   :  { %241 = vmatprep.subr.bf16.mxu0 %v261_v0  ;;  %v264_v3 = vld [vmem:[%s361_s1 + $0x18] sm:$0xff]   ;;  %v269_v4 = vld [vmem:[%s362_s0] sm:$0xff]   ;;  %v266_v6 = vld [vmem:[%s361_s1 + $0x28] sm:$0xff]  }
   0x3   :  { %242 = vmatpush3.bf16.msra.mxu0 %v261_v0  ;;  %257 = vmatprep.mubr.bf16.mxu0 %v269_v4  ;;  %v265_v5 = vld [vmem:[%s361_s1 + $0x20] sm:$0xff]   ;;  %v267_v7 = vld [vmem:[%s361_s1 + $0x30] sm:$0xff]   ;;  %v268_v8 = vld [vmem:[%s361_s1 + $0x38] sm:$0xff]  }
   0x4   :  { %243 = vmatprep.subr.bf16.mxu0 %v262_v1  ;;  %v270_v9 = vld [vmem:[%s362_s0 + $0x8] sm:$0xff]   ;;  %v229_v10 = vld [vmem:[%s363_s2] ss:$0 sm:$0xff]  ;;  %v201_v15 = vld [vmem:[%s365_s4 + $0x10] sm:$0xff] }
   0x5   :  { %v230_v12 = vld [vmem:[%s364_s3] ss:$0 sm:$0xff]  ;;  %v202_v23 = vld [vmem:[%s365_s4 + $0x18] sm:$0xff]  ;;  %v200_v27 = vld [vmem:[%s365_s4 + $0x8] sm:$0xff] }
   0x6   :  { %v199_v19 = vld [vmem:[%s365_s4] sm:$0xff] }
   0x7   :  { %244 = vmatpush3.bf16.msra.mxu0 %v262_v1 }
   0x8   :  { %245 = vmatprep.subr.bf16.mxu0 %v263_v2 }
   0xb   :  { %246 = vmatpush3.bf16.msra.mxu0 %v263_v2 }
   0xc   :  { %247 = vmatprep.subr.bf16.mxu0 %v264_v3 }
   0xf   :  { %248 = vmatpush3.bf16.msra.mxu0 %v264_v3 }
  0x10   :  { %249 = vmatprep.subr.bf16.mxu0 %v265_v5 }
  0x13   :  { %250 = vmatpush3.bf16.msra.mxu0 %v265_v5 }
  0x14   :  { %251 = vmatprep.subr.bf16.mxu0 %v266_v6 }
  0x17   :  { %252 = vmatpush3.bf16.msra.mxu0 %v266_v6 }
  0x18   :  { %253 = vmatprep.subr.bf16.mxu0 %v267_v7 }
  0x1b   :  { %254 = vmatpush3.bf16.msra.mxu0 %v267_v7 }
  0x1c   :  { %255 = vmatprep.subr.bf16.mxu0 %v268_v8 }
  0x1f   :  { %256 = vmatpush3.bf16.msra.mxu0 %v268_v8 }
  0x22   :  { %258 = vmatmul.mubr.bf16.vlgmr.msra.gmra.mrb[0].mxu0 %v270_v9 }
  0xf5   :  { %v259_v11 = vpop.f32.mrb[0].mxu0 }
  0xf6   :  { %v186_v13 = vmul.f32 %v259_v11, %v229_v10  ;;  %v147_v14 = vpop.f32.mrb[1].mxu0 }
  0xf7   :  { %v184_v16 = vmul.f32 %v229_v10, %v147_v14  ;;  %v260_v17 = vpop.f32.mrb[2].mxu0 }
  0xf8   :  { %v197_v18 = vadd.f32 %v230_v12, %v186_v13  ;;  %v187_v20 = vmul.f32 %v260_v17, %v229_v10  ;;  %v150_v21 = vpop.f32.mrb[3].mxu0 }
  0xf9   :  { %v195_v22 = vadd.f32 %v230_v12, %v184_v16  ;;  %v185_v24 = vmul.f32 %v229_v10, %v150_v21 }
  0xfa   :  { %v205_v25 = vadd.f32 %v201_v15, %v197_v18  ;;  %v198_v26 = vadd.f32 %v230_v12, %v187_v20 }
  0xfb   :  { %v203_v28 = vadd.f32 %v199_v19, %v195_v22  ;;  %v196_v29 = vadd.f32 %v230_v12, %v185_v24 }
  0xfc   :  { %v209_v30 = vmax.f32 %v205_v25, 0.0  ;;  %v206_v31 = vadd.f32 %v202_v23, %v198_v26 }
  0xfd   :  { %v207_v32 = vmax.f32 %v203_v28, 0.0  ;;  %v204_v33 = vadd.f32 %v200_v27, %v196_v29 }
  0xfe   :  { %213 = vst [vmem:[%s366_s5 + $0x10] sm:$0xff] %v209_v30  ;;  %v210_v34 = vmax.f32 %v206_v31, 0.0 }
  0xff   :  { %211 = vst [vmem:[%s366_s5] sm:$0xff] %v207_v32  ;;  %v208_v35 = vmax.f32 %v204_v33, 0.0 }
 0x100   :  { %214 = vst [vmem:[%s366_s5 + $0x18] sm:$0xff] %v210_v34 }
 0x101   :  { %212 = vst [vmem:[%s366_s5 + $0x8] sm:$0xff] %v208_v35 }

// kernel: _lambda_.32
= control target key start
LH: loop header
LB: loop body
LE: loop exit
PB: predicated region body
PF: predicated region fallthrough
CT: control target
= control target key end

     0   :  { %s329_s1 = inlined_call_operand.vmem [shape: bf16[128,128], index: 1, kind: input, shape index: {}]   ;;  %s330_s0 = inlined_call_operand.vmem [shape: bf16[32,128], index: 0, kind: input, shape index: {}]   ;;  %s331_s2 = inlined_call_operand.vmem [shape: f32[1,128], index: 2, kind: input, shape index: {}]   ;;  %s332_s3 = inlined_call_operand.vmem [shape: f32[1,128], index: 3, kind: input, shape index: {}]   ;;  %s333_s4 = inlined_call_operand.vmem [shape: f32[32,128], index: 4, kind: output, shape index: {}]  }
   0x1   :  { %v246_v0 = vld [vmem:[%s329_s1] sm:$0xff]   ;;  %v247_v1 = vld [vmem:[%s329_s1 + $0x8] sm:$0xff]   ;;  %v248_v2 = vld [vmem:[%s329_s1 + $0x10] sm:$0xff]  }
   0x2   :  { %226 = vmatprep.subr.bf16.mxu0 %v246_v0  ;;  %v249_v3 = vld [vmem:[%s329_s1 + $0x18] sm:$0xff]   ;;  %v254_v4 = vld [vmem:[%s330_s0] sm:$0xff]   ;;  %v251_v6 = vld [vmem:[%s329_s1 + $0x28] sm:$0xff]  }
   0x3   :  { %227 = vmatpush3.bf16.msra.mxu0 %v246_v0  ;;  %242 = vmatprep.mubr.bf16.mxu0 %v254_v4  ;;  %v250_v5 = vld [vmem:[%s329_s1 + $0x20] sm:$0xff]   ;;  %v252_v7 = vld [vmem:[%s329_s1 + $0x30] sm:$0xff]   ;;  %v253_v8 = vld [vmem:[%s329_s1 + $0x38] sm:$0xff]  }
   0x4   :  { %228 = vmatprep.subr.bf16.mxu0 %v247_v1  ;;  %v255_v9 = vld [vmem:[%s330_s0 + $0x8] sm:$0xff]   ;;  %v214_v10 = vld [vmem:[%s331_s2] ss:$0 sm:$0xff] }
   0x5   :  { %v215_v12 = vld [vmem:[%s332_s3] ss:$0 sm:$0xff] }
   0x7   :  { %229 = vmatpush3.bf16.msra.mxu0 %v247_v1 }
   0x8   :  { %230 = vmatprep.subr.bf16.mxu0 %v248_v2 }
   0xb   :  { %231 = vmatpush3.bf16.msra.mxu0 %v248_v2 }
   0xc   :  { %232 = vmatprep.subr.bf16.mxu0 %v249_v3 }
   0xf   :  { %233 = vmatpush3.bf16.msra.mxu0 %v249_v3 }
  0x10   :  { %234 = vmatprep.subr.bf16.mxu0 %v250_v5 }
  0x13   :  { %235 = vmatpush3.bf16.msra.mxu0 %v250_v5 }
  0x14   :  { %236 = vmatprep.subr.bf16.mxu0 %v251_v6 }
  0x17   :  { %237 = vmatpush3.bf16.msra.mxu0 %v251_v6 }
  0x18   :  { %238 = vmatprep.subr.bf16.mxu0 %v252_v7 }
  0x1b   :  { %239 = vmatpush3.bf16.msra.mxu0 %v252_v7 }
  0x1c   :  { %240 = vmatprep.subr.bf16.mxu0 %v253_v8 }
  0x1f   :  { %241 = vmatpush3.bf16.msra.mxu0 %v253_v8 }
  0x22   :  { %243 = vmatmul.mubr.bf16.vlgmr.msra.gmra.mrb[0].mxu0 %v255_v9 }
  0xf5   :  { %v244_v11 = vpop.f32.mrb[0].mxu0 }
  0xf6   :  { %v183_v13 = vmul.f32 %v244_v11, %v214_v10  ;;  %v144_v14 = vpop.f32.mrb[1].mxu0 }
  0xf7   :  { %v181_v15 = vmul.f32 %v214_v10, %v144_v14  ;;  %v245_v16 = vpop.f32.mrb[2].mxu0 }
  0xf8   :  { %v194_v17 = vadd.f32 %v215_v12, %v183_v13  ;;  %v184_v18 = vmul.f32 %v245_v16, %v214_v10  ;;  %v147_v19 = vpop.f32.mrb[3].mxu0 }
  0xf9   :  { %v192_v20 = vadd.f32 %v215_v12, %v181_v15  ;;  %v182_v21 = vmul.f32 %v214_v10, %v147_v19 }
  0xfa   :  { %198 = vst [vmem:[%s333_s4 + $0x10] sm:$0xff] %v194_v17  ;;  %v195_v22 = vadd.f32 %v215_v12, %v184_v18 }
  0xfb   :  { %196 = vst [vmem:[%s333_s4] sm:$0xff] %v192_v20  ;;  %v193_v23 = vadd.f32 %v215_v12, %v182_v21 }
  0xfc   :  { %199 = vst [vmem:[%s333_s4 + $0x18] sm:$0xff] %v195_v22 }
  0xfd   :  { %197 = vst [vmem:[%s333_s4 + $0x8] sm:$0xff] %v193_v23 }

// kernel: _lambda_.34
= control target key start
LH: loop header
LB: loop body
LE: loop exit
PB: predicated region body
PF: predicated region fallthrough
CT: control target
= control target key end

     0   :  { %s333_s1 = inlined_call_operand.vmem [shape: bf16[128,128], index: 1, kind: input, shape index: {}]   ;;  %s334_s0 = inlined_call_operand.vmem [shape: bf16[32,128], index: 0, kind: input, shape index: {}]   ;;  %s335_s2 = inlined_call_operand.vmem [shape: f32[1,128], index: 2, kind: input, shape index: {}]   ;;  %s336_s3 = inlined_call_operand.vmem [shape: f32[1,128], index: 3, kind: input, shape index: {}]   ;;  %s337_s4 = inlined_call_operand.vmem [shape: f32[32,128], index: 4, kind: output, shape index: {}]  }
   0x1   :  { %v250_v0 = vld [vmem:[%s333_s1] sm:$0xff]   ;;  %v251_v1 = vld [vmem:[%s333_s1 + $0x8] sm:$0xff]   ;;  %v252_v2 = vld [vmem:[%s333_s1 + $0x10] sm:$0xff]  }
   0x2   :  { %230 = vmatprep.subr.bf16.mxu0 %v250_v0  ;;  %v253_v3 = vld [vmem:[%s333_s1 + $0x18] sm:$0xff]   ;;  %v258_v4 = vld [vmem:[%s334_s0] sm:$0xff]   ;;  %v255_v6 = vld [vmem:[%s333_s1 + $0x28] sm:$0xff]  }
   0x3   :  { %231 = vmatpush3.bf16.msra.mxu0 %v250_v0  ;;  %246 = vmatprep.mubr.bf16.mxu0 %v258_v4  ;;  %v254_v5 = vld [vmem:[%s333_s1 + $0x20] sm:$0xff]   ;;  %v256_v7 = vld [vmem:[%s333_s1 + $0x30] sm:$0xff]   ;;  %v257_v8 = vld [vmem:[%s333_s1 + $0x38] sm:$0xff]  }
   0x4   :  { %232 = vmatprep.subr.bf16.mxu0 %v251_v1  ;;  %v259_v9 = vld [vmem:[%s334_s0 + $0x8] sm:$0xff]   ;;  %v218_v10 = vld [vmem:[%s335_s2] ss:$0 sm:$0xff] }
   0x5   :  { %v219_v12 = vld [vmem:[%s336_s3] ss:$0 sm:$0xff] }
   0x7   :  { %233 = vmatpush3.bf16.msra.mxu0 %v251_v1 }
   0x8   :  { %234 = vmatprep.subr.bf16.mxu0 %v252_v2 }
   0xb   :  { %235 = vmatpush3.bf16.msra.mxu0 %v252_v2 }
   0xc   :  { %236 = vmatprep.subr.bf16.mxu0 %v253_v3 }
   0xf   :  { %237 = vmatpush3.bf16.msra.mxu0 %v253_v3 }
  0x10   :  { %238 = vmatprep.subr.bf16.mxu0 %v254_v5 }
  0x13   :  { %239 = vmatpush3.bf16.msra.mxu0 %v254_v5 }
  0x14   :  { %240 = vmatprep.subr.bf16.mxu0 %v255_v6 }
  0x17   :  { %241 = vmatpush3.bf16.msra.mxu0 %v255_v6 }
  0x18   :  { %242 = vmatprep.subr.bf16.mxu0 %v256_v7 }
  0x1b   :  { %243 = vmatpush3.bf16.msra.mxu0 %v256_v7 }
  0x1c   :  { %244 = vmatprep.subr.bf16.mxu0 %v257_v8 }
  0x1f   :  { %245 = vmatpush3.bf16.msra.mxu0 %v257_v8 }
  0x22   :  { %247 = vmatmul.mubr.bf16.vlgmr.msra.gmra.mrb[0].mxu0 %v259_v9 }
  0xf5   :  { %v248_v11 = vpop.f32.mrb[0].mxu0 }
  0xf6   :  { %v183_v13 = vmul.f32 %v248_v11, %v218_v10  ;;  %v144_v14 = vpop.f32.mrb[1].mxu0 }
  0xf7   :  { %v181_v15 = vmul.f32 %v218_v10, %v144_v14  ;;  %v249_v16 = vpop.f32.mrb[2].mxu0 }
  0xf8   :  { %v194_v17 = vadd.f32 %v219_v12, %v183_v13  ;;  %v184_v18 = vmul.f32 %v249_v16, %v218_v10  ;;  %v147_v19 = vpop.f32.mrb[3].mxu0 }
  0xf9   :  { %v192_v20 = vadd.f32 %v219_v12, %v181_v15  ;;  %v182_v21 = vmul.f32 %v218_v10, %v147_v19 }
  0xfa   :  { %v198_v22 = vmax.f32 %v194_v17, 0.0  ;;  %v195_v23 = vadd.f32 %v219_v12, %v184_v18 }
  0xfb   :  { %v196_v24 = vmax.f32 %v192_v20, 0.0  ;;  %v193_v25 = vadd.f32 %v219_v12, %v182_v21 }
  0xfc   :  { %202 = vst [vmem:[%s337_s4 + $0x10] sm:$0xff] %v198_v22  ;;  %v199_v26 = vmax.f32 %v195_v23, 0.0 }
  0xfd   :  { %200 = vst [vmem:[%s337_s4] sm:$0xff] %v196_v24  ;;  %v197_v27 = vmax.f32 %v193_v25, 0.0 }
  0xfe   :  { %203 = vst [vmem:[%s337_s4 + $0x18] sm:$0xff] %v199_v26 }
  0xff   :  { %201 = vst [vmem:[%s337_s4 + $0x8] sm:$0xff] %v197_v27 }

// kernel: _lambda_.35
= control target key start
LH: loop header
LB: loop body
LE: loop exit
PB: predicated region body
PF: predicated region fallthrough
CT: control target
= control target key end

     0   :  { %s593_s15 = smov 0   ;;  %s595_s16 = smov 0   ;;  %s645_s0 = inlined_call_operand.vmem [shape: bf16[8,640], index: 0, kind: input, shape index: {}]   ;;  %s646_s1 = inlined_call_operand.vmem [shape: bf16[640,128], index: 1, kind: input, shape index: {}]   ;;  %s647_s2 = inlined_call_operand.vmem [shape: f32[1,128], index: 2, kind: input, shape index: {}]   ;;  %s648_s3 = inlined_call_operand.vmem [shape: f32[1,128], index: 3, kind: input, shape index: {}]   ;;  %s649_s4 = inlined_call_operand.vmem [shape: f32[8,128], index: 4, kind: output, shape index: {}]  }
   0x1   :  { %s597_s17 = smov 0  }
   0x2 LB: > { %s23_s18 = sadd.s32 1, %s559_s16  ;;  %p458_p0 = scmp.ge.s32.totalorder %s563_s17, 1  ;;  %s563_s17 = sphi %s597_s17, %s14_s17   ;;  %s559_s16 = sphi %s595_s16, %s651_s16   ;;  %s555_s15 = sphi %s593_s15, %s650_s15  }
   0x3   : > { %p24_p1 = scmp.ge.s32.totalorder %s23_s18, 5  ;;  %p190_p2 = scmp.lt.s32.totalorder %s563_s17, 6 }
   0x5   : > { %s653_s18 = smov (%p24_p1, %s23_s18), 0  ;;  %p191_p3 = pnand %p458_p0, %p190_p2 }
   0x6   : > { %p225_p4 = scmp.lt.s32.totalorder (!%p191_p3), %s555_s15, 4  ;;  %s460_s19 = sshll.u32 (!%p191_p3), %s555_s15, 4 }
   0x7   : > { %194 = sbr.rel (%p191_p3) target bundleno = 284 (0x11c), region = 36  ;;  %p232_p5 = scmp.lt.s32.totalorder (!%p191_p3), %s460_s19, 79 }
   0x8   : > { %p462_p6 = scmp.ne.s32.totalorder (!%p191_p3), %s555_s15, 0 }
   0xe   : > { %s226_s20 = scalar_select %p225_p4, %s555_s15, 4 }
   0xf   : > { %s655_s19 = smov (!%p232_p5, %s460_s19), 79  ;;  %245 = sbr.rel (%p462_p6) target bundleno = 22 (0x16), region = 40 }
  0x10   : > { %s459_s21 = sshll.u32 %s226_s20, 2  ;;  %s461_s25 = sshll.u32 %s655_s19, 2  ;;  %v565_v0 = vmov (!%p462_p6), 0.0  }
  0x11   : > { %s619_s24 = scalar_lea.vmem %s645_s0, %s459_s21  ;;  %s235_s28 = scalar_lea.vmem %s646_s1, %s461_s25  ;;  %246 = vst [vmem:[#allocation2] sm:$0xff] (!%p462_p6), %v565_v0 }
  0x16 PF: > { %v533_v1 = vld [vmem:[%s235_s28] sm:$0xff]   ;;  %v566_v2 = vmov 0.0   ;;  %v534_v3 = vld [vmem:[%s235_s28 + $0x8] sm:$0xff]   ;;  %vm567_vm0 = vmmov 0   ;;  %v535_v4 = vld [vmem:[%s235_s28 + $0x10] sm:$0xff]   ;;  %p471_p7 = scmp.ne.s32.totalorder %s555_s15, 4 }
  0x17   : > { %486 = vmatprep.subr.bf16.mxu0 %v566_v2  ;;  %502 = vmatprep.mubr.msk.bf16.mxu0 %vm567_vm0, %v566_v2  ;;  %v536_v5 = vld [vmem:[%s235_s28 + $0x18] sm:$0xff]   ;;  %v537_v6 = vld [vmem:[%s235_s28 + $0x20] sm:$0xff]   ;;  %v538_v7 = vld [vmem:[%s235_s28 + $0x28] sm:$0xff]  }
  0x18   : > { %487 = vmatpush3.bf16.msra.mxu0 %v533_v1  ;;  %v539_v8 = vld [vmem:[%s235_s28 + $0x30] sm:$0xff]   ;;  %v540_v9 = vld [vmem:[%s235_s28 + $0x38] sm:$0xff]   ;;  %v248_v10 = vld [vmem:[%s619_s24] sm:$0xf] }
  0x19   : > { %488 = vmatprep.subr.bf16.mxu0 %v566_v2  ;;  %v247_v11 = vld [vmem:[#allocation2] sm:$0xff] }
  0x1a   : > { %v472_v18 = vld [vmem:[%s647_s2] ss:$0 sm:$0xff] (!%p471_p7) }
  0x1b   : > { %v473_v19 = vld [vmem:[%s648_s3] ss:$0 sm:$0xff] (!%p471_p7) }
  0x1c   : > { %489 = vmatpush3.bf16.msra.mxu0 %v534_v3 }
  0x1d   : > { %490 = vmatprep.subr.bf16.mxu0 %v566_v2 }
  0x20   : > { %491 = vmatpush3.bf16.msra.mxu0 %v535_v4 }
  0x21   : > { %492 = vmatprep.subr.bf16.mxu0 %v566_v2 }
  0x24   : > { %493 = vmatpush3.bf16.msra.mxu0 %v536_v5 }
  0x25   : > { %494 = vmatprep.subr.bf16.mxu0 %v566_v2 }
  0x28   : > { %495 = vmatpush3.bf16.msra.mxu0 %v537_v6 }
  0x29   : > { %496 = vmatprep.subr.bf16.mxu0 %v566_v2 }
  0x2c   : > { %497 = vmatpush3.bf16.msra.mxu0 %v538_v7 }
  0x2d   : > { %498 = vmatprep.subr.bf16.mxu0 %v566_v2 }
  0x30   : > { %499 = vmatpush3.bf16.msra.mxu0 %v539_v8 }
  0x31   : > { %500 = vmatprep.subr.bf16.mxu0 %v566_v2 }
  0x34   : > { %501 = vmatpush3.bf16.msra.mxu0 %v540_v9 }
  0x37   : > { %503 = vmatmul.mubr.bf16.vlgmr.msra.gmra.mrb[0].mxu0 %v248_v10 }
 0x107   : > { %358 = sbr.rel (%p471_p7) target bundleno = 284 (0x11c), region = 44 }
 0x10a   : > { %v347_v12 = vpop.f32.mrb[0].mxu0 }
 0x10b   : > { %v353_v13 = vadd.f32 %v347_v12, %v247_v11  ;;  %v504_v14 = vpop.f32.mrb[1].mxu0 }
 0x10c   : > { %v350_v15 = vpop.f32.mrb[2].mxu0 }
 0x10d   : > { %354 = vst [vmem:[#allocation2] sm:$0xff] %v353_v13  ;;  %v505_v16 = vpop.f32.mrb[3].mxu0 }
 0x114   : > { %v359_v17 = vld [vmem:[#allocation2] sm:$0xff] }
 0x115   : > { %v367_v20 = vmul.f32 %v472_v18, %v359_v17 }
 0x117   : > { %v375_v21 = vadd.f32 %v473_v19, %v367_v20 }
 0x119   : > { %v376_v22 = vmax.f32 %v375_v21, 0.0 }
 0x11b   : > { %377 = vst [vmem:[%s649_s4] sm:$0xff] %v376_v22 }
 0x11c PF: > { %s14_s17 = sadd.s32 1, %s563_s17   ;;  %s650_s15 = smov %s559_s16 }
 0x11d   : > { %p11_p8 = scmp.ge.s32.totalorder %s14_s17, 7   ;;  %s651_s16 = smov %s653_s18 }
 0x11f   :  { %13 = sbr.rel (!%p11_p8) target bundleno = 2 (0x2), region = 77 }

// kernel: _lambda_.36
= control target key start
LH: loop header
LB: loop body
LE: loop exit
PB: predicated region body
PF: predicated region fallthrough
CT: control target
= control target key end

     0   :  { %v248_v1 = vmov 0   ;;  %v175_v18 = vlaneseq  ;;  %s337_s1 = inlined_call_operand.vmem [shape: bf16[128,256], index: 1, kind: input, shape index: {}]   ;;  %s338_s0 = inlined_call_operand.vmem [shape: bf16[8,128], index: 0, kind: input, shape index: {}]   ;;  %s339_s2 = inlined_call_operand.vmem [shape: f32[1,256], index: 2, kind: input, shape index: {}]   ;;  %s340_s3 = inlined_call_operand.vmem [shape: f32[1,256], index: 3, kind: input, shape index: {}]   ;;  %s341_s4 = inlined_call_operand.vmem [shape: f32[8,256], index: 4, kind: output, shape index: {}]  }
   0x1   :  { %v224_v0 = vld [vmem:[%s337_s1 + $0x4] ss:$8 sps:$4 sm:$0xff]   ;;  %155 = vmatprep.mubr.bf16.mxu0 %v248_v1  ;;  %v226_v2 = vld [vmem:[%s337_s1] ss:$8 sps:$4 sm:$0xff]   ;;  %v227_v3 = vld [vmem:[%s337_s1 + $0x14] ss:$8 sps:$4 sm:$0xff]  }
   0x2   :  { %123 = vmatprep.subr.bf16.mxu0 %v224_v0  ;;  %v229_v4 = vld [vmem:[%s337_s1 + $0x10] ss:$8 sps:$4 sm:$0xff]   ;;  %v230_v5 = vld [vmem:[%s337_s1 + $0x24] ss:$8 sps:$4 sm:$0xff]   ;;  %v232_v6 = vld [vmem:[%s337_s1 + $0x20] ss:$8 sps:$4 sm:$0xff]  }
   0x3   :  { %124 = vmatpush1.bf16.msra.mxu0 %v226_v2  ;;  %v233_v7 = vld [vmem:[%s337_s1 + $0x34] ss:$8 sps:$4 sm:$0xff]   ;;  %v235_v8 = vld [vmem:[%s337_s1 + $0x30] ss:$8 sps:$4 sm:$0xff]   ;;  %v236_v9 = vld [vmem:[%s337_s1 + $0x44] ss:$8 sps:$4 sm:$0xff]  }
   0x4   :  { %125 = vmatprep.subr.bf16.mxu0 %v227_v3  ;;  %v238_v10 = vld [vmem:[%s337_s1 + $0x40] ss:$8 sps:$4 sm:$0xff]   ;;  %v239_v11 = vld [vmem:[%s337_s1 + $0x54] ss:$8 sps:$4 sm:$0xff]   ;;  %v241_v12 = vld [vmem:[%s337_s1 + $0x50] ss:$8 sps:$4 sm:$0xff]  }
   0x5   :  { %v242_v13 = vld [vmem:[%s337_s1 + $0x64] ss:$8 sps:$4 sm:$0xff]   ;;  %v244_v14 = vld [vmem:[%s337_s1 + $0x60] ss:$8 sps:$4 sm:$0xff]   ;;  %v245_v15 = vld [vmem:[%s337_s1 + $0x74] ss:$8 sps:$4 sm:$0xff]  }
   0x6   :  { %v247_v16 = vld [vmem:[%s337_s1 + $0x70] ss:$8 sps:$4 sm:$0xff]   ;;  %v26_v17 = vld [vmem:[%s338_s0] sm:$0xf]  ;;  %v176_v19 = vshrl.u32 %v175_v18, 7 }
   0x7   :  { %126 = vmatpush1.bf16.msra.mxu0 %v229_v4  ;;  %v173_v21 = vld [vmem:[%s339_s2] sm:$0x3] }
   0x8   :  { %127 = vmatprep.subr.bf16.mxu0 %v230_v5  ;;  %v177_v20 = vsub.s32 0, %v176_v19  ;;  %v181_v22 = vsub.s32 1, %v176_v19  ;;  %v187_v23 = vld [vmem:[%s340_s3] sm:$0x3] }
   0xa   :  { %v178_v24 = vrot.slane %v173_v21, %v177_v20  ;;  %v182_v25 = vrot.slane %v173_v21, %v181_v22  ;;  %v192_v26 = vrot.slane %v187_v23, %v177_v20  ;;  %v196_v28 = vrot.slane %v187_v23, %v181_v22 }
   0xb   :  { %128 = vmatpush1.bf16.msra.mxu0 %v232_v6 }
   0xc   :  { %129 = vmatprep.subr.bf16.mxu0 %v233_v7 }
   0xf   :  { %130 = vmatpush1.bf16.msra.mxu0 %v235_v8 }
  0x10   :  { %131 = vmatprep.subr.bf16.mxu0 %v236_v9 }
  0x13   :  { %132 = vmatpush1.bf16.msra.mxu0 %v238_v10 }
  0x14   :  { %133 = vmatprep.subr.bf16.mxu0 %v239_v11 }
  0x17   :  { %134 = vmatpush1.bf16.msra.mxu0 %v241_v12 }
  0x18   :  { %135 = vmatprep.subr.bf16.mxu0 %v242_v13 }
  0x1b   :  { %136 = vmatpush1.bf16.msra.mxu0 %v244_v14 }
  0x1c   :  { %137 = vmatprep.subr.bf16.mxu0 %v245_v15 }
  0x1f   :  { %138 = vmatpush1.bf16.msra.mxu0 %v247_v16 }
  0x22   :  { %156 = vmatmul.mubr.bf16.vlgmr.msra.gmra.mrb[0].mxu0 %v26_v17 }
  0xf5   :  { %v157_v27 = vpop.f32.mrb[0].mxu0 }
  0xf6   :  { %v185_v29 = vmul.f32 %v178_v24, %v157_v27  ;;  %v159_v30 = vpop.f32.mrb[1].mxu0 }
  0xf7   :  { %v186_v31 = vmul.f32 %v182_v25, %v159_v30  ;;  %v161_v32 = vpop.f32.mrb[2].mxu0 }
  0xf8   :  { %v199_v33 = vadd.f32 %v192_v26, %v185_v29  ;;  %v162_v34 = vpop.f32.mrb[3].mxu0 }
  0xf9   :  { %v200_v35 = vadd.f32 %v196_v28, %v186_v31 }
  0xfa   :  { %201 = vst [vmem:[%s341_s4] sm:$0xff] %v199_v33 }
  0xfb   :  { %202 = vst [vmem:[%s341_s4 + $0x8] sm:$0xff] %v200_v35 }

// kernel: _lambda_.37
= control target key start
LH: loop header
LB: loop body
LE: loop exit
PB: predicated region body
PF: predicated region fallthrough
CT: control target
= control target key end

     0   :  { %v257_v1 = vmov 0   ;;  %v178_v18 = vlaneseq  ;;  %s357_s1 = inlined_call_operand.vmem [shape: bf16[128,256], index: 1, kind: input, shape index: {}]   ;;  %s358_s0 = inlined_call_operand.vmem [shape: bf16[8,128], index: 0, kind: input, shape index: {}]   ;;  %s359_s2 = inlined_call_operand.vmem [shape: f32[1,256], index: 2, kind: input, shape index: {}]   ;;  %s360_s3 = inlined_call_operand.vmem [shape: f32[1,256], index: 3, kind: input, shape index: {}]   ;;  %s361_s4 = inlined_call_operand.vmem [shape: f32[8,256], index: 4, kind: input, shape index: {}]   ;;  %s362_s5 = inlined_call_operand.vmem [shape: f32[8,256], index: 5, kind: output, shape index: {}]  }
   0x1   :  { %v233_v0 = vld [vmem:[%s357_s1 + $0x4] ss:$8 sps:$4 sm:$0xff]   ;;  %158 = vmatprep.mubr.bf16.mxu0 %v257_v1  ;;  %v235_v2 = vld [vmem:[%s357_s1] ss:$8 sps:$4 sm:$0xff]   ;;  %v236_v3 = vld [vmem:[%s357_s1 + $0x14] ss:$8 sps:$4 sm:$0xff]  }
   0x2   :  { %126 = vmatprep.subr.bf16.mxu0 %v233_v0  ;;  %v238_v4 = vld [vmem:[%s357_s1 + $0x10] ss:$8 sps:$4 sm:$0xff]   ;;  %v239_v5 = vld [vmem:[%s357_s1 + $0x24] ss:$8 sps:$4 sm:$0xff]   ;;  %v241_v6 = vld [vmem:[%s357_s1 + $0x20] ss:$8 sps:$4 sm:$0xff]  }
   0x3   :  { %127 = vmatpush1.bf16.msra.mxu0 %v235_v2  ;;  %v242_v7 = vld [vmem:[%s357_s1 + $0x34] ss:$8 sps:$4 sm:$0xff]   ;;  %v244_v8 = vld [vmem:[%s357_s1 + $0x30] ss:$8 sps:$4 sm:$0xff]   ;;  %v245_v9 = vld [vmem:[%s357_s1 + $0x44] ss:$8 sps:$4 sm:$0xff]  }
   0x4   :  { %128 = vmatprep.subr.bf16.mxu0 %v236_v3  ;;  %v247_v10 = vld [vmem:[%s357_s1 + $0x40] ss:$8 sps:$4 sm:$0xff]   ;;  %v248_v11 = vld [vmem:[%s357_s1 + $0x54] ss:$8 sps:$4 sm:$0xff]   ;;  %v250_v12 = vld [vmem:[%s357_s1 + $0x50] ss:$8 sps:$4 sm:$0xff]  }
   0x5   :  { %v251_v13 = vld [vmem:[%s357_s1 + $0x64] ss:$8 sps:$4 sm:$0xff]   ;;  %v253_v14 = vld [vmem:[%s357_s1 + $0x60] ss:$8 sps:$4 sm:$0xff]   ;;  %v254_v15 = vld [vmem:[%s357_s1 + $0x74] ss:$8 sps:$4 sm:$0xff]  }
   0x6   :  { %v256_v16 = vld [vmem:[%s357_s1 + $0x70] ss:$8 sps:$4 sm:$0xff]   ;;  %v29_v17 = vld [vmem:[%s358_s0] sm:$0xf]  ;;  %v179_v19 = vshrl.u32 %v178_v18, 7  ;;  %v205_v35 = vld [vmem:[%s361_s4 + $0x8] sm:$0xff] }
   0x7   :  { %129 = vmatpush1.bf16.msra.mxu0 %v238_v4  ;;  %v176_v21 = vld [vmem:[%s359_s2] sm:$0x3] }
   0x8   :  { %130 = vmatprep.subr.bf16.mxu0 %v239_v5  ;;  %v180_v20 = vsub.s32 0, %v179_v19  ;;  %v184_v22 = vsub.s32 1, %v179_v19  ;;  %v190_v23 = vld [vmem:[%s360_s3] sm:$0x3] }
   0x9   :  { %v204_v31 = vld [vmem:[%s361_s4] sm:$0xff] }
   0xa   :  { %v181_v24 = vrot.slane %v176_v21, %v180_v20  ;;  %v185_v25 = vrot.slane %v176_v21, %v184_v22  ;;  %v195_v26 = vrot.slane %v190_v23, %v180_v20  ;;  %v199_v28 = vrot.slane %v190_v23, %v184_v22 }
   0xb   :  { %131 = vmatpush1.bf16.msra.mxu0 %v241_v6 }
   0xc   :  { %132 = vmatprep.subr.bf16.mxu0 %v242_v7 }
   0xf   :  { %133 = vmatpush1.bf16.msra.mxu0 %v244_v8 }
  0x10   :  { %134 = vmatprep.subr.bf16.mxu0 %v245_v9 }
  0x13   :  { %135 = vmatpush1.bf16.msra.mxu0 %v247_v10 }
  0x14   :  { %136 = vmatprep.subr.bf16.mxu0 %v248_v11 }
  0x17   :  { %137 = vmatpush1.bf16.msra.mxu0 %v250_v12 }
  0x18   :  { %138 = vmatprep.subr.bf16.mxu0 %v251_v13 }
  0x1b   :  { %139 = vmatpush1.bf16.msra.mxu0 %v253_v14 }
  0x1c   :  { %140 = vmatprep.subr.bf16.mxu0 %v254_v15 }
  0x1f   :  { %141 = vmatpush1.bf16.msra.mxu0 %v256_v16 }
  0x22   :  { %159 = vmatmul.mubr.bf16.vlgmr.msra.gmra.mrb[0].mxu0 %v29_v17 }
  0xf5   :  { %v160_v27 = vpop.f32.mrb[0].mxu0 }
  0xf6   :  { %v188_v29 = vmul.f32 %v181_v24, %v160_v27  ;;  %v162_v30 = vpop.f32.mrb[1].mxu0 }
  0xf7   :  { %v189_v32 = vmul.f32 %v185_v25, %v162_v30  ;;  %v164_v33 = vpop.f32.mrb[2].mxu0 }
  0xf8   :  { %v202_v34 = vadd.f32 %v195_v26, %v188_v29  ;;  %v165_v36 = vpop.f32.mrb[3].mxu0 }
  0xf9   :  { %v203_v37 = vadd.f32 %v199_v28, %v189_v32 }
  0xfa   :  { %v206_v38 = vadd.f32 %v204_v31, %v202_v34 }
  0xfb   :  { %v207_v39 = vadd.f32 %v205_v35, %v203_v37 }
  0xfc   :  { %v208_v40 = vmax.f32 %v206_v38, 0.0 }
  0xfd   :  { %v209_v41 = vmax.f32 %v207_v39, 0.0 }
  0xfe   :  { %210 = vst [vmem:[%s362_s5] sm:$0xff] %v208_v40 }
  0xff   :  { %211 = vst [vmem:[%s362_s5 + $0x8] sm:$0xff] %v209_v41 }

// kernel: _lambda_.38
= control target key start
LH: loop header
LB: loop body
LE: loop exit
PB: predicated region body
PF: predicated region fallthrough
CT: control target
= control target key end

     0   :  { %s373_s1 = inlined_call_operand.vmem [shape: bf16[256,128], index: 1, kind: input, shape index: {}]   ;;  %s374_s0 = inlined_call_operand.vmem [shape: bf16[8,256], index: 0, kind: input, shape index: {}]   ;;  %s375_s2 = inlined_call_operand.vmem [shape: f32[1,128], index: 2, kind: input, shape index: {}]   ;;  %s376_s3 = inlined_call_operand.vmem [shape: f32[1,128], index: 3, kind: input, shape index: {}]   ;;  %s377_s4 = inlined_call_operand.vmem [shape: f32[8,128], index: 4, kind: output, shape index: {}]  }
   0x1   :  { %v270_v0 = vld [vmem:[%s373_s1 + $0x40] sm:$0xff]   ;;  %v272_v2 = vld [vmem:[%s373_s1 + $0x48] sm:$0xff]   ;;  %v274_v4 = vld [vmem:[%s373_s1 + $0x50] sm:$0xff]  }
   0x2   :  { %v271_v1 = vld [vmem:[%s373_s1] sm:$0xff]   ;;  %248 = vmatprep.subr.bf16.mxu0 %v270_v0  ;;  %v273_v3 = vld [vmem:[%s373_s1 + $0x8] sm:$0xff]   ;;  %v275_v5 = vld [vmem:[%s373_s1 + $0x10] sm:$0xff]  }
   0x3   :  { %249 = vmatpush3.bf16.msra.mxu0 %v271_v1  ;;  %v276_v6 = vld [vmem:[%s373_s1 + $0x58] sm:$0xff]   ;;  %v278_v8 = vld [vmem:[%s373_s1 + $0x60] sm:$0xff]   ;;  %v280_v10 = vld [vmem:[%s373_s1 + $0x68] sm:$0xff]  }
   0x4   :  { %250 = vmatprep.subr.bf16.mxu0 %v272_v2  ;;  %v277_v7 = vld [vmem:[%s373_s1 + $0x18] sm:$0xff]   ;;  %v279_v9 = vld [vmem:[%s373_s1 + $0x20] sm:$0xff]   ;;  %v281_v13 = vld [vmem:[%s373_s1 + $0x28] sm:$0xff]  }
   0x5   :  { %v24_v11 = vld [vmem:[%s374_s0] sm:$0xff]  ;;  %v282_v14 = vld [vmem:[%s373_s1 + $0x70] sm:$0xff]   ;;  %v284_v16 = vld [vmem:[%s373_s1 + $0x78] sm:$0xff]  }
   0x6   :  { %v229_v12 = vcombine.high %v24_v11, %v24_v11  ;;  %v283_v15 = vld [vmem:[%s373_s1 + $0x30] sm:$0xff]   ;;  %v285_v17 = vld [vmem:[%s373_s1 + $0x38] sm:$0xff]   ;;  %v228_v18 = vcombine.low %v24_v11, %v24_v11  ;;  %v246_v21 = vld [vmem:[%s375_s2] ss:$0 sm:$0xff] }
   0x7   :  { %251 = vmatpush3.bf16.msra.mxu0 %v273_v3  ;;  %v247_v24 = vld [vmem:[%s376_s3] ss:$0 sm:$0xff] }
   0x8   :  { %252 = vmatprep.subr.bf16.mxu0 %v274_v4  ;;  %192 = vmatprep.mubr.bf16.mxu0 %v229_v12 }
   0xb   :  { %253 = vmatpush3.bf16.msra.mxu0 %v275_v5 }
   0xc   :  { %254 = vmatprep.subr.bf16.mxu0 %v276_v6 }
   0xf   :  { %255 = vmatpush3.bf16.msra.mxu0 %v277_v7 }
  0x10   :  { %256 = vmatprep.subr.bf16.mxu0 %v278_v8 }
  0x13   :  { %257 = vmatpush3.bf16.msra.mxu0 %v279_v9 }
  0x14   :  { %258 = vmatprep.subr.bf16.mxu0 %v280_v10 }
  0x17   :  { %259 = vmatpush3.bf16.msra.mxu0 %v281_v13 }
  0x18   :  { %260 = vmatprep.subr.bf16.mxu0 %v282_v14 }
  0x1b   :  { %261 = vmatpush3.bf16.msra.mxu0 %v283_v15 }
  0x1c   :  { %262 = vmatprep.subr.bf16.mxu0 %v284_v16 }
  0x1f   :  { %263 = vmatpush3.bf16.msra.mxu0 %v285_v17 }
  0x22   :  { %193 = vmatmul.mubr.bf16.vlgmr.msra.gmra.mrb[0].mxu0 %v228_v18 }
  0xf5   :  { %v264_v19 = vpop.f32.mrb[0].mxu0 }
  0xf6   :  { %v265_v20 = vpop.f32.mrb[1].mxu0 }
  0xf7   :  { %v266_v22 = vadd.f32 %v265_v20, %v264_v19  ;;  %v267_v23 = vpop.f32.mrb[2].mxu0 }
  0xf8   :  { %v268_v25 = vpop.f32.mrb[3].mxu0 }
  0xf9   :  { %v213_v26 = vmul.f32 %v266_v22, %v246_v21 }
  0xfb   :  { %v221_v27 = vadd.f32 %v247_v24, %v213_v26 }
  0xfd   :  { %v222_v28 = vmax.f32 %v221_v27, 0.0 }
  0xff   :  { %223 = vst [vmem:[%s377_s4] sm:$0xff] %v222_v28 }

// kernel: _lambda_.40
= control target key start
LH: loop header
LB: loop body
LE: loop exit
PB: predicated region body
PF: predicated region fallthrough
CT: control target
= control target key end

     0   :  { %s980_s1 = inlined_call_operand.vmem [shape: bf16[256,512], index: 1, kind: input, shape index: {}]   ;;  %s981_s0 = inlined_call_operand.vmem [shape: bf16[8,256], index: 0, kind: input, shape index: {}]   ;;  %s982_s2 = inlined_call_operand.vmem [shape: f32[1,512], index: 2, kind: input, shape index: {}]   ;;  %s983_s3 = inlined_call_operand.vmem [shape: f32[1,512], index: 3, kind: input, shape index: {}]   ;;  %s984_s4 = inlined_call_operand.vmem [shape: f32[8,512], index: 4, kind: output, shape index: {}]  }
   0x1   :  { %v644_v0 = vld [vmem:[%s980_s1 + $0x4] ss:$16 sps:$4 sm:$0xff]   ;;  %v646_v1 = vld [vmem:[%s980_s1 + $0xc] ss:$16 sps:$4 sm:$0xff]   ;;  %v648_v2 = vld [vmem:[%s980_s1] ss:$16 sps:$4 sm:$0xff]  }
   0x2   :  { %421 = vmatprep.subr.bf16.mxu0 %v644_v0  ;;  %v649_v3 = vld [vmem:[%s980_s1 + $0x8] ss:$16 sps:$4 sm:$0xff]   ;;  %462 = vmatprep.subr.bf16.mxu1 %v646_v1  ;;  %v650_v4 = vld [vmem:[%s980_s1 + $0x24] ss:$16 sps:$4 sm:$0xff]   ;;  %v652_v5 = vld [vmem:[%s980_s1 + $0x2c] ss:$16 sps:$4 sm:$0xff]  }
   0x3   :  { %422 = vmatpush1.bf16.msra.mxu0 %v648_v2  ;;  %463 = vmatpush1.bf16.msra.mxu1 %v649_v3  ;;  %v654_v6 = vld [vmem:[%s980_s1 + $0x20] ss:$16 sps:$4 sm:$0xff]   ;;  %v655_v7 = vld [vmem:[%s980_s1 + $0x28] ss:$16 sps:$4 sm:$0xff]   ;;  %v656_v8 = vld [vmem:[%s980_s1 + $0x44] ss:$16 sps:$4 sm:$0xff]   ;;  %v520_v3 = vlaneseq }
   0x4   :  { %423 = vmatprep.subr.bf16.mxu0 %v650_v4  ;;  %464 = vmatprep.subr.bf16.mxu1 %v652_v5  ;;  %v658_v9 = vld [vmem:[%s980_s1 + $0x4c] ss:$16 sps:$4 sm:$0xff]   ;;  %v660_v10 = vld [vmem:[%s980_s1 + $0x40] ss:$16 sps:$4 sm:$0xff]   ;;  %v661_v11 = vld [vmem:[%s980_s1 + $0x48] ss:$16 sps:$4 sm:$0xff]  }
   0x5   :  { %v662_v12 = vld [vmem:[%s980_s1 + $0x64] ss:$16 sps:$4 sm:$0xff]   ;;  %v664_v13 = vld [vmem:[%s980_s1 + $0x6c] ss:$16 sps:$4 sm:$0xff]   ;;  %v666_v14 = vld [vmem:[%s980_s1 + $0x60] ss:$16 sps:$4 sm:$0xff]  }
   0x6   :  { %v667_v15 = vld [vmem:[%s980_s1 + $0x68] ss:$16 sps:$4 sm:$0xff]   ;;  %v668_v16 = vld [vmem:[%s980_s1 + $0x84] ss:$16 sps:$4 sm:$0xff]   ;;  %v670_v17 = vld [vmem:[%s980_s1 + $0x8c] ss:$16 sps:$4 sm:$0xff]  }
   0x7   :  { %424 = vmatpush1.bf16.msra.mxu0 %v654_v6  ;;  %465 = vmatpush1.bf16.msra.mxu1 %v655_v7  ;;  %v672_v18 = vld [vmem:[%s980_s1 + $0x80] ss:$16 sps:$4 sm:$0xff]   ;;  %v673_v19 = vld [vmem:[%s980_s1 + $0x88] ss:$16 sps:$4 sm:$0xff]   ;;  %v674_v20 = vld [vmem:[%s980_s1 + $0xa4] ss:$16 sps:$4 sm:$0xff]  }
   0x8   :  { %425 = vmatprep.subr.bf16.mxu0 %v656_v8  ;;  %466 = vmatprep.subr.bf16.mxu1 %v658_v9  ;;  %v676_v21 = vld [vmem:[%s980_s1 + $0xac] ss:$16 sps:$4 sm:$0xff]   ;;  %v678_v22 = vld [vmem:[%s980_s1 + $0xa0] ss:$16 sps:$4 sm:$0xff]   ;;  %v679_v23 = vld [vmem:[%s980_s1 + $0xa8] ss:$16 sps:$4 sm:$0xff]  }
   0x9   :  { %v680_v24 = vld [vmem:[%s980_s1 + $0xc4] ss:$16 sps:$4 sm:$0xff]   ;;  %v682_v25 = vld [vmem:[%s980_s1 + $0xcc] ss:$16 sps:$4 sm:$0xff]   ;;  %v684_v26 = vld [vmem:[%s980_s1 + $0xc0] ss:$16 sps:$4 sm:$0xff]  }
   0xa   :  { %v685_v27 = vld [vmem:[%s980_s1 + $0xc8] ss:$16 sps:$4 sm:$0xff]   ;;  %v686_v28 = vld [vmem:[%s980_s1 + $0xe4] ss:$16 sps:$4 sm:$0xff]   ;;  %v688_v29 = vld [vmem:[%s980_s1 + $0xec] ss:$16 sps:$4 sm:$0xff]  }
   0xb   :  { %426 = vmatpush1.bf16.msra.mxu0 %v660_v10  ;;  %467 = vmatpush1.bf16.msra.mxu1 %v661_v11  ;;  %v690_v30 = vld [vmem:[%s980_s1 + $0xe0] ss:$16 sps:$4 sm:$0xff]   ;;  %v691_v31 = vld [vmem:[%s980_s1 + $0xe8] ss:$16 sps:$4 sm:$0xff]   ;;  %v692_v32 = vld [vmem:[%s980_s1 + $0x104] ss:$16 sps:$4 sm:$0xff]  }
   0xc   :  { %427 = vmatprep.subr.bf16.mxu0 %v662_v12  ;;  %468 = vmatprep.subr.bf16.mxu1 %v664_v13  ;;  %v694_v33 = vld [vmem:[%s980_s1 + $0x10c] ss:$16 sps:$4 sm:$0xff]   ;;  %v696_v34 = vld [vmem:[%s980_s1 + $0x100] ss:$16 sps:$4 sm:$0xff]   ;;  %v697_v35 = vld [vmem:[%s980_s1 + $0x108] ss:$16 sps:$4 sm:$0xff]  }
   0xd   :  { %v698_v36 = vld [vmem:[%s980_s1 + $0x124] ss:$16 sps:$4 sm:$0xff]   ;;  %v700_v37 = vld [vmem:[%s980_s1 + $0x12c] ss:$16 sps:$4 sm:$0xff]   ;;  %v702_v38 = vld [vmem:[%s980_s1 + $0x120] ss:$16 sps:$4 sm:$0xff]  }
   0xe   :  { %v703_v39 = vld [vmem:[%s980_s1 + $0x128] ss:$16 sps:$4 sm:$0xff]   ;;  %v704_v40 = vld [vmem:[%s980_s1 + $0x144] ss:$16 sps:$4 sm:$0xff]   ;;  %v706_v41 = vld [vmem:[%s980_s1 + $0x14c] ss:$16 sps:$4 sm:$0xff]  }
   0xf   :  { %428 = vmatpush1.bf16.msra.mxu0 %v666_v14  ;;  %469 = vmatpush1.bf16.msra.mxu1 %v667_v15  ;;  %v708_v42 = vld [vmem:[%s980_s1 + $0x140] ss:$16 sps:$4 sm:$0xff]   ;;  %v709_v43 = vld [vmem:[%s980_s1 + $0x148] ss:$16 sps:$4 sm:$0xff]   ;;  %v710_v44 = vld [vmem:[%s980_s1 + $0x164] ss:$16 sps:$4 sm:$0xff]  }
  0x10   :  { %429 = vmatprep.subr.bf16.mxu0 %v668_v16  ;;  %470 = vmatprep.subr.bf16.mxu1 %v670_v17  ;;  %v712_v45 = vld [vmem:[%s980_s1 + $0x16c] ss:$16 sps:$4 sm:$0xff]   ;;  %v29_v46 = vld [vmem:[%s981_s0] sm:$0xff]  ;;  %v715_v49 = vld [vmem:[%s980_s1 + $0x168] ss:$16 sps:$4 sm:$0xff]   ;;  %v521_v4 = vshrl.u32 %v520_v3, 7 }
  0x11   :  { %v579_v47 = vcombine.high %v29_v46, %v29_v46  ;;  %v714_v48 = vld [vmem:[%s980_s1 + $0x160] ss:$16 sps:$4 sm:$0xff]   ;;  %v716_v50 = vld [vmem:[%s980_s1 + $0x184] ss:$16 sps:$4 sm:$0xff]   ;;  %v718_v51 = vld [vmem:[%s980_s1 + $0x18c] ss:$16 sps:$4 sm:$0xff]   ;;  %v578_v2 = vcombine.low %v29_v46, %v29_v46 }
  0x12   :  { %v720_v52 = vld [vmem:[%s980_s1 + $0x180] ss:$16 sps:$4 sm:$0xff]   ;;  %v721_v53 = vld [vmem:[%s980_s1 + $0x188] ss:$16 sps:$4 sm:$0xff]   ;;  %v722_v54 = vld [vmem:[%s980_s1 + $0x1a4] ss:$16 sps:$4 sm:$0xff]  }
  0x13   :  { %430 = vmatpush1.bf16.msra.mxu0 %v672_v18  ;;  %471 = vmatpush1.bf16.msra.mxu1 %v673_v19  ;;  %v724_v55 = vld [vmem:[%s980_s1 + $0x1ac] ss:$16 sps:$4 sm:$0xff]   ;;  %v726_v56 = vld [vmem:[%s980_s1 + $0x1a0] ss:$16 sps:$4 sm:$0xff]   ;;  %v727_v57 = vld [vmem:[%s980_s1 + $0x1a8] ss:$16 sps:$4 sm:$0xff]  }
  0x14   :  { %431 = vmatprep.subr.bf16.mxu0 %v674_v20  ;;  %472 = vmatprep.subr.bf16.mxu1 %v676_v21  ;;  %v728_v58 = vld [vmem:[%s980_s1 + $0x1c4] ss:$16 sps:$4 sm:$0xff]   ;;  %v730_v59 = vld [vmem:[%s980_s1 + $0x1cc] ss:$16 sps:$4 sm:$0xff]   ;;  %v732_v60 = vld [vmem:[%s980_s1 + $0x1c0] ss:$16 sps:$4 sm:$0xff]  }
  0x15   :  { %453 = vmatprep.mubr.bf16.mxu0 %v579_v47  ;;  %494 = vmatprep.mubr.bf16.mxu1 %v579_v47  ;;  %v733_v61 = vld [vmem:[%s980_s1 + $0x1c8] ss:$16 sps:$4 sm:$0xff]   ;;  %v734_v62 = vld [vmem:[%s980_s1 + $0x1e4] ss:$16 sps:$4 sm:$0xff]   ;;  %v736_v63 = vld [vmem:[%s980_s1 + $0x1ec] ss:$16 sps:$4 sm:$0xff]  }
  0x16   :  { %v738_v0 = vld [vmem:[%s980_s1 + $0x1e0] ss:$16 sps:$4 sm:$0xff]   ;;  %v739_v1 = vld [vmem:[%s980_s1 + $0x1e8] ss:$16 sps:$4 sm:$0xff]   ;;  %v522_v5 = vsub.s32 0, %v521_v4  ;;  %v530_v6 = vsub.s32 2, %v521_v4 }
  0x17   :  { %432 = vmatpush1.bf16.msra.mxu0 %v678_v22  ;;  %473 = vmatpush1.bf16.msra.mxu1 %v679_v23  ;;  %v518_v7 = vld [vmem:[%s982_s2] sm:$0xf]  ;;  %v526_v8 = vsub.s32 1, %v521_v4  ;;  %v534_v9 = vsub.s32 3, %v521_v4 }
  0x18   :  { %433 = vmatprep.subr.bf16.mxu0 %v680_v24  ;;  %474 = vmatprep.subr.bf16.mxu1 %v682_v25  ;;  %v544_v10 = vld [vmem:[%s983_s3] sm:$0xf]  ;;  %v523_v11 = vrot.slane %v518_v7, %v522_v5  ;;  %v531_v12 = vrot.slane %v518_v7, %v530_v6 }
  0x19   :  { %v527_v13 = vrot.slane %v518_v7, %v526_v8  ;;  %v535_v14 = vrot.slane %v518_v7, %v534_v9  ;;  %v549_v15 = vrot.slane %v544_v10, %v522_v5  ;;  %v557_v16 = vrot.slane %v544_v10, %v530_v6 }
  0x1a   :  { %v553_v19 = vrot.slane %v544_v10, %v526_v8  ;;  %v561_v20 = vrot.slane %v544_v10, %v534_v9 }
  0x1b   :  { %434 = vmatpush1.bf16.msra.mxu0 %v684_v26  ;;  %475 = vmatpush1.bf16.msra.mxu1 %v685_v27 }
  0x1c   :  { %435 = vmatprep.subr.bf16.mxu0 %v686_v28  ;;  %476 = vmatprep.subr.bf16.mxu1 %v688_v29 }
  0x1f   :  { %436 = vmatpush1.bf16.msra.mxu0 %v690_v30  ;;  %477 = vmatpush1.bf16.msra.mxu1 %v691_v31 }
  0x20   :  { %437 = vmatprep.subr.bf16.mxu0 %v692_v32  ;;  %478 = vmatprep.subr.bf16.mxu1 %v694_v33 }
  0x23   :  { %438 = vmatpush1.bf16.msra.mxu0 %v696_v34  ;;  %479 = vmatpush1.bf16.msra.mxu1 %v697_v35 }
  0x24   :  { %439 = vmatprep.subr.bf16.mxu0 %v698_v36  ;;  %480 = vmatprep.subr.bf16.mxu1 %v700_v37 }
  0x27   :  { %440 = vmatpush1.bf16.msra.mxu0 %v702_v38  ;;  %481 = vmatpush1.bf16.msra.mxu1 %v703_v39 }
  0x28   :  { %441 = vmatprep.subr.bf16.mxu0 %v704_v40  ;;  %482 = vmatprep.subr.bf16.mxu1 %v706_v41 }
  0x2b   :  { %442 = vmatpush1.bf16.msra.mxu0 %v708_v42  ;;  %483 = vmatpush1.bf16.msra.mxu1 %v709_v43 }
  0x2c   :  { %443 = vmatprep.subr.bf16.mxu0 %v710_v44  ;;  %484 = vmatprep.subr.bf16.mxu1 %v712_v45 }
  0x2f   :  { %444 = vmatpush1.bf16.msra.mxu0 %v714_v48  ;;  %485 = vmatpush1.bf16.msra.mxu1 %v715_v49 }
  0x30   :  { %445 = vmatprep.subr.bf16.mxu0 %v716_v50  ;;  %486 = vmatprep.subr.bf16.mxu1 %v718_v51 }
  0x33   :  { %446 = vmatpush1.bf16.msra.mxu0 %v720_v52  ;;  %487 = vmatpush1.bf16.msra.mxu1 %v721_v53 }
  0x34   :  { %447 = vmatprep.subr.bf16.mxu0 %v722_v54  ;;  %488 = vmatprep.subr.bf16.mxu1 %v724_v55 }
  0x37   :  { %448 = vmatpush1.bf16.msra.mxu0 %v726_v56  ;;  %489 = vmatpush1.bf16.msra.mxu1 %v727_v57 }
  0x38   :  { %449 = vmatprep.subr.bf16.mxu0 %v728_v58  ;;  %490 = vmatprep.subr.bf16.mxu1 %v730_v59 }
  0x3b   :  { %450 = vmatpush1.bf16.msra.mxu0 %v732_v60  ;;  %491 = vmatpush1.bf16.msra.mxu1 %v733_v61 }
  0x3c   :  { %451 = vmatprep.subr.bf16.mxu0 %v734_v62  ;;  %492 = vmatprep.subr.bf16.mxu1 %v736_v63 }
  0x3f   :  { %452 = vmatpush1.bf16.msra.mxu0 %v738_v0  ;;  %493 = vmatpush1.bf16.msra.mxu1 %v739_v1 }
  0x42   :  { %454 = vmatmul.mubr.bf16.vlgmr.msra.gmra.mrb[0].mxu0 %v578_v2  ;;  %495 = vmatmul.mubr.bf16.vlgmr.msra.gmra.mrb[0].mxu1 %v578_v2 }
 0x115   :  { %v455_v17 = vpop.f32.mrb[0].mxu0  ;;  %v496_v18 = vpop.f32.mrb[0].mxu1 }
 0x116   :  { %v540_v21 = vmul.f32 %v523_v11, %v455_v17  ;;  %v542_v22 = vmul.f32 %v531_v12, %v496_v18  ;;  %v457_v23 = vpop.f32.mrb[1].mxu0  ;;  %v498_v24 = vpop.f32.mrb[1].mxu1 }
 0x117   :  { %v541_v25 = vmul.f32 %v527_v13, %v457_v23  ;;  %v543_v26 = vmul.f32 %v535_v14, %v498_v24  ;;  %v459_v27 = vpop.f32.mrb[2].mxu0  ;;  %v500_v28 = vpop.f32.mrb[2].mxu1 }
 0x118   :  { %v566_v29 = vadd.f32 %v549_v15, %v540_v21  ;;  %v568_v30 = vadd.f32 %v557_v16, %v542_v22  ;;  %v460_v31 = vpop.f32.mrb[3].mxu0  ;;  %v501_v32 = vpop.f32.mrb[3].mxu1 }
 0x119   :  { %v567_v33 = vadd.f32 %v553_v19, %v541_v25  ;;  %v569_v34 = vadd.f32 %v561_v20, %v543_v26 }
 0x11a   :  { %570 = vst [vmem:[%s984_s4] sm:$0xff] %v566_v29  ;;  %572 = vst [vmem:[%s984_s4 + $0x10] sm:$0xff] %v568_v30 }
 0x11b   :  { %571 = vst [vmem:[%s984_s4 + $0x8] sm:$0xff] %v567_v33  ;;  %573 = vst [vmem:[%s984_s4 + $0x18] sm:$0xff] %v569_v34 }

// kernel: _lambda_.39
= control target key start
LH: loop header
LB: loop body
LE: loop exit
PB: predicated region body
PF: predicated region fallthrough
CT: control target
= control target key end

     0   :  { %s837_s15 = smov 0   ;;  %s839_s16 = smov 0   ;;  %s915_s0 = inlined_call_operand.vmem [shape: bf16[8,1152], index: 0, kind: input, shape index: {}]   ;;  %s916_s1 = inlined_call_operand.vmem [shape: bf16[1152,128], index: 1, kind: input, shape index: {}]   ;;  %s917_s2 = inlined_call_operand.vmem [shape: f32[1,128], index: 2, kind: input, shape index: {}]   ;;  %s918_s3 = inlined_call_operand.vmem [shape: f32[1,128], index: 3, kind: input, shape index: {}]   ;;  %s919_s4 = inlined_call_operand.vmem [shape: f32[8,128], index: 4, kind: output, shape index: {}]  }
   0x1   :  { %s841_s17 = smov 0  }
   0x2 LB: > { %s23_s18 = sadd.s32 1, %s803_s16  ;;  %p643_p0 = scmp.ge.s32.totalorder %s807_s17, 1  ;;  %s807_s17 = sphi %s841_s17, %s14_s17   ;;  %s803_s16 = sphi %s839_s16, %s921_s16   ;;  %s799_s15 = sphi %s837_s15, %s920_s15  }
   0x3   : > { %p24_p1 = scmp.ge.s32.totalorder %s23_s18, 3  ;;  %p192_p2 = scmp.lt.s32.totalorder %s807_s17, 4 }
   0x5   : > { %s923_s18 = smov (%p24_p1, %s23_s18), 0  ;;  %p193_p3 = pnand %p643_p0, %p192_p2 }
   0x6   : > { %s226_s19 = smul.u32 (!%p193_p3), 3, %s799_s15  ;;  %p646_p6 = scmp.ne.s32.totalorder (!%p193_p3), %s799_s15, 0 }
   0x7   : > { %196 = sbr.rel (%p193_p3) target bundleno = 291 (0x123), region = 36 }
   0x8   : > { %s236_s20 = smul.u32 (!%p193_p3), 48, %s799_s15  ;;  %p229_p4 = scmp.lt.s32.totalorder (!%p193_p3), %s226_s19, 8 }
   0xa   : > { %p237_p5 = scmp.lt.s32.totalorder (!%p193_p3), %s236_s20, 143 }
   0xe   : > { %s925_s19 = smov (!%p229_p4, %s226_s19), 8  ;;  %s927_s20 = smov (!%p237_p5, %s236_s20), 143 }
   0xf   : > { %s644_s21 = sshll.u32 %s925_s19, 2  ;;  %s645_s25 = sshll.u32 %s927_s20, 2  ;;  %v809_v0 = vmov (!%p646_p6), 0.0  }
  0x10   : > { %s862_s24 = scalar_lea.vmem %s915_s0, %s644_s21  ;;  %s867_s28 = scalar_lea.vmem %s916_s1, %s645_s25  ;;  %251 = vst [vmem:[#allocation2] sm:$0xff] (!%p646_p6), %v809_v0 }
  0x11   : > { %250 = sbr.rel (%p646_p6) target bundleno = 24 (0x18), region = 40 }
  0x18 PF: > { %v758_v1 = vld [vmem:[%s867_s28 + $0x40] sm:$0xff]   ;;  %v810_v2 = vmov 0.0   ;;  %vm811_vm0 = vmmov 0   ;;  %v761_v5 = vld [vmem:[%s867_s28 + $0x48] sm:$0xff]   ;;  %v764_v8 = vld [vmem:[%s867_s28 + $0x50] sm:$0xff]   ;;  %p674_p7 = scmp.ne.s32.totalorder %s799_s15, 2 }
  0x19   : > { %711 = vmatprep.subr.bf16.mxu1 %v810_v2  ;;  %v759_v3 = vld [vmem:[%s867_s28] sm:$0xff]   ;;  %680 = vmatprep.subr.bf16.mxu0 %v758_v1  ;;  %v762_v6 = vld [vmem:[%s867_s28 + $0x8] sm:$0xff]   ;;  %v765_v9 = vld [vmem:[%s867_s28 + $0x10] sm:$0xff]  }
  0x1a   : > { %v760_v4 = vld [vmem:[%s867_s28 + $0x80] sm:$0xff]   ;;  %727 = vmatprep.mubr.msk.bf16.mxu1 %vm811_vm0, %v810_v2  ;;  %681 = vmatpush3.bf16.msra.mxu0 %v759_v3  ;;  %v763_v7 = vld [vmem:[%s867_s28 + $0x88] sm:$0xff]   ;;  %v766_v10 = vld [vmem:[%s867_s28 + $0x90] sm:$0xff]  }
  0x1b   : > { %712 = vmatpush3.bf16.msra.mxu1 %v760_v4  ;;  %682 = vmatprep.subr.bf16.mxu0 %v761_v5  ;;  %v767_v11 = vld [vmem:[%s867_s28 + $0x58] sm:$0xff]   ;;  %v770_v14 = vld [vmem:[%s867_s28 + $0x60] sm:$0xff]   ;;  %v773_v17 = vld [vmem:[%s867_s28 + $0x68] sm:$0xff]  }
  0x1c   : > { %713 = vmatprep.subr.bf16.mxu1 %v810_v2  ;;  %v768_v12 = vld [vmem:[%s867_s28 + $0x18] sm:$0xff]   ;;  %v771_v15 = vld [vmem:[%s867_s28 + $0x20] sm:$0xff]   ;;  %v774_v18 = vld [vmem:[%s867_s28 + $0x28] sm:$0xff]  }
  0x1d   : > { %v769_v13 = vld [vmem:[%s867_s28 + $0x98] sm:$0xff]   ;;  %v772_v16 = vld [vmem:[%s867_s28 + $0xa0] sm:$0xff]   ;;  %v775_v19 = vld [vmem:[%s867_s28 + $0xa8] sm:$0xff]  }
  0x1e   : > { %683 = vmatpush3.bf16.msra.mxu0 %v762_v6  ;;  %v776_v20 = vld [vmem:[%s867_s28 + $0x70] sm:$0xff]   ;;  %v779_v23 = vld [vmem:[%s867_s28 + $0x78] sm:$0xff]   ;;  %v253_v24 = vld [vmem:[%s862_s24] sm:$0xff] }
  0x1f   : > { %714 = vmatpush3.bf16.msra.mxu1 %v763_v7  ;;  %684 = vmatprep.subr.bf16.mxu0 %v764_v8  ;;  %v777_v21 = vld [vmem:[%s867_s28 + $0x30] sm:$0xff]   ;;  %v648_v25 = vcombine.high %v253_v24, %v253_v24  ;;  %v780_v26 = vld [vmem:[%s867_s28 + $0x38] sm:$0xff]   ;;  %v647_v28 = vcombine.low %v253_v24, %v253_v24  ;;  %v784_v29 = vld [vmem:[%s862_s24 + $0x8] ss:$0 sps:$4 sm:$0xff]  }
  0x20   : > { %715 = vmatprep.subr.bf16.mxu1 %v810_v2  ;;  %v778_v22 = vld [vmem:[%s867_s28 + $0xb0] sm:$0xff]   ;;  %v781_v27 = vld [vmem:[%s867_s28 + $0xb8] sm:$0xff]   ;;  %v252_v36 = vld [vmem:[#allocation2] sm:$0xff] }
  0x21   : > { %490 = vmatprep.mubr.bf16.mxu0 %v648_v25  ;;  %v675_v43 = vld [vmem:[%s917_s2] ss:$0 sm:$0xff] (!%p674_p7) }
  0x22   : > { %685 = vmatpush3.bf16.msra.mxu0 %v765_v9  ;;  %v676_v44 = vld [vmem:[%s918_s3] ss:$0 sm:$0xff] (!%p674_p7) }
  0x23   : > { %716 = vmatpush3.bf16.msra.mxu1 %v766_v10  ;;  %686 = vmatprep.subr.bf16.mxu0 %v767_v11 }
  0x24   : > { %717 = vmatprep.subr.bf16.mxu1 %v810_v2 }
  0x26   : > { %687 = vmatpush3.bf16.msra.mxu0 %v768_v12 }
  0x27   : > { %718 = vmatpush3.bf16.msra.mxu1 %v769_v13  ;;  %688 = vmatprep.subr.bf16.mxu0 %v770_v14 }
  0x28   : > { %719 = vmatprep.subr.bf16.mxu1 %v810_v2 }
  0x2a   : > { %689 = vmatpush3.bf16.msra.mxu0 %v771_v15 }
  0x2b   : > { %720 = vmatpush3.bf16.msra.mxu1 %v772_v16  ;;  %690 = vmatprep.subr.bf16.mxu0 %v773_v17 }
  0x2c   : > { %721 = vmatprep.subr.bf16.mxu1 %v810_v2 }
  0x2e   : > { %691 = vmatpush3.bf16.msra.mxu0 %v774_v18 }
  0x2f   : > { %722 = vmatpush3.bf16.msra.mxu1 %v775_v19  ;;  %692 = vmatprep.subr.bf16.mxu0 %v776_v20 }
  0x30   : > { %723 = vmatprep.subr.bf16.mxu1 %v810_v2 }
  0x32   : > { %693 = vmatpush3.bf16.msra.mxu0 %v777_v21 }
  0x33   : > { %724 = vmatpush3.bf16.msra.mxu1 %v778_v22  ;;  %694 = vmatprep.subr.bf16.mxu0 %v779_v23 }
  0x34   : > { %725 = vmatprep.subr.bf16.mxu1 %v810_v2 }
  0x36   : > { %695 = vmatpush3.bf16.msra.mxu0 %v780_v26 }
  0x37   : > { %726 = vmatpush3.bf16.msra.mxu1 %v781_v27 }
  0x39   : > { %491 = vmatmul.mubr.bf16.vlgmr.msra.gmra.mrb[0].mxu0 %v647_v28 }
  0x3a   : > { %728 = vmatmul.mubr.bf16.vlgmr.msra.gmra.mrb[0].mxu1 %v784_v29 }
 0x10c   : > { %v696_v30 = vpop.f32.mrb[0].mxu0 }
 0x10d   : > { %v532_v31 = vpop.f32.mrb[0].mxu1  ;;  %v697_v32 = vpop.f32.mrb[1].mxu0 }
 0x10e   : > { %v698_v33 = vadd.f32 %v697_v32, %v696_v30  ;;  %v729_v34 = vpop.f32.mrb[1].mxu1  ;;  %v699_v35 = vpop.f32.mrb[2].mxu0  ;;  %543 = sbr.rel (%p674_p7) target bundleno = 291 (0x123), region = 44 }
 0x10f   : > { %v535_v37 = vpop.f32.mrb[2].mxu1  ;;  %v700_v38 = vpop.f32.mrb[3].mxu0 }
 0x110   : > { %v533_v39 = vadd.f32 %v698_v33, %v532_v31  ;;  %v730_v40 = vpop.f32.mrb[3].mxu1 }
 0x112   : > { %v538_v41 = vadd.f32 %v533_v39, %v252_v36 }
 0x114   : > { %539 = vst [vmem:[#allocation2] sm:$0xff] %v538_v41 }
 0x11b   : > { %v544_v42 = vld [vmem:[#allocation2] sm:$0xff] }
 0x11c   : > { %v552_v45 = vmul.f32 %v675_v43, %v544_v42 }
 0x11e   : > { %v560_v46 = vadd.f32 %v676_v44, %v552_v45 }
 0x120   : > { %v561_v47 = vmax.f32 %v560_v46, 0.0 }
 0x122   : > { %562 = vst [vmem:[%s919_s4] sm:$0xff] %v561_v47 }
 0x123 PF: > { %s14_s17 = sadd.s32 1, %s807_s17   ;;  %s920_s15 = smov %s803_s16 }
 0x124   : > { %p11_p8 = scmp.ge.s32.totalorder %s14_s17, 5   ;;  %s921_s16 = smov %s923_s18 }
 0x126   :  { %13 = sbr.rel (!%p11_p8) target bundleno = 2 (0x2), region = 77 }

// kernel: _lambda_.41
= control target key start
LH: loop header
LB: loop body
LE: loop exit
PB: predicated region body
PF: predicated region fallthrough
CT: control target
= control target key end

     0   :  { %v476_v1 = vmov 0   ;;  %v325_v34 = vlaneseq  ;;  %s636_s1 = inlined_call_operand.vmem [shape: bf16[128,512], index: 1, kind: input, shape index: {}]   ;;  %s637_s0 = inlined_call_operand.vmem [shape: bf16[8,128], index: 0, kind: input, shape index: {}]   ;;  %s638_s2 = inlined_call_operand.vmem [shape: f32[1,512], index: 2, kind: input, shape index: {}]   ;;  %s639_s3 = inlined_call_operand.vmem [shape: f32[1,512], index: 3, kind: input, shape index: {}]   ;;  %s640_s4 = inlined_call_operand.vmem [shape: f32[8,512], index: 4, kind: input, shape index: {}]   ;;  %s641_s5 = inlined_call_operand.vmem [shape: f32[8,512], index: 5, kind: output, shape index: {}]  }
   0x1   :  { %v428_v0 = vld [vmem:[%s636_s1 + $0x4] ss:$16 sps:$4 sm:$0xff]   ;;  %258 = vmatprep.mubr.bf16.mxu0 %v476_v1  ;;  %299 = vmatprep.mubr.bf16.mxu1 %v476_v1  ;;  %v430_v2 = vld [vmem:[%s636_s1 + $0xc] ss:$16 sps:$4 sm:$0xff]   ;;  %v432_v3 = vld [vmem:[%s636_s1] ss:$16 sps:$4 sm:$0xff]  }
   0x2   :  { %226 = vmatprep.subr.bf16.mxu0 %v428_v0  ;;  %v433_v4 = vld [vmem:[%s636_s1 + $0x8] ss:$16 sps:$4 sm:$0xff]   ;;  %267 = vmatprep.subr.bf16.mxu1 %v430_v2  ;;  %v434_v5 = vld [vmem:[%s636_s1 + $0x24] ss:$16 sps:$4 sm:$0xff]   ;;  %v436_v6 = vld [vmem:[%s636_s1 + $0x2c] ss:$16 sps:$4 sm:$0xff]  }
   0x3   :  { %227 = vmatpush1.bf16.msra.mxu0 %v432_v3  ;;  %268 = vmatpush1.bf16.msra.mxu1 %v433_v4  ;;  %v438_v7 = vld [vmem:[%s636_s1 + $0x20] ss:$16 sps:$4 sm:$0xff]   ;;  %v439_v8 = vld [vmem:[%s636_s1 + $0x28] ss:$16 sps:$4 sm:$0xff]   ;;  %v440_v9 = vld [vmem:[%s636_s1 + $0x44] ss:$16 sps:$4 sm:$0xff]  }
   0x4   :  { %228 = vmatprep.subr.bf16.mxu0 %v434_v5  ;;  %269 = vmatprep.subr.bf16.mxu1 %v436_v6  ;;  %v442_v10 = vld [vmem:[%s636_s1 + $0x4c] ss:$16 sps:$4 sm:$0xff]   ;;  %v444_v11 = vld [vmem:[%s636_s1 + $0x40] ss:$16 sps:$4 sm:$0xff]   ;;  %v445_v12 = vld [vmem:[%s636_s1 + $0x48] ss:$16 sps:$4 sm:$0xff]  }
   0x5   :  { %v446_v13 = vld [vmem:[%s636_s1 + $0x64] ss:$16 sps:$4 sm:$0xff]   ;;  %v448_v14 = vld [vmem:[%s636_s1 + $0x6c] ss:$16 sps:$4 sm:$0xff]   ;;  %v450_v15 = vld [vmem:[%s636_s1 + $0x60] ss:$16 sps:$4 sm:$0xff]  }
   0x6   :  { %v451_v16 = vld [vmem:[%s636_s1 + $0x68] ss:$16 sps:$4 sm:$0xff]   ;;  %v452_v17 = vld [vmem:[%s636_s1 + $0x84] ss:$16 sps:$4 sm:$0xff]   ;;  %v454_v18 = vld [vmem:[%s636_s1 + $0x8c] ss:$16 sps:$4 sm:$0xff]  }
   0x7   :  { %229 = vmatpush1.bf16.msra.mxu0 %v438_v7  ;;  %270 = vmatpush1.bf16.msra.mxu1 %v439_v8  ;;  %v456_v19 = vld [vmem:[%s636_s1 + $0x80] ss:$16 sps:$4 sm:$0xff]   ;;  %v457_v20 = vld [vmem:[%s636_s1 + $0x88] ss:$16 sps:$4 sm:$0xff]   ;;  %v458_v21 = vld [vmem:[%s636_s1 + $0xa4] ss:$16 sps:$4 sm:$0xff]  }
   0x8   :  { %230 = vmatprep.subr.bf16.mxu0 %v440_v9  ;;  %271 = vmatprep.subr.bf16.mxu1 %v442_v10  ;;  %v460_v22 = vld [vmem:[%s636_s1 + $0xac] ss:$16 sps:$4 sm:$0xff]   ;;  %v462_v23 = vld [vmem:[%s636_s1 + $0xa0] ss:$16 sps:$4 sm:$0xff]   ;;  %v463_v24 = vld [vmem:[%s636_s1 + $0xa8] ss:$16 sps:$4 sm:$0xff]  }
   0x9   :  { %v464_v25 = vld [vmem:[%s636_s1 + $0xc4] ss:$16 sps:$4 sm:$0xff]   ;;  %v466_v26 = vld [vmem:[%s636_s1 + $0xcc] ss:$16 sps:$4 sm:$0xff]   ;;  %v468_v27 = vld [vmem:[%s636_s1 + $0xc0] ss:$16 sps:$4 sm:$0xff]  }
   0xa   :  { %v469_v28 = vld [vmem:[%s636_s1 + $0xc8] ss:$16 sps:$4 sm:$0xff]   ;;  %v470_v29 = vld [vmem:[%s636_s1 + $0xe4] ss:$16 sps:$4 sm:$0xff]   ;;  %v472_v30 = vld [vmem:[%s636_s1 + $0xec] ss:$16 sps:$4 sm:$0xff]  }
   0xb   :  { %231 = vmatpush1.bf16.msra.mxu0 %v444_v11  ;;  %272 = vmatpush1.bf16.msra.mxu1 %v445_v12  ;;  %v474_v31 = vld [vmem:[%s636_s1 + $0xe0] ss:$16 sps:$4 sm:$0xff]   ;;  %v475_v32 = vld [vmem:[%s636_s1 + $0xe8] ss:$16 sps:$4 sm:$0xff]   ;;  %v326_v35 = vshrl.u32 %v325_v34, 7 }
   0xc   :  { %232 = vmatprep.subr.bf16.mxu0 %v446_v13  ;;  %273 = vmatprep.subr.bf16.mxu1 %v448_v14  ;;  %v33_v33 = vld [vmem:[%s637_s0] sm:$0xf]  ;;  %v377_v57 = vld [vmem:[%s640_s4 + $0x10] sm:$0xff]  ;;  %v376_v0 = vld [vmem:[%s640_s4 + $0x8] sm:$0xff] }
   0xd   :  { %v327_v36 = vsub.s32 0, %v326_v35  ;;  %v335_v37 = vsub.s32 2, %v326_v35  ;;  %v323_v38 = vld [vmem:[%s638_s2] sm:$0xf]  ;;  %v331_v39 = vsub.s32 1, %v326_v35  ;;  %v339_v40 = vsub.s32 3, %v326_v35 }
   0xe   :  { %v349_v41 = vld [vmem:[%s639_s3] sm:$0xf]  ;;  %v378_v1 = vld [vmem:[%s640_s4 + $0x18] sm:$0xff] }
   0xf   :  { %233 = vmatpush1.bf16.msra.mxu0 %v450_v15  ;;  %274 = vmatpush1.bf16.msra.mxu1 %v451_v16  ;;  %v328_v42 = vrot.slane %v323_v38, %v327_v36  ;;  %v336_v43 = vrot.slane %v323_v38, %v335_v37  ;;  %v332_v44 = vrot.slane %v323_v38, %v331_v39  ;;  %v375_v56 = vld [vmem:[%s640_s4] sm:$0xff] }
  0x10   :  { %234 = vmatprep.subr.bf16.mxu0 %v452_v17  ;;  %275 = vmatprep.subr.bf16.mxu1 %v454_v18  ;;  %v340_v45 = vrot.slane %v323_v38, %v339_v40  ;;  %v354_v46 = vrot.slane %v349_v41, %v327_v36  ;;  %v362_v47 = vrot.slane %v349_v41, %v335_v37 }
  0x11   :  { %v358_v50 = vrot.slane %v349_v41, %v331_v39  ;;  %v366_v51 = vrot.slane %v349_v41, %v339_v40 }
  0x13   :  { %235 = vmatpush1.bf16.msra.mxu0 %v456_v19  ;;  %276 = vmatpush1.bf16.msra.mxu1 %v457_v20 }
  0x14   :  { %236 = vmatprep.subr.bf16.mxu0 %v458_v21  ;;  %277 = vmatprep.subr.bf16.mxu1 %v460_v22 }
  0x17   :  { %237 = vmatpush1.bf16.msra.mxu0 %v462_v23  ;;  %278 = vmatpush1.bf16.msra.mxu1 %v463_v24 }
  0x18   :  { %238 = vmatprep.subr.bf16.mxu0 %v464_v25  ;;  %279 = vmatprep.subr.bf16.mxu1 %v466_v26 }
  0x1b   :  { %239 = vmatpush1.bf16.msra.mxu0 %v468_v27  ;;  %280 = vmatpush1.bf16.msra.mxu1 %v469_v28 }
  0x1c   :  { %240 = vmatprep.subr.bf16.mxu0 %v470_v29  ;;  %281 = vmatprep.subr.bf16.mxu1 %v472_v30 }
  0x1f   :  { %241 = vmatpush1.bf16.msra.mxu0 %v474_v31  ;;  %282 = vmatpush1.bf16.msra.mxu1 %v475_v32 }
  0x22   :  { %259 = vmatmul.mubr.bf16.vlgmr.msra.gmra.mrb[0].mxu0 %v33_v33  ;;  %300 = vmatmul.mubr.bf16.vlgmr.msra.gmra.mrb[0].mxu1 %v33_v33 }
  0xf5   :  { %v260_v48 = vpop.f32.mrb[0].mxu0  ;;  %v301_v49 = vpop.f32.mrb[0].mxu1 }
  0xf6   :  { %v345_v52 = vmul.f32 %v328_v42, %v260_v48  ;;  %v347_v53 = vmul.f32 %v336_v43, %v301_v49  ;;  %v262_v54 = vpop.f32.mrb[1].mxu0  ;;  %v303_v55 = vpop.f32.mrb[1].mxu1 }
  0xf7   :  { %v346_v58 = vmul.f32 %v332_v44, %v262_v54  ;;  %v348_v59 = vmul.f32 %v340_v45, %v303_v55  ;;  %v264_v60 = vpop.f32.mrb[2].mxu0  ;;  %v305_v61 = vpop.f32.mrb[2].mxu1 }
  0xf8   :  { %v371_v62 = vadd.f32 %v354_v46, %v345_v52  ;;  %v373_v63 = vadd.f32 %v362_v47, %v347_v53  ;;  %v265_v2 = vpop.f32.mrb[3].mxu0  ;;  %v306_v3 = vpop.f32.mrb[3].mxu1 }
  0xf9   :  { %v372_v4 = vadd.f32 %v358_v50, %v346_v58  ;;  %v374_v5 = vadd.f32 %v366_v51, %v348_v59 }
  0xfa   :  { %v379_v6 = vadd.f32 %v375_v56, %v371_v62  ;;  %v381_v7 = vadd.f32 %v377_v57, %v373_v63 }
  0xfb   :  { %v380_v8 = vadd.f32 %v376_v0, %v372_v4  ;;  %v382_v9 = vadd.f32 %v378_v1, %v374_v5 }
  0xfc   :  { %v383_v10 = vmax.f32 %v379_v6, 0.0  ;;  %v385_v11 = vmax.f32 %v381_v7, 0.0 }
  0xfd   :  { %v384_v12 = vmax.f32 %v380_v8, 0.0  ;;  %v386_v13 = vmax.f32 %v382_v9, 0.0 }
  0xfe   :  { %387 = vst [vmem:[%s641_s5] sm:$0xff] %v383_v10  ;;  %389 = vst [vmem:[%s641_s5 + $0x10] sm:$0xff] %v385_v11 }
  0xff   :  { %388 = vst [vmem:[%s641_s5 + $0x8] sm:$0xff] %v384_v12  ;;  %390 = vst [vmem:[%s641_s5 + $0x18] sm:$0xff] %v386_v13 }

</bundles_post_ra>
